<compile_context>
chip_gen: v6e
topology: v6e:2x2x1
jax: 0.10.0
libtpu: 0.0.40
codegen_flags: <defaults>
</compile_context>

<pallas_src>
import functools

import jax
import jax.numpy as jnp
from jax import lax
from jax.experimental import pallas as pl
from jax.experimental.pallas import tpu as pltpu
import numpy as np


def _tablock_kernel(x_ref, xr_ref, wq_ref, bq_ref, wk_ref, bk_ref, wv_ref, bv_ref,
                    o_ref, *, strip, cdtype):
    """One TABlock on a (block_b, C, N) tile.

    Output layout is (block_b, N, C) with out[b,n,c] = (attn@v)[b,c,n] + x_flat_as_(N,C)[b,n,c],
    so the wrapper's free reshape back to (B,C,N) equals
    (attn @ v).transpose(1,2).reshape(B,C,N) + x  (the exact PyTorch result).
    """
    bt, C, N = x_ref.shape
    n_strips = C // strip

    # Grid-invariant weights (bf16) / biases (f32) — hoisted once per grid step.
    wq = wq_ref[...]
    wk = wk_ref[...]
    wv = wv_ref[...]
    bq = bq_ref[...]
    bk = bk_ref[...]
    bv = bv_ref[...]

    for b in range(bt):                                    # bt small & static -> unrolled
        # In-kernel f32 -> bf16 cast (VPU; hides under MXU). No wrapper-side cast pass.
        xb = x_ref[b].astype(cdtype)                       # (C, N)

        # Full K / V projections, f32 accumulation + bias, kept resident in bf16 for all
        # query strips. The attention scale N^-0.5 is already folded into Wq/bq.
        k = (jnp.dot(xb, wk, preferred_element_type=jnp.float32) + bk).astype(cdtype)   # (C, N)
        v = (jnp.dot(xb, wv, preferred_element_type=jnp.float32) + bv).astype(cdtype)   # (C, N)

        # Flash-style strip loop over query rows: bounds live f32 temps (s, p, yT) to
        # O(strip * C) instead of O(C * C) — required at production C (~3072) on v7x.
        for i in range(n_strips):
            r0 = i * strip
            xs = xb[r0:r0 + strip, :]                                                    # (S, N)
            q = (jnp.dot(xs, wq, preferred_element_type=jnp.float32) + bq).astype(cdtype)

            # Scores (S, C): contract over N of both operands (native trans-B MXU feed).
            s = lax.dot_general(q, k, (((1,), (1,)), ((), ())),
                                preferred_element_type=jnp.float32)

            # Numerically stable softmax in f32; reciprocal on the EUP slot.
            s = s - jnp.max(s, axis=-1, keepdims=True)
            p = jnp.exp(s)
            p = p * pl.reciprocal(jnp.sum(p, axis=-1, keepdims=True), approx=True)

            # y^T directly: contract v over its leading (C) dim -> (N, S). Avoids an
            # explicit f32 (S,N)->(N,S) XLU transpose in the epilogue.
            yT = lax.dot_general(v, p.astype(cdtype), (((0,), (1,)), ((), ())),
                                 preferred_element_type=jnp.float32)                    # (N, S)

            # Fused residual + store to a lane-dense column strip of the (N, C) output.
            o_ref[b, :, pl.ds(r0, strip)] = (
                yT + xr_ref[b, :, pl.ds(r0, strip)]).astype(o_ref.dtype)


def prepare_tablock_params(params, *, use_bf16=True):
    """One-time weight preprocessing (hoisted out of the per-call path).

    params: PyTorch-layout weights (out, in) + biases. Returns transposed (in, out) weights
    in the MXU compute dtype with the attention scale N^-0.5 folded into the q path.
    """
    cdtype = jnp.bfloat16 if use_bf16 else jnp.float32
    N = params["wq"].shape[0]
    scale = float(N) ** (-0.5)
    return {
        "wq_t": (jnp.asarray(params["wq"], jnp.float32).T * scale).astype(cdtype),
        "wk_t": jnp.asarray(params["wk"], jnp.float32).T.astype(cdtype),
        "wv_t": jnp.asarray(params["wv"], jnp.float32).T.astype(cdtype),
        "bq": (jnp.asarray(params["bq"], jnp.float32) * scale).reshape(1, N),
        "bk": jnp.asarray(params["bk"], jnp.float32).reshape(1, N),
        "bv": jnp.asarray(params["bv"], jnp.float32).reshape(1, N),
    }


def _pick_block_b(B, C, N, max_tile_bytes=6 * 1024 * 1024):
    # Prefer >= 4 grid steps when possible (>= 2 per v7x TensorCore, so the prologue DMA
    # hides behind compute) while keeping the f32 x / xr / out blocks to a few MB each.
    best = 1
    for cand in range(1, B + 1):
        if B % cand:
            continue
        if B // cand < min(4, B):
            continue
        if cand * C * N * 4 > max_tile_bytes:
            continue
        best = cand
    return best


def _pick_strip(C):
    # 128–256 query rows per strip; MXU-dense and a full-lane output store width.
    if C % 256 == 0 and C > 256:
        return 256
    if C % 128 == 0 and C > 128:
        return 128
    return C


def tablock_forward(x, prep, *, use_buffered=True):
    """One TABlock forward. x: (B, C, N) float32; prep: prepare_tablock_params() output."""
    B, C, N = x.shape
    assert prep["wq_t"].shape == (N, N)
    out_dtype = x.dtype
    cdtype = prep["wq_t"].dtype

    block_b = _pick_block_b(B, C, N)
    strip = _pick_strip(C)
    grid = (B // block_b,)

    # Same f32 HBM buffer, two views: (B,C,N) for the matmuls, (B,N,C) for the fused
    # shuffle+residual. No wrapper-side dtype cast pass over x.
    x_resid = x.reshape(B, N, C)

    if use_buffered:
        # Grid-invariant blocks: single-buffered (no pointless double-buffering of weights).
        w_spec = pl.BlockSpec((N, N), lambda i: (0, 0), pipeline_mode=pl.Buffered(1))
        b_spec = pl.BlockSpec((1, N), lambda i: (0, 0), pipeline_mode=pl.Buffered(1))
    else:
        w_spec = pl.BlockSpec((N, N), lambda i: (0, 0))
        b_spec = pl.BlockSpec((1, N), lambda i: (0, 0))

    kernel = functools.partial(_tablock_kernel, strip=strip, cdtype=cdtype)

    out = pl.pallas_call(
        kernel,
        out_shape=jax.ShapeDtypeStruct((B, N, C), out_dtype),
        grid_spec=pltpu.PrefetchScalarGridSpec(
            num_scalar_prefetch=0,
            grid=grid,
            in_specs=[
                pl.BlockSpec((block_b, C, N), lambda i: (i, 0, 0)),   # x (f32, cast in-kernel)
                pl.BlockSpec((block_b, N, C), lambda i: (i, 0, 0)),   # x viewed (B,N,C), residual
                w_spec, b_spec,                                       # Wq, bq (scale folded)
                w_spec, b_spec,                                       # Wk, bk
                w_spec, b_spec,                                       # Wv, bv
            ],
            out_specs=pl.BlockSpec((block_b, N, C), lambda i: (i, 0, 0)),
        ),
        compiler_params=pltpu.CompilerParams(
            dimension_semantics=("parallel",),
            # Sized for the real production footprint (C~3072, N~784 with strip loop);
            # stays below v7x's 64 MiB physical VMEM, well above the 16/32 MiB defaults.
            vmem_limit_bytes=48 * 1024 * 1024,
        ),
    )(x, x_resid, prep["wq_t"], prep["bq"], prep["wk_t"], prep["bk"], prep["wv_t"], prep["bv"])

    # Kernel already produced the shuffled + residual result in (B, N, C) layout; this
    # reshape back to (B, C, N) is a free row-major reinterpretation.
    return out.reshape(B, C, N)


def tablock_chain(x, preps, *, use_buffered=True):
    """Sequential TABlocks (num_tab=2 in MANIQA3Stages)."""
    out = x
    for prep in preps:
        out = tablock_forward(out, prep, use_buffered=use_buffered)
    return out


def _reference(x, params):
    """Pure-JAX f32 reference mirroring the PyTorch TABlock forward exactly."""
    B, C, N = x.shape
    scale = float(N) ** (-0.5)
    q = x @ params["wq"].T + params["bq"]
    k = x @ params["wk"].T + params["bk"]
    v = x @ params["wv"].T + params["bv"]
    attn = jnp.einsum("bcn,bdn->bcd", q, k) * scale
    attn = jax.nn.softmax(attn, axis=-1)
    y = jnp.einsum("bcd,bdn->bcn", attn, v)
    y = jnp.transpose(y, (0, 2, 1)).reshape(B, C, N)
    return y + x


def _init_params(key, dim):
    # Deterministic init mimicking nn.Linear default: uniform(-1/sqrt(dim), 1/sqrt(dim)).
    bound = 1.0 / np.sqrt(dim)
    ks = jax.random.split(key, 6)
    return {
        "wq": jax.random.uniform(ks[0], (dim, dim), jnp.float32, -bound, bound),
        "bq": jax.random.uniform(ks[1], (dim,), jnp.float32, -bound, bound),
        "wk": jax.random.uniform(ks[2], (dim, dim), jnp.float32, -bound, bound),
        "bk": jax.random.uniform(ks[3], (dim,), jnp.float32, -bound, bound),
        "wv": jax.random.uniform(ks[4], (dim, dim), jnp.float32, -bound, bound),
        "bv": jax.random.uniform(ks[5], (dim,), jnp.float32, -bound, bound),
    }


if __name__ == "__main__":
    # Small but lane-/MXU-dense shapes consistent with the module (C != N exercises the
    # general transpose(1,2).reshape path; C=256 exercises the 2-strip inner loop):
    #   C = channel/token count of the TABlock, N = dim = input_size**2.
    B, C, N = 4, 256, 128
    key = jax.random.PRNGKey(0)
    kx, k1, k2 = jax.random.split(key, 3)
    x = jax.random.normal(kx, (B, C, N), jnp.float32)
    params1 = _init_params(k1, N)
    params2 = _init_params(k2, N)

    # One-time weight preprocessing (hoisted out of the per-call path).
    preps = (prepare_tablock_params(params1, use_bf16=True),
             prepare_tablock_params(params2, use_bf16=True))

    chain = jax.jit(tablock_chain, static_argnames=("use_buffered",))
    try:
        out = jax.block_until_ready(chain(x, preps, use_buffered=True))
    except Exception:
        # Fallback if pl.Buffered(1) single-buffering is rejected by this JAX/Mosaic build.
        out = jax.block_until_ready(chain(x, preps, use_buffered=False))

    ref = x
    for p in (params1, params2):
        ref = _reference(ref, p)

    # bf16 MXU inputs + approx EUP reciprocal over a 2-block chain -> loosened tolerances.
    np.testing.assert_allclose(np.asarray(out), np.asarray(ref), rtol=5e-2, atol=5e-2)

    print("KERNEL_OK")
</pallas_src>

<mosaic_0001>
module attributes {stable_mosaic.version = 11 : i64} {
  func.func @_tablock_kernel(%arg0: i32, %arg1: memref<1x256x128xf32, #tpu.memory_space<vmem>>, %arg2: memref<1x128x256xf32, #tpu.memory_space<vmem>>, %arg3: memref<128x128xbf16, #tpu.memory_space<vmem>>, %arg4: memref<1x128xf32, #tpu.memory_space<vmem>>, %arg5: memref<128x128xbf16, #tpu.memory_space<vmem>>, %arg6: memref<1x128xf32, #tpu.memory_space<vmem>>, %arg7: memref<128x128xbf16, #tpu.memory_space<vmem>>, %arg8: memref<1x128xf32, #tpu.memory_space<vmem>>, %arg9: memref<1x128x256xf32, #tpu.memory_space<vmem>>) attributes {dimension_semantics = [#tpu.dimension_semantics<parallel>], iteration_bounds = array<i64: 4>, scalar_prefetch = 0 : i64, scratch_operands = 0 : i64, tpu.core_type = #tpu.core_type<tc>, window_params = [{transform_indices = @transform_0, window_bounds = array<i64: 1, 256, 128>}, {transform_indices = @transform_1, window_bounds = array<i64: 1, 128, 256>}, {pipeline_mode = #tpu.pipeline_mode<synchronous>, transform_indices = @transform_2, window_bounds = array<i64: 128, 128>}, {pipeline_mode = #tpu.pipeline_mode<synchronous>, transform_indices = @transform_3, window_bounds = array<i64: 1, 128>}, {pipeline_mode = #tpu.pipeline_mode<synchronous>, transform_indices = @transform_4, window_bounds = array<i64: 128, 128>}, {pipeline_mode = #tpu.pipeline_mode<synchronous>, transform_indices = @transform_5, window_bounds = array<i64: 1, 128>}, {pipeline_mode = #tpu.pipeline_mode<synchronous>, transform_indices = @transform_6, window_bounds = array<i64: 128, 128>}, {pipeline_mode = #tpu.pipeline_mode<synchronous>, transform_indices = @transform_7, window_bounds = array<i64: 1, 128>}, {transform_indices = @transform_8, window_bounds = array<i64: 1, 128, 256>}]} {
    %c0 = arith.constant 0 : index
    %c0_0 = arith.constant 0 : index
    %0 = vector.load %arg3[%c0, %c0_0] : memref<128x128xbf16, #tpu.memory_space<vmem>>, vector<128x128xbf16>
    %c0_1 = arith.constant 0 : index
    %c0_2 = arith.constant 0 : index
    %1 = vector.load %arg5[%c0_1, %c0_2] : memref<128x128xbf16, #tpu.memory_space<vmem>>, vector<128x128xbf16>
    %c0_3 = arith.constant 0 : index
    %c0_4 = arith.constant 0 : index
    %2 = vector.load %arg7[%c0_3, %c0_4] : memref<128x128xbf16, #tpu.memory_space<vmem>>, vector<128x128xbf16>
    %c0_5 = arith.constant 0 : index
    %c0_6 = arith.constant 0 : index
    %3 = vector.load %arg4[%c0_5, %c0_6] : memref<1x128xf32, #tpu.memory_space<vmem>>, vector<1x128xf32>
    %c0_7 = arith.constant 0 : index
    %c0_8 = arith.constant 0 : index
    %4 = vector.load %arg6[%c0_7, %c0_8] : memref<1x128xf32, #tpu.memory_space<vmem>>, vector<1x128xf32>
    %c0_9 = arith.constant 0 : index
    %c0_10 = arith.constant 0 : index
    %5 = vector.load %arg8[%c0_9, %c0_10] : memref<1x128xf32, #tpu.memory_space<vmem>>, vector<1x128xf32>
    %c0_11 = arith.constant 0 : index
    %c0_12 = arith.constant 0 : index
    %c0_13 = arith.constant 0 : index
    %6 = vector.load %arg1[%c0_11, %c0_12, %c0_13] : memref<1x256x128xf32, #tpu.memory_space<vmem>>, vector<1x256x128xf32>
    %7 = vector.shape_cast %6 : vector<1x256x128xf32> to vector<256x128xf32>
    %8 = arith.truncf %7 : vector<256x128xf32> to vector<256x128xbf16>
    %cst = arith.constant dense<0.000000e+00> : vector<256x128xf32>
    %9 = tpu.matmul %8, %1, %cst {dimension_numbers = #tpu.dot_dimension_numbers<[1], [0], [0], [1], [0, 0, 1, 1], [], []>} : vector<256x128xbf16>, vector<128x128xbf16>, vector<256x128xf32> -> vector<256x128xf32>
    %10 = vector.broadcast %4 : vector<1x128xf32> to vector<256x128xf32>
    %11 = arith.addf %9, %10 : vector<256x128xf32>
    %12 = arith.truncf %11 : vector<256x128xf32> to vector<256x128xbf16>
    %cst_14 = arith.constant dense<0.000000e+00> : vector<256x128xf32>
    %13 = tpu.matmul %8, %2, %cst_14 {dimension_numbers = #tpu.dot_dimension_numbers<[1], [0], [0], [1], [0, 0, 1, 1], [], []>} : vector<256x128xbf16>, vector<128x128xbf16>, vector<256x128xf32> -> vector<256x128xf32>
    %14 = vector.broadcast %5 : vector<1x128xf32> to vector<256x128xf32>
    %15 = arith.addf %13, %14 : vector<256x128xf32>
    %16 = arith.truncf %15 : vector<256x128xf32> to vector<256x128xbf16>
    %17 = vector.extract_strided_slice %8 {offsets = [0, 0], sizes = [128, 128], strides = [1, 1]} : vector<256x128xbf16> to vector<128x128xbf16>
    %cst_15 = arith.constant dense<0.000000e+00> : vector<128x128xf32>
    %18 = tpu.matmul %17, %0, %cst_15 {dimension_numbers = #tpu.dot_dimension_numbers<[1], [0], [0], [1], [0, 0, 1, 1], [], []>} : vector<128x128xbf16>, vector<128x128xbf16>, vector<128x128xf32> -> vector<128x128xf32>
    %19 = vector.broadcast %3 : vector<1x128xf32> to vector<128x128xf32>
    %20 = arith.addf %18, %19 : vector<128x128xf32>
    %21 = arith.truncf %20 : vector<128x128xf32> to vector<128x128xbf16>
    %cst_16 = arith.constant dense<0.000000e+00> : vector<128x256xf32>
    %22 = tpu.matmul %21, %12, %cst_16 {dimension_numbers = #tpu.dot_dimension_numbers<[1], [1], [0], [0], [0, 0, 1, 0], [], []>} : vector<128x128xbf16>, vector<256x128xbf16>, vector<128x256xf32> -> vector<128x256xf32>
    %cst_17 = arith.constant dense<0xFF800000> : vector<128xf32>
    %23 = vector.multi_reduction <maximumf>, %22, %cst_17 [1] : vector<128x256xf32> to vector<128xf32>
    %24 = vector.shape_cast %23 : vector<128xf32> to vector<128x1xf32>
    %25 = vector.broadcast %24 : vector<128x1xf32> to vector<128x256xf32>
    %26 = arith.subf %22, %25 : vector<128x256xf32>
    %27 = math.exp %26 : vector<128x256xf32>
    %cst_18 = arith.constant dense<0.000000e+00> : vector<128xf32>
    %28 = vector.multi_reduction <add>, %27, %cst_18 [1] : vector<128x256xf32> to vector<128xf32>
    %29 = vector.shape_cast %28 : vector<128xf32> to vector<128x1xf32>
    %30 = tpu.reciprocal %29 {approx = true} : vector<128x1xf32> -> vector<128x1xf32>
    %31 = vector.broadcast %30 : vector<128x1xf32> to vector<128x256xf32>
    %32 = arith.mulf %27, %31 : vector<128x256xf32>
    %33 = arith.truncf %32 : vector<128x256xf32> to vector<128x256xbf16>
    %cst_19 = arith.constant dense<0.000000e+00> : vector<128x128xf32>
    %34 = tpu.matmul %16, %33, %cst_19 {dimension_numbers = #tpu.dot_dimension_numbers<[0], [1], [1], [0], [0, 1, 1, 0], [], []>} : vector<256x128xbf16>, vector<128x256xbf16>, vector<128x128xf32> -> vector<128x128xf32>
    %c0_20 = arith.constant 0 : index
    %c0_21 = arith.constant 0 : index
    %c0_22 = arith.constant 0 : index
    %35 = vector.load %arg2[%c0_20, %c0_21, %c0_22] : memref<1x128x256xf32, #tpu.memory_space<vmem>>, vector<1x128x128xf32>
    %36 = vector.shape_cast %35 : vector<1x128x128xf32> to vector<128x128xf32>
    %37 = arith.addf %34, %36 : vector<128x128xf32>
    %c0_23 = arith.constant 0 : index
    %c0_24 = arith.constant 0 : index
    %c0_25 = arith.constant 0 : index
    %38 = vector.load %arg9[%c0_23, %c0_24, %c0_25] : memref<1x128x256xf32, #tpu.memory_space<vmem>>, vector<1x128x128xf32>
    %39 = vector.shape_cast %38 : vector<1x128x128xf32> to vector<128x128xf32>
    %40 = vector.shape_cast %37 : vector<128x128xf32> to vector<1x128x128xf32>
    tpu.vector_store %arg9[%c0_23, %c0_24, %c0_25], %40 {strides = array<i32>} : memref<1x128x256xf32, #tpu.memory_space<vmem>>, vector<1x128x128xf32>,
    %41 = vector.extract_strided_slice %8 {offsets = [128, 0], sizes = [128, 128], strides = [1, 1]} : vector<256x128xbf16> to vector<128x128xbf16>
    %cst_26 = arith.constant dense<0.000000e+00> : vector<128x128xf32>
    %42 = tpu.matmul %41, %0, %cst_26 {dimension_numbers = #tpu.dot_dimension_numbers<[1], [0], [0], [1], [0, 0, 1, 1], [], []>} : vector<128x128xbf16>, vector<128x128xbf16>, vector<128x128xf32> -> vector<128x128xf32>
    %43 = vector.broadcast %3 : vector<1x128xf32> to vector<128x128xf32>
    %44 = arith.addf %42, %43 : vector<128x128xf32>
    %45 = arith.truncf %44 : vector<128x128xf32> to vector<128x128xbf16>
    %cst_27 = arith.constant dense<0.000000e+00> : vector<128x256xf32>
    %46 = tpu.matmul %45, %12, %cst_27 {dimension_numbers = #tpu.dot_dimension_numbers<[1], [1], [0], [0], [0, 0, 1, 0], [], []>} : vector<128x128xbf16>, vector<256x128xbf16>, vector<128x256xf32> -> vector<128x256xf32>
    %cst_28 = arith.constant dense<0xFF800000> : vector<128xf32>
    %47 = vector.multi_reduction <maximumf>, %46, %cst_28 [1] : vector<128x256xf32> to vector<128xf32>
    %48 = vector.shape_cast %47 : vector<128xf32> to vector<128x1xf32>
    %49 = vector.broadcast %48 : vector<128x1xf32> to vector<128x256xf32>
    %50 = arith.subf %46, %49 : vector<128x256xf32>
    %51 = math.exp %50 : vector<128x256xf32>
    %cst_29 = arith.constant dense<0.000000e+00> : vector<128xf32>
    %52 = vector.multi_reduction <add>, %51, %cst_29 [1] : vector<128x256xf32> to vector<128xf32>
    %53 = vector.shape_cast %52 : vector<128xf32> to vector<128x1xf32>
    %54 = tpu.reciprocal %53 {approx = true} : vector<128x1xf32> -> vector<128x1xf32>
    %55 = vector.broadcast %54 : vector<128x1xf32> to vector<128x256xf32>
    %56 = arith.mulf %51, %55 : vector<128x256xf32>
    %57 = arith.truncf %56 : vector<128x256xf32> to vector<128x256xbf16>
    %cst_30 = arith.constant dense<0.000000e+00> : vector<128x128xf32>
    %58 = tpu.matmul %16, %57, %cst_30 {dimension_numbers = #tpu.dot_dimension_numbers<[0], [1], [1], [0], [0, 1, 1, 0], [], []>} : vector<256x128xbf16>, vector<128x256xbf16>, vector<128x128xf32> -> vector<128x128xf32>
    %c0_31 = arith.constant 0 : index
    %c0_32 = arith.constant 0 : index
    %c128 = arith.constant 128 : index
    %59 = vector.load %arg2[%c0_31, %c0_32, %c128] : memref<1x128x256xf32, #tpu.memory_space<vmem>>, vector<1x128x128xf32>
    %60 = vector.shape_cast %59 : vector<1x128x128xf32> to vector<128x128xf32>
    %61 = arith.addf %58, %60 : vector<128x128xf32>
    %c0_33 = arith.constant 0 : index
    %c0_34 = arith.constant 0 : index
    %c128_35 = arith.constant 128 : index
    %62 = vector.load %arg9[%c0_33, %c0_34, %c128_35] : memref<1x128x256xf32, #tpu.memory_space<vmem>>, vector<1x128x128xf32>
    %63 = vector.shape_cast %62 : vector<1x128x128xf32> to vector<128x128xf32>
    %64 = vector.shape_cast %61 : vector<128x128xf32> to vector<1x128x128xf32>
    tpu.vector_store %arg9[%c0_33, %c0_34, %c128_35], %64 {strides = array<i32>} : memref<1x128x256xf32, #tpu.memory_space<vmem>>, vector<1x128x128xf32>,
    return
  }
  func.func @transform_0(%arg0: i32) -> (i32, i32, i32) {
    %c0_i32 = arith.constant 0 : i32
    %c0_i32_0 = arith.constant 0 : i32
    %c0_i32_1 = arith.constant 0 : i32
    return %arg0, %c0_i32, %c0_i32_0 : i32, i32, i32
  }
  func.func @transform_1(%arg0: i32) -> (i32, i32, i32) {
    %c0_i32 = arith.constant 0 : i32
    %c0_i32_0 = arith.constant 0 : i32
    %c0_i32_1 = arith.constant 0 : i32
    return %arg0, %c0_i32, %c0_i32_0 : i32, i32, i32
  }
  func.func @transform_2(%arg0: i32) -> (i32, i32) {
    %c0_i32 = arith.constant 0 : i32
    %c0_i32_0 = arith.constant 0 : i32
    %c0_i32_1 = arith.constant 0 : i32
    return %c0_i32, %c0_i32_0 : i32, i32
  }
  func.func @transform_3(%arg0: i32) -> (i32, i32) {
    %c0_i32 = arith.constant 0 : i32
    %c0_i32_0 = arith.constant 0 : i32
    %c0_i32_1 = arith.constant 0 : i32
    return %c0_i32, %c0_i32_0 : i32, i32
  }
  func.func @transform_4(%arg0: i32) -> (i32, i32) {
    %c0_i32 = arith.constant 0 : i32
    %c0_i32_0 = arith.constant 0 : i32
    %c0_i32_1 = arith.constant 0 : i32
    return %c0_i32, %c0_i32_0 : i32, i32
  }
  func.func @transform_5(%arg0: i32) -> (i32, i32) {
    %c0_i32 = arith.constant 0 : i32
    %c0_i32_0 = arith.constant 0 : i32
    %c0_i32_1 = arith.constant 0 : i32
    return %c0_i32, %c0_i32_0 : i32, i32
  }
  func.func @transform_6(%arg0: i32) -> (i32, i32) {
    %c0_i32 = arith.constant 0 : i32
    %c0_i32_0 = arith.constant 0 : i32
    %c0_i32_1 = arith.constant 0 : i32
    return %c0_i32, %c0_i32_0 : i32, i32
  }
  func.func @transform_7(%arg0: i32) -> (i32, i32) {
    %c0_i32 = arith.constant 0 : i32
    %c0_i32_0 = arith.constant 0 : i32
    %c0_i32_1 = arith.constant 0 : i32
    return %c0_i32, %c0_i32_0 : i32, i32
  }
  func.func @transform_8(%arg0: i32) -> (i32, i32, i32) {
    %c0_i32 = arith.constant 0 : i32
    %c0_i32_0 = arith.constant 0 : i32
    %c0_i32_1 = arith.constant 0 : i32
    return %arg0, %c0_i32, %c0_i32_0 : i32, i32, i32
  }
}

module attributes {stable_mosaic.version = 11 : i64} {
  func.func @_tablock_kernel(%arg0: i32, %arg1: memref<1x256x128xf32, #tpu.memory_space<vmem>>, %arg2: memref<1x128x256xf32, #tpu.memory_space<vmem>>, %arg3: memref<128x128xbf16, #tpu.memory_space<vmem>>, %arg4: memref<1x128xf32, #tpu.memory_space<vmem>>, %arg5: memref<128x128xbf16, #tpu.memory_space<vmem>>, %arg6: memref<1x128xf32, #tpu.memory_space<vmem>>, %arg7: memref<128x128xbf16, #tpu.memory_space<vmem>>, %arg8: memref<1x128xf32, #tpu.memory_space<vmem>>, %arg9: memref<1x128x256xf32, #tpu.memory_space<vmem>>) attributes {dimension_semantics = [#tpu.dimension_semantics<parallel>], iteration_bounds = array<i64: 4>, scalar_prefetch = 0 : i64, scratch_operands = 0 : i64, tpu.core_type = #tpu.core_type<tc>, window_params = [{transform_indices = @transform_0, window_bounds = array<i64: 1, 256, 128>}, {transform_indices = @transform_1, window_bounds = array<i64: 1, 128, 256>}, {pipeline_mode = #tpu.pipeline_mode<synchronous>, transform_indices = @transform_2, window_bounds = array<i64: 128, 128>}, {pipeline_mode = #tpu.pipeline_mode<synchronous>, transform_indices = @transform_3, window_bounds = array<i64: 1, 128>}, {pipeline_mode = #tpu.pipeline_mode<synchronous>, transform_indices = @transform_4, window_bounds = array<i64: 128, 128>}, {pipeline_mode = #tpu.pipeline_mode<synchronous>, transform_indices = @transform_5, window_bounds = array<i64: 1, 128>}, {pipeline_mode = #tpu.pipeline_mode<synchronous>, transform_indices = @transform_6, window_bounds = array<i64: 128, 128>}, {pipeline_mode = #tpu.pipeline_mode<synchronous>, transform_indices = @transform_7, window_bounds = array<i64: 1, 128>}, {transform_indices = @transform_8, window_bounds = array<i64: 1, 128, 256>}]} {
    %c0 = arith.constant 0 : index
    %c0_0 = arith.constant 0 : index
    %0 = vector.load %arg3[%c0, %c0_0] : memref<128x128xbf16, #tpu.memory_space<vmem>>, vector<128x128xbf16>
    %c0_1 = arith.constant 0 : index
    %c0_2 = arith.constant 0 : index
    %1 = vector.load %arg5[%c0_1, %c0_2] : memref<128x128xbf16, #tpu.memory_space<vmem>>, vector<128x128xbf16>
    %c0_3 = arith.constant 0 : index
    %c0_4 = arith.constant 0 : index
    %2 = vector.load %arg7[%c0_3, %c0_4] : memref<128x128xbf16, #tpu.memory_space<vmem>>, vector<128x128xbf16>
    %c0_5 = arith.constant 0 : index
    %c0_6 = arith.constant 0 : index
    %3 = vector.load %arg4[%c0_5, %c0_6] : memref<1x128xf32, #tpu.memory_space<vmem>>, vector<1x128xf32>
    %c0_7 = arith.constant 0 : index
    %c0_8 = arith.constant 0 : index
    %4 = vector.load %arg6[%c0_7, %c0_8] : memref<1x128xf32, #tpu.memory_space<vmem>>, vector<1x128xf32>
    %c0_9 = arith.constant 0 : index
    %c0_10 = arith.constant 0 : index
    %5 = vector.load %arg8[%c0_9, %c0_10] : memref<1x128xf32, #tpu.memory_space<vmem>>, vector<1x128xf32>
    %c0_11 = arith.constant 0 : index
    %c0_12 = arith.constant 0 : index
    %c0_13 = arith.constant 0 : index
    %6 = vector.load %arg1[%c0_11, %c0_12, %c0_13] : memref<1x256x128xf32, #tpu.memory_space<vmem>>, vector<1x256x128xf32>
    %7 = vector.shape_cast %6 : vector<1x256x128xf32> to vector<256x128xf32>
    %8 = arith.truncf %7 : vector<256x128xf32> to vector<256x128xbf16>
    %cst = arith.constant dense<0.000000e+00> : vector<256x128xf32>
    %9 = tpu.matmul %8, %1, %cst {dimension_numbers = #tpu.dot_dimension_numbers<[1], [0], [0], [1], [0, 0, 1, 1], [], []>} : vector<256x128xbf16>, vector<128x128xbf16>, vector<256x128xf32> -> vector<256x128xf32>
    %10 = vector.broadcast %4 : vector<1x128xf32> to vector<256x128xf32>
    %11 = arith.addf %9, %10 : vector<256x128xf32>
    %12 = arith.truncf %11 : vector<256x128xf32> to vector<256x128xbf16>
    %cst_14 = arith.constant dense<0.000000e+00> : vector<256x128xf32>
    %13 = tpu.matmul %8, %2, %cst_14 {dimension_numbers = #tpu.dot_dimension_numbers<[1], [0], [0], [1], [0, 0, 1, 1], [], []>} : vector<256x128xbf16>, vector<128x128xbf16>, vector<256x128xf32> -> vector<256x128xf32>
    %14 = vector.broadcast %5 : vector<1x128xf32> to vector<256x128xf32>
    %15 = arith.addf %13, %14 : vector<256x128xf32>
    %16 = arith.truncf %15 : vector<256x128xf32> to vector<256x128xbf16>
    %17 = vector.extract_strided_slice %8 {offsets = [0, 0], sizes = [128, 128], strides = [1, 1]} : vector<256x128xbf16> to vector<128x128xbf16>
    %cst_15 = arith.constant dense<0.000000e+00> : vector<128x128xf32>
    %18 = tpu.matmul %17, %0, %cst_15 {dimension_numbers = #tpu.dot_dimension_numbers<[1], [0], [0], [1], [0, 0, 1, 1], [], []>} : vector<128x128xbf16>, vector<128x128xbf16>, vector<128x128xf32> -> vector<128x128xf32>
    %19 = vector.broadcast %3 : vector<1x128xf32> to vector<128x128xf32>
    %20 = arith.addf %18, %19 : vector<128x128xf32>
    %21 = arith.truncf %20 : vector<128x128xf32> to vector<128x128xbf16>
    %cst_16 = arith.constant dense<0.000000e+00> : vector<128x256xf32>
    %22 = tpu.matmul %21, %12, %cst_16 {dimension_numbers = #tpu.dot_dimension_numbers<[1], [1], [0], [0], [0, 0, 1, 0], [], []>} : vector<128x128xbf16>, vector<256x128xbf16>, vector<128x256xf32> -> vector<128x256xf32>
    %cst_17 = arith.constant dense<0xFF800000> : vector<128xf32>
    %23 = vector.multi_reduction <maximumf>, %22, %cst_17 [1] : vector<128x256xf32> to vector<128xf32>
    %24 = vector.shape_cast %23 : vector<128xf32> to vector<128x1xf32>
    %25 = vector.broadcast %24 : vector<128x1xf32> to vector<128x256xf32>
    %26 = arith.subf %22, %25 : vector<128x256xf32>
    %27 = math.exp %26 : vector<128x256xf32>
    %cst_18 = arith.constant dense<0.000000e+00> : vector<128xf32>
    %28 = vector.multi_reduction <add>, %27, %cst_18 [1] : vector<128x256xf32> to vector<128xf32>
    %29 = vector.shape_cast %28 : vector<128xf32> to vector<128x1xf32>
    %30 = tpu.reciprocal %29 {approx = true} : vector<128x1xf32> -> vector<128x1xf32>
    %31 = vector.broadcast %30 : vector<128x1xf32> to vector<128x256xf32>
    %32 = arith.mulf %27, %31 : vector<128x256xf32>
    %33 = arith.truncf %32 : vector<128x256xf32> to vector<128x256xbf16>
    %cst_19 = arith.constant dense<0.000000e+00> : vector<128x128xf32>
    %34 = tpu.matmul %16, %33, %cst_19 {dimension_numbers = #tpu.dot_dimension_numbers<[0], [1], [1], [0], [0, 1, 1, 0], [], []>} : vector<256x128xbf16>, vector<128x256xbf16>, vector<128x128xf32> -> vector<128x128xf32>
    %c0_20 = arith.constant 0 : index
    %c0_21 = arith.constant 0 : index
    %c0_22 = arith.constant 0 : index
    %35 = vector.load %arg2[%c0_20, %c0_21, %c0_22] : memref<1x128x256xf32, #tpu.memory_space<vmem>>, vector<1x128x128xf32>
    %36 = vector.shape_cast %35 : vector<1x128x128xf32> to vector<128x128xf32>
    %37 = arith.addf %34, %36 : vector<128x128xf32>
    %c0_23 = arith.constant 0 : index
    %c0_24 = arith.constant 0 : index
    %c0_25 = arith.constant 0 : index
    %38 = vector.load %arg9[%c0_23, %c0_24, %c0_25] : memref<1x128x256xf32, #tpu.memory_space<vmem>>, vector<1x128x128xf32>
    %39 = vector.shape_cast %38 : vector<1x128x128xf32> to vector<128x128xf32>
    %40 = vector.shape_cast %37 : vector<128x128xf32> to vector<1x128x128xf32>
    tpu.vector_store %arg9[%c0_23, %c0_24, %c0_25], %40 {strides = array<i32>} : memref<1x128x256xf32, #tpu.memory_space<vmem>>, vector<1x128x128xf32>,
    %41 = vector.extract_strided_slice %8 {offsets = [128, 0], sizes = [128, 128], strides = [1, 1]} : vector<256x128xbf16> to vector<128x128xbf16>
    %cst_26 = arith.constant dense<0.000000e+00> : vector<128x128xf32>
    %42 = tpu.matmul %41, %0, %cst_26 {dimension_numbers = #tpu.dot_dimension_numbers<[1], [0], [0], [1], [0, 0, 1, 1], [], []>} : vector<128x128xbf16>, vector<128x128xbf16>, vector<128x128xf32> -> vector<128x128xf32>
    %43 = vector.broadcast %3 : vector<1x128xf32> to vector<128x128xf32>
    %44 = arith.addf %42, %43 : vector<128x128xf32>
    %45 = arith.truncf %44 : vector<128x128xf32> to vector<128x128xbf16>
    %cst_27 = arith.constant dense<0.000000e+00> : vector<128x256xf32>
    %46 = tpu.matmul %45, %12, %cst_27 {dimension_numbers = #tpu.dot_dimension_numbers<[1], [1], [0], [0], [0, 0, 1, 0], [], []>} : vector<128x128xbf16>, vector<256x128xbf16>, vector<128x256xf32> -> vector<128x256xf32>
    %cst_28 = arith.constant dense<0xFF800000> : vector<128xf32>
    %47 = vector.multi_reduction <maximumf>, %46, %cst_28 [1] : vector<128x256xf32> to vector<128xf32>
    %48 = vector.shape_cast %47 : vector<128xf32> to vector<128x1xf32>
    %49 = vector.broadcast %48 : vector<128x1xf32> to vector<128x256xf32>
    %50 = arith.subf %46, %49 : vector<128x256xf32>
    %51 = math.exp %50 : vector<128x256xf32>
    %cst_29 = arith.constant dense<0.000000e+00> : vector<128xf32>
    %52 = vector.multi_reduction <add>, %51, %cst_29 [1] : vector<128x256xf32> to vector<128xf32>
    %53 = vector.shape_cast %52 : vector<128xf32> to vector<128x1xf32>
    %54 = tpu.reciprocal %53 {approx = true} : vector<128x1xf32> -> vector<128x1xf32>
    %55 = vector.broadcast %54 : vector<128x1xf32> to vector<128x256xf32>
    %56 = arith.mulf %51, %55 : vector<128x256xf32>
    %57 = arith.truncf %56 : vector<128x256xf32> to vector<128x256xbf16>
    %cst_30 = arith.constant dense<0.000000e+00> : vector<128x128xf32>
    %58 = tpu.matmul %16, %57, %cst_30 {dimension_numbers = #tpu.dot_dimension_numbers<[0], [1], [1], [0], [0, 1, 1, 0], [], []>} : vector<256x128xbf16>, vector<128x256xbf16>, vector<128x128xf32> -> vector<128x128xf32>
    %c0_31 = arith.constant 0 : index
    %c0_32 = arith.constant 0 : index
    %c128 = arith.constant 128 : index
    %59 = vector.load %arg2[%c0_31, %c0_32, %c128] : memref<1x128x256xf32, #tpu.memory_space<vmem>>, vector<1x128x128xf32>
    %60 = vector.shape_cast %59 : vector<1x128x128xf32> to vector<128x128xf32>
    %61 = arith.addf %58, %60 : vector<128x128xf32>
    %c0_33 = arith.constant 0 : index
    %c0_34 = arith.constant 0 : index
    %c128_35 = arith.constant 128 : index
    %62 = vector.load %arg9[%c0_33, %c0_34, %c128_35] : memref<1x128x256xf32, #tpu.memory_space<vmem>>, vector<1x128x128xf32>
    %63 = vector.shape_cast %62 : vector<1x128x128xf32> to vector<128x128xf32>
    %64 = vector.shape_cast %61 : vector<128x128xf32> to vector<1x128x128xf32>
    tpu.vector_store %arg9[%c0_33, %c0_34, %c128_35], %64 {strides = array<i32>} : memref<1x128x256xf32, #tpu.memory_space<vmem>>, vector<1x128x128xf32>,
    return
  }
  func.func @transform_0(%arg0: i32) -> (i32, i32, i32) {
    %c0_i32 = arith.constant 0 : i32
    %c0_i32_0 = arith.constant 0 : i32
    %c0_i32_1 = arith.constant 0 : i32
    return %arg0, %c0_i32, %c0_i32_0 : i32, i32, i32
  }
  func.func @transform_1(%arg0: i32) -> (i32, i32, i32) {
    %c0_i32 = arith.constant 0 : i32
    %c0_i32_0 = arith.constant 0 : i32
    %c0_i32_1 = arith.constant 0 : i32
    return %arg0, %c0_i32, %c0_i32_0 : i32, i32, i32
  }
  func.func @transform_2(%arg0: i32) -> (i32, i32) {
    %c0_i32 = arith.constant 0 : i32
    %c0_i32_0 = arith.constant 0 : i32
    %c0_i32_1 = arith.constant 0 : i32
    return %c0_i32, %c0_i32_0 : i32, i32
  }
  func.func @transform_3(%arg0: i32) -> (i32, i32) {
    %c0_i32 = arith.constant 0 : i32
    %c0_i32_0 = arith.constant 0 : i32
    %c0_i32_1 = arith.constant 0 : i32
    return %c0_i32, %c0_i32_0 : i32, i32
  }
  func.func @transform_4(%arg0: i32) -> (i32, i32) {
    %c0_i32 = arith.constant 0 : i32
    %c0_i32_0 = arith.constant 0 : i32
    %c0_i32_1 = arith.constant 0 : i32
    return %c0_i32, %c0_i32_0 : i32, i32
  }
  func.func @transform_5(%arg0: i32) -> (i32, i32) {
    %c0_i32 = arith.constant 0 : i32
    %c0_i32_0 = arith.constant 0 : i32
    %c0_i32_1 = arith.constant 0 : i32
    return %c0_i32, %c0_i32_0 : i32, i32
  }
  func.func @transform_6(%arg0: i32) -> (i32, i32) {
    %c0_i32 = arith.constant 0 : i32
    %c0_i32_0 = arith.constant 0 : i32
    %c0_i32_1 = arith.constant 0 : i32
    return %c0_i32, %c0_i32_0 : i32, i32
  }
  func.func @transform_7(%arg0: i32) -> (i32, i32) {
    %c0_i32 = arith.constant 0 : i32
    %c0_i32_0 = arith.constant 0 : i32
    %c0_i32_1 = arith.constant 0 : i32
    return %c0_i32, %c0_i32_0 : i32, i32
  }
  func.func @transform_8(%arg0: i32) -> (i32, i32, i32) {
    %c0_i32 = arith.constant 0 : i32
    %c0_i32_0 = arith.constant 0 : i32
    %c0_i32_1 = arith.constant 0 : i32
    return %arg0, %c0_i32, %c0_i32_0 : i32, i32, i32
  }
}

</mosaic_0001>

<bundles_post_ra>
// kernel: tablock_chain.2
= control target key start
LH: loop header
LB: loop body
LE: loop exit
PB: predicated region body
PF: predicated region fallthrough
CT: control target
= control target key end

     0   :  { %s2872_s27 = smov 0   ;;  %s4027_s0 = inlined_call_operand.vmem [shape: f32[4,256,128], index: 0, kind: input, shape index: {}]   ;;  %s4028_s1 = inlined_call_operand.vmem [shape: f32[4,128,256], index: 1, kind: input, shape index: {}]   ;;  %s4029_s2 = inlined_call_operand.vmem [shape: bf16[128,128], index: 2, kind: input, shape index: {}]   ;;  %s4030_s3 = inlined_call_operand.vmem [shape: f32[1,128], index: 3, kind: input, shape index: {}]   ;;  %s4031_s4 = inlined_call_operand.vmem [shape: bf16[128,128], index: 4, kind: input, shape index: {}]   ;;  %s4032_s5 = inlined_call_operand.vmem [shape: f32[1,128], index: 5, kind: input, shape index: {}]   ;;  %s4033_s6 = inlined_call_operand.vmem [shape: bf16[128,128], index: 6, kind: input, shape index: {}]   ;;  %s4034_s7 = inlined_call_operand.vmem [shape: f32[1,128], index: 7, kind: input, shape index: {}]   ;;  %s4035_s8 = inlined_call_operand.vmem [shape: f32[4,128,256], index: 8, kind: output, shape index: {}]  }
   0x1 LB: > { %s2247_s28 = sadd.s32 4294967295, %s2825_s27   ;;  %p2251_p0 = scmp.ge.s32.totalorder %s2825_s27, 1  ;;  %s2825_s27 = sphi %s2872_s27, %s18_s27  }
   0x2   : > { %p272_p1 = scmp.lt.s32.totalorder %s2825_s27, 5 }
   0x4   : > { %p273_p2 = pnand %p2251_p0, %p272_p1 }
   0x6   : > { %276 = sbr.rel (%p273_p2) target bundleno = 1959 (0x7a7), region = 52 }
   0xb   : > { %v2602_v0 = vld [vmem:[%s4031_s4 + $0x38] sm:$0xff]   ;;  %p311_p3 = scmp.lt.s32.totalorder %s2247_s28, 3  ;;  %v2603_v1 = vld [vmem:[%s4031_s4 + $0x30] sm:$0xff]   ;;  %v2604_v2 = vld [vmem:[%s4031_s4 + $0x28] sm:$0xff]  }
   0xc   : > { %2434 = vmatprep.subr.bf16.mxu0 %v2602_v0  ;;  %v2605_v3 = vld [vmem:[%s4031_s4 + $0x20] sm:$0xff]   ;;  %v2606_v7 = vld [vmem:[%s4031_s4 + $0x18] sm:$0xff]   ;;  %v2607_v8 = vld [vmem:[%s4031_s4 + $0x10] sm:$0xff]  }
   0xd   : > { %s4162_s28 = smov (!%p311_p3, %s2247_s28), 3  ;;  %2435 = vmatpush3.bf16.msra.mxu0 %v2602_v0  ;;  %v2608_v9 = vld [vmem:[%s4031_s4 + $0x8] sm:$0xff]   ;;  %v2609_v10 = vld [vmem:[%s4031_s4] sm:$0xff]   ;;  %v2925_v15 = vld [vmem:[%s4029_s2 + $0x38] sm:$0xff]  }
   0xe   : > { %2436 = vmatprep.subr.bf16.mxu0 %v2603_v1  ;;  %s2889_s13 = sshll.u32 %s4162_s28, 8  ;;  %v2935_v18 = vld [vmem:[%s4029_s2 + $0x30] sm:$0xff]   ;;  %v2948_v23 = vld [vmem:[%s4029_s2 + $0x28] sm:$0xff]   ;;  %v2959_v26 = vld [vmem:[%s4029_s2 + $0x20] sm:$0xff]  }
   0xf   : > { %s2895_s16 = scalar_lea.vmem %s4027_s0, %s2889_s13  ;;  %v2972_v31 = vld [vmem:[%s4029_s2 + $0x18] sm:$0xff]   ;;  %v2983_v34 = vld [vmem:[%s4029_s2 + $0x10] sm:$0xff]   ;;  %v2996_v39 = vld [vmem:[%s4029_s2 + $0x8] sm:$0xff]   ;;  %s3705_s30 = scalar_lea.vmem %s4028_s1, %s2889_s13 }
  0x10   : > { %v378_v4 = vld [vmem:[%s2895_s16] sm:$0xff]  ;;  %v379_v5 = vld [vmem:[%s2895_s16 + $0x8] sm:$0xff]  ;;  %v380_v11 = vld [vmem:[%s2895_s16 + $0x10] sm:$0xff]  ;;  %s3712_s11 = scalar_lea.vmem %s4035_s8, %s2889_s13 }
  0x11   : > { %2437 = vmatpush3.bf16.msra.mxu0 %v2603_v1  ;;  %v2902_v6 = vpack.c.bf16 %v379_v5, %v378_v4  ;;  %v381_v12 = vld [vmem:[%s2895_s16 + $0x18] sm:$0xff]  ;;  %v382_v13 = vld [vmem:[%s2895_s16 + $0x20] sm:$0xff]  ;;  %v383_v14 = vld [vmem:[%s2895_s16 + $0x28] sm:$0xff] }
  0x12   : > { %2438 = vmatprep.subr.bf16.mxu0 %v2604_v2  ;;  %v2927_v16 = vpack.c.bf16 %v381_v12, %v380_v11  ;;  %v2929_v17 = vpack.c.bf16 %v383_v14, %v382_v13  ;;  %v384_v19 = vld [vmem:[%s2895_s16 + $0x30] sm:$0xff]  ;;  %v385_v20 = vld [vmem:[%s2895_s16 + $0x38] sm:$0xff]  ;;  %v386_v21 = vld [vmem:[%s2895_s16 + $0x40] sm:$0xff] }
  0x13   : > { %2450 = vmatprep.mubr.bf16.mxu0 %v2902_v6  ;;  %2498 = vmatprep.mubr.bf16.mxu1 %v2902_v6  ;;  %v387_v22 = vld [vmem:[%s2895_s16 + $0x48] sm:$0xff]  ;;  %v2950_v24 = vpack.c.bf16 %v385_v20, %v384_v19  ;;  %v388_v27 = vld [vmem:[%s2895_s16 + $0x50] sm:$0xff]  ;;  %v389_v28 = vld [vmem:[%s2895_s16 + $0x58] sm:$0xff] }
  0x14   : > { %v2952_v25 = vpack.c.bf16 %v387_v22, %v386_v21  ;;  %v390_v29 = vld [vmem:[%s2895_s16 + $0x60] sm:$0xff]  ;;  %v391_v30 = vld [vmem:[%s2895_s16 + $0x68] sm:$0xff]  ;;  %v2974_v32 = vpack.c.bf16 %v389_v28, %v388_v27  ;;  %v392_v35 = vld [vmem:[%s2895_s16 + $0x70] sm:$0xff] }
  0x15   : > { %2439 = vmatpush3.bf16.msra.mxu0 %v2604_v2  ;;  %v2976_v33 = vpack.c.bf16 %v391_v30, %v390_v29  ;;  %v393_v36 = vld [vmem:[%s2895_s16 + $0x78] sm:$0xff]  ;;  %v394_v37 = vld [vmem:[%s2895_s16 + $0x80] sm:$0xff]  ;;  %v395_v38 = vld [vmem:[%s2895_s16 + $0x88] sm:$0xff] }
  0x16   : > { %2440 = vmatprep.subr.bf16.mxu0 %v2605_v3  ;;  %v2998_v40 = vpack.c.bf16 %v393_v36, %v392_v35  ;;  %v3000_v41 = vpack.c.bf16 %v395_v38, %v394_v37  ;;  %v3007_v42 = vld [vmem:[%s4029_s2] sm:$0xff]   ;;  %v396_v43 = vld [vmem:[%s2895_s16 + $0x90] sm:$0xff]  ;;  %v397_v44 = vld [vmem:[%s2895_s16 + $0x98] sm:$0xff] }
  0x17   : > { %v398_v45 = vld [vmem:[%s2895_s16 + $0xa0] sm:$0xff]  ;;  %v399_v46 = vld [vmem:[%s2895_s16 + $0xa8] sm:$0xff]  ;;  %v3017_v47 = vpack.c.bf16 %v397_v44, %v396_v43  ;;  %v400_v49 = vld [vmem:[%s2895_s16 + $0xb0] sm:$0xff] }
  0x18   : > { %v3019_v48 = vpack.c.bf16 %v399_v46, %v398_v45  ;;  %v401_v50 = vld [vmem:[%s2895_s16 + $0xb8] sm:$0xff]  ;;  %v402_v51 = vld [vmem:[%s2895_s16 + $0xc0] sm:$0xff]  ;;  %v403_v52 = vld [vmem:[%s2895_s16 + $0xc8] sm:$0xff] }
  0x19   : > { %2441 = vmatpush3.bf16.msra.mxu0 %v2605_v3  ;;  %v3028_v53 = vpack.c.bf16 %v401_v50, %v400_v49  ;;  %v3030_v54 = vpack.c.bf16 %v403_v52, %v402_v51  ;;  %v404_v55 = vld [vmem:[%s2895_s16 + $0xd0] sm:$0xff]  ;;  %v405_v56 = vld [vmem:[%s2895_s16 + $0xd8] sm:$0xff]  ;;  %v406_v57 = vld [vmem:[%s2895_s16 + $0xe0] sm:$0xff] }
  0x1a   : > { %2442 = vmatprep.subr.bf16.mxu0 %v2606_v7  ;;  %v407_v58 = vld [vmem:[%s2895_s16 + $0xe8] sm:$0xff]  ;;  %v3038_v59 = vpack.c.bf16 %v405_v56, %v404_v55  ;;  %v408_v61 = vld [vmem:[%s2895_s16 + $0xf0] sm:$0xff]  ;;  %v409_v62 = vld [vmem:[%s2895_s16 + $0xf8] sm:$0xff] }
  0x1b   : > { %v3040_v60 = vpack.c.bf16 %v407_v58, %v406_v57  ;;  %v3046_v63 = vpack.c.bf16 %v409_v62, %v408_v61  ;;  %v2618_v0 = vld [vmem:[%s4033_s6 + $0x38] sm:$0xff]   ;;  %v2619_v1 = vld [vmem:[%s4033_s6 + $0x30] sm:$0xff]   ;;  %v2620_v2 = vld [vmem:[%s4033_s6 + $0x28] sm:$0xff]  }
  0x1c   : > { %2482 = vmatprep.subr.bf16.mxu1 %v2618_v0  ;;  %v2621_v3 = vld [vmem:[%s4033_s6 + $0x20] sm:$0xff]   ;;  %v2622_v4 = vld [vmem:[%s4033_s6 + $0x18] sm:$0xff]   ;;  %v2623_v5 = vld [vmem:[%s4033_s6 + $0x10] sm:$0xff]  }
  0x1d   : > { %2443 = vmatpush3.bf16.msra.mxu0 %v2606_v7  ;;  %2483 = vmatpush3.bf16.msra.mxu1 %v2618_v0  ;;  %v2625_v7 = vld [vmem:[%s4033_s6] sm:$0xff]  }
  0x1e   : > { %2444 = vmatprep.subr.bf16.mxu0 %v2607_v8  ;;  %2484 = vmatprep.subr.bf16.mxu1 %v2619_v1 }
  0x21   : > { %2445 = vmatpush3.bf16.msra.mxu0 %v2607_v8  ;;  %2485 = vmatpush3.bf16.msra.mxu1 %v2619_v1 }
  0x22   : > { %2446 = vmatprep.subr.bf16.mxu0 %v2608_v9  ;;  %2486 = vmatprep.subr.bf16.mxu1 %v2620_v2 }
  0x25   : > { %2447 = vmatpush3.bf16.msra.mxu0 %v2608_v9  ;;  %2487 = vmatpush3.bf16.msra.mxu1 %v2620_v2  ;;  %v3099_v9 = vld [vmem:[%s4032_s5] ss:$0 sm:$0xff] }
  0x26   : > { %2448 = vmatprep.subr.bf16.mxu0 %v2609_v10  ;;  %2488 = vmatprep.subr.bf16.mxu1 %v2621_v3 }
  0x29   : > { %2449 = vmatpush3.bf16.msra.mxu0 %v2609_v10  ;;  %2489 = vmatpush3.bf16.msra.mxu1 %v2621_v3 }
  0x2a   : > { %2530 = vmatprep.subr.bf16.mxu0 %v2925_v15  ;;  %2490 = vmatprep.subr.bf16.mxu1 %v2622_v4 }
  0x2c   : > { %2451 = vmatmul.mubr.bf16.vlgmr.msra.gmra.mxu0 %v2927_v16 }
  0x2d   : > { %2454 = vmatprep.mubr.bf16.mxu0 %v2929_v17  ;;  %2531 = vmatpush3.bf16.msra.mxu0 %v2925_v15 }
  0x2e   : > { %2532 = vmatprep.subr.bf16.mxu0 %v2935_v18  ;;  %2491 = vmatpush3.bf16.msra.mxu1 %v2622_v4 }
  0x2f   : > { %2492 = vmatprep.subr.bf16.mxu1 %v2623_v5 }
  0x31   : > { %2533 = vmatpush3.bf16.msra.mxu0 %v2935_v18 }
  0x32   : > { %2534 = vmatprep.subr.bf16.mxu0 %v2948_v23  ;;  %2493 = vmatpush3.bf16.msra.mxu1 %v2623_v5 }
  0x34   : > { %2455 = vmatmul.mubr.bf16.gmra.mxu0 %v2950_v24 }
  0x35   : > { %2458 = vmatprep.mubr.bf16.mxu0 %v2952_v25  ;;  %2535 = vmatpush3.bf16.msra.mxu0 %v2948_v23 }
  0x36   : > { %2536 = vmatprep.subr.bf16.mxu0 %v2959_v26 }
  0x39   : > { %2537 = vmatpush3.bf16.msra.mxu0 %v2959_v26 }
  0x3a   : > { %2538 = vmatprep.subr.bf16.mxu0 %v2972_v31 }
  0x3c   : > { %2459 = vmatmul.mubr.bf16.gmra.mxu0 %v2974_v32 }
  0x3d   : > { %2462 = vmatprep.mubr.bf16.mxu0 %v2976_v33  ;;  %2539 = vmatpush3.bf16.msra.mxu0 %v2972_v31 }
  0x3e   : > { %2540 = vmatprep.subr.bf16.mxu0 %v2983_v34 }
  0x41   : > { %2541 = vmatpush3.bf16.msra.mxu0 %v2983_v34 }
  0x42   : > { %2542 = vmatprep.subr.bf16.mxu0 %v2996_v39 }
  0x44   : > { %2463 = vmatmul.mubr.bf16.gmra.mxu0 %v2998_v40 }
  0x45   : > { %2466 = vmatprep.mubr.bf16.mxu0 %v3000_v41  ;;  %2543 = vmatpush3.bf16.msra.mxu0 %v2996_v39 }
  0x46   : > { %2544 = vmatprep.subr.bf16.mxu0 %v3007_v42 }
  0x49   : > { %2545 = vmatpush3.bf16.msra.mxu0 %v3007_v42 }
  0x4c   : > { %2467 = vmatmul.mubr.bf16.gmra.mxu0 %v3017_v47 }
  0x4d   : > { %2470 = vmatprep.mubr.bf16.mxu0 %v3019_v48 }
  0x54   : > { %2471 = vmatmul.mubr.bf16.gmra.mxu0 %v3028_v53 }
  0x55   : > { %2474 = vmatprep.mubr.bf16.mxu0 %v3030_v54 }
  0x5c   : > { %2475 = vmatmul.mubr.bf16.gmra.mxu0 %v3038_v59 }
  0x5d   : > { %2478 = vmatprep.mubr.bf16.mxu0 %v3040_v60 }
  0x64   : > { %2479 = vmatmul.mubr.bf16.gmra.mxu0 %v3046_v63 }
  0x65   : > { %2546 = vmatprep.mubr.bf16.mxu0 %v2902_v6  ;;  %v2624_v6 = vld [vmem:[%s4033_s6 + $0x8] sm:$0xff]  }
  0x66   : > { %2494 = vmatprep.subr.bf16.mxu1 %v2624_v6 }
  0x67   : > { %2495 = vmatpush3.bf16.msra.mxu1 %v2624_v6 }
  0x68   : > { %2496 = vmatprep.subr.bf16.mxu1 %v2625_v7 }
  0x6b   : > { %2497 = vmatpush3.bf16.msra.mxu1 %v2625_v7 }
  0x6c   : > { %2547 = vmatmul.mubr.bf16.vlgmr.msra.gmra.mxu0 %v2927_v16 }
  0x6d   : > { %2550 = vmatprep.mubr.bf16.mxu0 %v2929_v17 }
  0x6e   : > { %2499 = vmatmul.mubr.bf16.vlgmr.msra.gmra.mxu1 %v2927_v16 }
  0x6f   : > { %2502 = vmatprep.mubr.bf16.mxu1 %v2929_v17 }
  0x74   : > { %2551 = vmatmul.mubr.bf16.gmra.mxu0 %v2950_v24 }
  0x75   : > { %2554 = vmatprep.mubr.bf16.mxu0 %v2952_v25 }
  0x76   : > { %2503 = vmatmul.mubr.bf16.gmra.mxu1 %v2950_v24 }
  0x77   : > { %2506 = vmatprep.mubr.bf16.mxu1 %v2952_v25 }
  0x7c   : > { %2555 = vmatmul.mubr.bf16.gmra.mxu0 %v2974_v32 }
  0x7d   : > { %2558 = vmatprep.mubr.bf16.mxu0 %v2976_v33 }
  0x7e   : > { %2507 = vmatmul.mubr.bf16.gmra.mxu1 %v2974_v32 }
  0x7f   : > { %2510 = vmatprep.mubr.bf16.mxu1 %v2976_v33 }
  0x84   : > { %2559 = vmatmul.mubr.bf16.gmra.mxu0 %v2998_v40 }
  0x86   : > { %2511 = vmatmul.mubr.bf16.gmra.mxu1 %v2998_v40 }
  0x87   : > { %2514 = vmatprep.mubr.bf16.mxu1 %v3000_v41 }
  0x8e   : > { %2515 = vmatmul.mubr.bf16.gmra.mxu1 %v3017_v47 }
  0x8f   : > { %2518 = vmatprep.mubr.bf16.mxu1 %v3019_v48 }
  0x96   : > { %2519 = vmatmul.mubr.bf16.gmra.mxu1 %v3028_v53 }
  0x97   : > { %2522 = vmatprep.mubr.bf16.mxu1 %v3030_v54 }
  0x9e   : > { %2523 = vmatmul.mubr.bf16.gmra.mxu1 %v3038_v59 }
  0x9f   : > { %2526 = vmatprep.mubr.bf16.mxu1 %v3040_v60 }
  0xa6   : > { %2527 = vmatmul.mubr.bf16.gmra.mxu1 %v3046_v63 }
  0xec   : > { %v2452_v8 = vpop.f32.mrf.mxu0 }
  0xed   : > { %v523_v12 = vadd.f32 %v2452_v8, %v3099_v9 }
  0xee   : > { %v514_v10 = vpop.f32.mrf.mxu0 }
  0xef   : > { %v515_v16 = vadd.f32 %v3099_v9, %v514_v10 }
  0xf0   : > { %v2453_v11 = vpop.f32.mrf.mxu0 }
  0xf1   : > { %v526_v13 = vadd.f32 %v2453_v11, %v3099_v9 }
  0xf2   : > { %v517_v14 = vpop.f32.mrf.mxu0 }
  0xf3   : > { %v3104_v17 = vpack.c.bf16 %v526_v13, %v523_v12  ;;  %v518_v19 = vadd.f32 %v3099_v9, %v517_v14 }
  0xf4   : > { %v2456_v20 = vpop.f32.mrf.mxu0 }
  0xf5   : > { %4072 = vst [vmem:[#allocation2_spill] sm:$0xff] %v3104_v17  ;;  %v3107_v21 = vpack.c.bf16 %v518_v19, %v515_v16  ;;  %v539_v25 = vadd.f32 %v2456_v20, %v3099_v9 }
  0xf6   : > { %v530_v22 = vpop.f32.mrf.mxu0 }
  0xf7   : > { %4073 = vst [vmem:[#allocation3_spill] sm:$0xff] %v3107_v21  ;;  %v531_v29 = vadd.f32 %v3099_v9, %v530_v22 }
  0xf8   : > { %v2457_v24 = vpop.f32.mrf.mxu0 }
  0xf9   : > { %v542_v27 = vadd.f32 %v2457_v24, %v3099_v9 }
  0xfa   : > { %v533_v28 = vpop.f32.mrf.mxu0 }
  0xfb   : > { %v3112_v30 = vpack.c.bf16 %v542_v27, %v539_v25  ;;  %v534_v32 = vadd.f32 %v3099_v9, %v533_v28  ;;  %v3146_v28 = vld [vmem:[%s4030_s3] ss:$0 sm:$0xff] }
  0xfc   : > { %v2460_v33 = vpop.f32.mrf.mxu0 }
  0xfd   : > { %4074 = vst [vmem:[#allocation4_spill] sm:$0xff] %v3112_v30  ;;  %v3115_v35 = vpack.c.bf16 %v534_v32, %v531_v29 }
  0xfe   : > { %v3117_v36 = vpop.f32.mrf.mxu0 }
  0xff   : > { %4075 = vst [vmem:[#allocation5_spill] sm:$0xff] %v3115_v35 }
 0x100   : > { %v2461_v37 = vpop.f32.mrf.mxu0 }
 0x102   : > { %v3119_v38 = vpop.f32.mrf.mxu0 }
 0x104   : > { %v2464_v40 = vpop.f32.mrf.mxu0 }
 0x105   : > { %v571_v14 = vadd.f32 %v2464_v40, %v3099_v9 }
 0x106   : > { %v562_v43 = vpop.f32.mrf.mxu0 }
 0x108   : > { %v2465_v44 = vpop.f32.mrf.mxu0 }
 0x109   : > { %v574_v10 = vadd.f32 %v2465_v44, %v3099_v9 }
 0x10a   : > { %v565_v45 = vpop.f32.mrf.mxu0 }
 0x10b   : > { %v3137_v24 = vpack.c.bf16 %v574_v10, %v571_v14  ;;  %v566_v32 = vadd.f32 %v3099_v9, %v565_v45  ;;  %v558_v45 = vadd.f32 %v2461_v37, %v3099_v9  ;;  %v550_v10 = vadd.f32 %v3099_v9, %v3119_v38 }
 0x10c   : > { %v2468_v46 = vpop.f32.mrf.mxu0  ;;  %v547_v37 = vadd.f32 %v3099_v9, %v3117_v36 }
 0x10d   : > { %v587_v51 = vadd.f32 %v2468_v46, %v3099_v9  ;;  %4079 = vst [vmem:[#allocation9_spill] sm:$0xff] %v3137_v24 }
 0x10e   : > { %v578_v49 = vpop.f32.mrf.mxu0 }
 0x10f   : > { %v579_v56 = vadd.f32 %v3099_v9, %v578_v49  ;;  %v563_v49 = vadd.f32 %v3099_v9, %v562_v43  ;;  %v555_v43 = vadd.f32 %v2460_v33, %v3099_v9 }
 0x110   : > { %v2469_v50 = vpop.f32.mrf.mxu0 }
 0x111   : > { %v590_v52 = vadd.f32 %v2469_v50, %v3099_v9 }
 0x112   : > { %v581_v55 = vpop.f32.mrf.mxu0 }
 0x113   : > { %v3124_v57 = vpack.c.bf16 %v590_v52, %v587_v51  ;;  %v582_v58 = vadd.f32 %v3099_v9, %v581_v55  ;;  %v3155_v55 = vpack.c.bf16 %v566_v32, %v563_v49 }
 0x114   : > { %v2472_v61 = vpop.f32.mrf.mxu0 }
 0x115   : > { %4076 = vst [vmem:[#allocation6_spill] sm:$0xff] %v3124_v57  ;;  %v3127_v62 = vpack.c.bf16 %v582_v58, %v579_v56  ;;  %4081 = vst [vmem:[#allocation11_spill] sm:$0xff] %v3155_v55  ;;  %v603_v33 = vadd.f32 %v2472_v61, %v3099_v9 }
 0x116   : > { %v594_v0 = vpop.f32.mrf.mxu0 }
 0x117   : > { %4077 = vst [vmem:[#allocation7_spill] sm:$0xff] %v3127_v62 }
 0x118   : > { %v2473_v1 = vpop.f32.mrf.mxu0 }
 0x11a   : > { %v597_v2 = vpop.f32.mrf.mxu0 }
 0x11c   : > { %v2476_v3 = vpop.f32.mrf.mxu0 }
 0x11d   : > { %v619_v51 = vadd.f32 %v2476_v3, %v3099_v9 }
 0x11e   : > { %v610_v4 = vpop.f32.mrf.mxu0 }
 0x11f   : > { %v611_v3 = vadd.f32 %v3099_v9, %v610_v4 }
 0x120   : > { %v2477_v5 = vpop.f32.mrf.mxu0 }
 0x121   : > { %v622_v44 = vadd.f32 %v2477_v5, %v3099_v9 }
 0x122   : > { %v613_v6 = vpop.f32.mrf.mxu0 }
 0x123   : > { %v3157_v56 = vpack.c.bf16 %v622_v44, %v619_v51  ;;  %v614_v5 = vadd.f32 %v3099_v9, %v613_v6  ;;  %v3177_v6 = vpack.c.bf16 %v550_v10, %v547_v37 }
 0x124   : > { %v2480_v7 = vpop.f32.mrf.mxu0 }
 0x125   : > { %v635_v12 = vadd.f32 %v2480_v7, %v3099_v9  ;;  %4082 = vst [vmem:[#allocation12_spill] sm:$0xff] %v3157_v56  ;;  %v3165_v7 = vpack.c.bf16 %v558_v45, %v555_v43  ;;  %4085 = vst [vmem:[#allocation15_spill] sm:$0xff] %v3177_v6 }
 0x126   : > { %v626_v8 = vpop.f32.mrf.mxu0 }
 0x127   : > { %v627_v19 = vadd.f32 %v3099_v9, %v626_v8  ;;  %4083 = vst [vmem:[#allocation13_spill] sm:$0xff] %v3165_v7  ;;  %v3167_v8 = vpack.c.bf16 %v614_v5, %v611_v3 }
 0x128   : > { %v2481_v11 = vpop.f32.mrf.mxu0 }
 0x129   : > { %v638_v13 = vadd.f32 %v2481_v11, %v3099_v9  ;;  %4084 = vst [vmem:[#allocation14_spill] sm:$0xff] %v3167_v8  ;;  %v606_v11 = vadd.f32 %v2473_v1, %v3099_v9 }
 0x12a   : > { %v629_v16 = vpop.f32.mrf.mxu0 }
 0x12b   : > { %v3134_v20 = vpack.c.bf16 %v638_v13, %v635_v12  ;;  %v630_v22 = vadd.f32 %v3099_v9, %v629_v16  ;;  %v3179_v4 = vpack.c.bf16 %v606_v11, %v603_v33  ;;  %v598_v12 = vadd.f32 %v3099_v9, %v597_v2 }
 0x12c   : > { %v2548_v25 = vpop.f32.mrf.mxu0  ;;  %v595_v13 = vadd.f32 %v3099_v9, %v594_v0  ;;  %v3197_v0 = vld [vmem:[%s4034_s7] ss:$0 sm:$0xff] }
 0x12d   : > { %4078 = vst [vmem:[#allocation8_spill] sm:$0xff] %v3134_v20  ;;  %v3139_v27 = vpack.c.bf16 %v630_v22, %v627_v19  ;;  %2354 = vmatprep.subr.bf16.mxu1 %v3134_v20  ;;  %4086 = vst [vmem:[#allocation16_spill] sm:$0xff] %v3179_v4  ;;  %v985_v2 = vadd.f32 %v2548_v25, %v3146_v28 }
 0x12e   : > { %2355 = vmatpush3.bf16.xpose.msra.mxu1 %v3137_v24  ;;  %v976_v29 = vpop.f32.mrf.mxu0  ;;  %v3185_v38 = vpack.c.bf16 %v598_v12, %v595_v13  ;;  %v2500_v9 = vpop.f32.mrf.mxu1  ;;  %4088 = vst [vmem:[#allocation18_spill] sm:$0xff] %v3197_v0 }
 0x12f   : > { %4080 = vst [vmem:[#allocation10_spill] sm:$0xff] %v3139_v27  ;;  %2356 = vmatprep.subr.bf16.mxu1 %v3139_v27  ;;  %v977_v46 = vadd.f32 %v3146_v28, %v976_v29  ;;  %v3203_v19 = vadd.f32 %v2500_v9, %v3197_v0 }
 0x130   : > { %v2549_v40 = vpop.f32.mrf.mxu0  ;;  %4087 = vst [vmem:[#allocation17_spill] sm:$0xff] %v3185_v38  ;;  %v745_v16 = vpop.f32.mrf.mxu1 }
 0x131   : > { %v988_v14 = vadd.f32 %v2549_v40, %v3146_v28  ;;  %v3216_v51 = vadd.f32 %v3197_v0, %v745_v16 }
 0x132   : > { %v979_v50 = vpop.f32.mrf.mxu0  ;;  %v2501_v29 = vpop.f32.mrf.mxu1 }
 0x133   : > { %v980_v52 = vadd.f32 %v3146_v28, %v979_v50  ;;  %v1040_v32 = vpack.c.bf16 %v988_v14, %v985_v2  ;;  %v3206_v44 = vadd.f32 %v2501_v29, %v3197_v0 }
 0x134   : > { %v2552_v36 = vpop.f32.mrf.mxu0 }
 0x135   : > { %v1039_v58 = vpack.c.bf16 %v980_v52, %v977_v46  ;;  %v748_v46 = vpop.f32.mrf.mxu1  ;;  %v1001_v9 = vadd.f32 %v2552_v36, %v3146_v28 }
 0x136   : > { %2357 = vmatpush3.bf16.xpose.msra.mxu1 %v3155_v55  ;;  %v992_v61 = vpop.f32.mrf.mxu0  ;;  %v3219_v52 = vadd.f32 %v3197_v0, %v748_v46 }
 0x137   : > { %2358 = vmatprep.subr.bf16.mxu1 %v3157_v56  ;;  %2370 = vmatprep.mubr.bf16.mxu1 %v1039_v58  ;;  %v993_v49 = vadd.f32 %v3146_v28, %v992_v61 }
 0x138   : > { %v2553_v1 = vpop.f32.mrf.mxu0 }
 0x139   : > { %v1004_v2 = vadd.f32 %v2553_v1, %v3146_v28 }
 0x13a   : > { %v995_v22 = vpop.f32.mrf.mxu0 }
 0x13b   : > { %v996_v50 = vadd.f32 %v3146_v28, %v995_v22 }
 0x13c   : > { %v3213_v40 = vpop.f32.mrf.mxu0 }
 0x13d   : > { %v1041_v5 = vpack.c.bf16 %v996_v50, %v993_v49 }
 0x13e   : > { %2359 = vmatpush3.bf16.xpose.msra.mxu1 %v3165_v7  ;;  %v1008_v3 = vpop.f32.mrf.mxu0 }
 0x13f   : > { %2360 = vmatprep.subr.bf16.mxu1 %v3167_v8  ;;  %v1009_v1 = vadd.f32 %v3146_v28, %v1008_v3 }
 0x140   : > { %v2557_v13 = vpop.f32.mrf.mxu0 }
 0x142   : > { %v1011_v29 = vpop.f32.mrf.mxu0 }
 0x143   : > { %v1012_v50 = vadd.f32 %v3146_v28, %v1011_v29 }
 0x146   : > { %2361 = vmatpush3.bf16.xpose.msra.mxu1 %v3177_v6 }
 0x147   : > { %2362 = vmatprep.subr.bf16.mxu1 %v3179_v4 }
 0x14e   : > { %2363 = vmatpush3.bf16.xpose.msra.mxu1 %v3112_v30 }
 0x14f   : > { %2364 = vmatprep.subr.bf16.mxu1 %v3185_v38 }
 0x156   : > { %2365 = vmatpush3.bf16.xpose.msra.mxu1 %v3115_v35 }
 0x157   : > { %2366 = vmatprep.subr.bf16.mxu1 %v3124_v57 }
 0x15e   : > { %2367 = vmatpush3.bf16.xpose.msra.mxu1 %v3104_v17 }
 0x15f   : > { %2368 = vmatprep.subr.bf16.mxu1 %v3127_v62 }
 0x166   : > { %2369 = vmatpush3.bf16.xpose.msra.mxu1 %v3107_v21 }
 0x167   : > { %2562 = vmatprep.subr.bf16.mxu1 %v2925_v15 }
 0x16d   : > { %2371 = vmatmul.mubr.bf16.vlgmr.msra.gmra.mxu1 %v1039_v58  ;;  %v2504_v58 = vpop.f32.mrf.mxu1 }
 0x16e   : > { %2372 = vmatprep.mubr.bf16.mxu1 %v1040_v32  ;;  %2563 = vmatpush3.bf16.msra.mxu1 %v2925_v15  ;;  %v3223_v43 = vadd.f32 %v2504_v58, %v3197_v0 }
 0x16f   : > { %2564 = vmatprep.subr.bf16.mxu1 %v2935_v18  ;;  %v761_v45 = vpop.f32.mrf.mxu1 }
 0x170   : > { %4089 = vst [vmem:[#allocation19_spill] sm:$0xff] %v3223_v43  ;;  %v3230_v11 = vadd.f32 %v3197_v0, %v761_v45  ;;  %v2560_v45 = vpop.f32.mrf.mxu0 }
 0x171   : > { %v2505_v15 = vpop.f32.mrf.mxu1 }
 0x172   : > { %2565 = vmatpush3.bf16.msra.mxu1 %v2935_v18  ;;  %v3233_v37 = vadd.f32 %v2505_v15, %v3197_v0 }
 0x173   : > { %2566 = vmatprep.subr.bf16.mxu1 %v2948_v23  ;;  %v764_v33 = vpop.f32.mrf.mxu1 }
 0x174   : > { %4090 = vst [vmem:[#allocation20_spill] sm:$0xff] %v3233_v37  ;;  %v3238_v18 = vadd.f32 %v3197_v0, %v764_v33  ;;  %v1043_v33 = vpack.c.bf16 %v1012_v50, %v1009_v1  ;;  %v1017_v50 = vadd.f32 %v3213_v40, %v3146_v28 }
 0x175   : > { %2373 = vmatmul.mubr.bf16.gmra.mxu1 %v1040_v32  ;;  %v2508_v61 = vpop.f32.mrf.mxu1 }
 0x176   : > { %2374 = vmatprep.mubr.bf16.mxu1 %v1041_v5  ;;  %2567 = vmatpush3.bf16.msra.mxu1 %v2948_v23  ;;  %v3247_v22 = vadd.f32 %v2508_v61, %v3197_v0  ;;  %v1042_v23 = vpack.c.bf16 %v1004_v2, %v1001_v9  ;;  %v1024_v9 = vpop.f32.mrf.mxu0 }
 0x177   : > { %2568 = vmatprep.subr.bf16.mxu1 %v2959_v26  ;;  %v777_v16 = vpop.f32.mrf.mxu1  ;;  %v1025_v40 = vadd.f32 %v3146_v28, %v1024_v9 }
 0x178   : > { %4091 = vst [vmem:[#allocation21_spill] sm:$0xff] %v3247_v22  ;;  %v3252_v46 = vadd.f32 %v3197_v0, %v777_v16 }
 0x179   : > { %v2509_v32 = vpop.f32.mrf.mxu1 }
 0x17a   : > { %2569 = vmatpush3.bf16.msra.mxu1 %v2959_v26  ;;  %4092 = vst [vmem:[#allocation22_spill] sm:$0xff] %v3252_v46  ;;  %v3255_v36 = vadd.f32 %v2509_v32, %v3197_v0 }
 0x17b   : > { %2570 = vmatprep.subr.bf16.mxu1 %v2972_v31  ;;  %v780_v49 = vpop.f32.mrf.mxu1 }
 0x17c   : > { %4093 = vst [vmem:[#allocation23_spill] sm:$0xff] %v3255_v36  ;;  %v3262_v58 = vadd.f32 %v3197_v0, %v780_v49 }
 0x17d   : > { %2375 = vmatmul.mubr.bf16.gmra.mxu1 %v1041_v5  ;;  %v2512_v15 = vpop.f32.mrf.mxu1 }
 0x17e   : > { %2376 = vmatprep.mubr.bf16.mxu1 %v1042_v23  ;;  %4094 = vst [vmem:[#allocation24_spill] sm:$0xff] %v3262_v58  ;;  %2571 = vmatpush3.bf16.msra.mxu1 %v2972_v31  ;;  %v3269_v61 = vadd.f32 %v2512_v15, %v3197_v0  ;;  %v1020_v15 = vadd.f32 %v2557_v13, %v3146_v28 }
 0x17f   : > { %2572 = vmatprep.subr.bf16.mxu1 %v2983_v34  ;;  %v793_v5 = vpop.f32.mrf.mxu1 }
 0x180   : > { %4095 = vst [vmem:[#allocation25_spill] sm:$0xff] %v3269_v61  ;;  %v3274_v31 = vadd.f32 %v3197_v0, %v793_v5  ;;  %v1044_v32 = vpack.c.bf16 %v1020_v15, %v1017_v50 }
 0x181   : > { %v2513_v2 = vpop.f32.mrf.mxu1 }
 0x182   : > { %2573 = vmatpush3.bf16.msra.mxu1 %v2983_v34  ;;  %4096 = vst [vmem:[#allocation26_spill] sm:$0xff] %v3274_v31  ;;  %v3277_v16 = vadd.f32 %v2513_v2, %v3197_v0  ;;  %v2561_v34 = vpop.f32.mrf.mxu0 }
 0x183   : > { %2574 = vmatprep.subr.bf16.mxu1 %v2996_v39  ;;  %v796_v29 = vpop.f32.mrf.mxu1  ;;  %v1036_v25 = vadd.f32 %v2561_v34, %v3146_v28 }
 0x184   : > { %4097 = vst [vmem:[#allocation27_spill] sm:$0xff] %v3277_v16  ;;  %v3282_v1 = vadd.f32 %v3197_v0, %v796_v29  ;;  %v1027_v29 = vpop.f32.mrf.mxu0 }
 0x185   : > { %2377 = vmatmul.mubr.bf16.gmra.mxu1 %v1042_v23  ;;  %v2516_v49 = vpop.f32.mrf.mxu1  ;;  %v1028_v13 = vadd.f32 %v3146_v28, %v1027_v29 }
 0x186   : > { %2378 = vmatprep.mubr.bf16.mxu1 %v1043_v33  ;;  %4098 = vst [vmem:[#allocation28_spill] sm:$0xff] %v3282_v1  ;;  %2575 = vmatpush3.bf16.msra.mxu1 %v2996_v39  ;;  %v3292_v2 = vadd.f32 %v2516_v49, %v3197_v0 }
 0x187   : > { %2576 = vmatprep.subr.bf16.mxu1 %v3007_v42  ;;  %v809_v5 = vpop.f32.mrf.mxu1 }
 0x188   : > { %v3303_v49 = vadd.f32 %v3197_v0, %v809_v5 }
 0x189   : > { %v2517_v39 = vpop.f32.mrf.mxu1 }
 0x18a   : > { %2577 = vmatpush3.bf16.msra.mxu1 %v3007_v42  ;;  %v3296_v26 = vadd.f32 %v2517_v39, %v3197_v0  ;;  %v1045_v39 = vpack.c.bf16 %v1028_v13, %v1025_v40 }
 0x18b   : > { %v812_v3 = vpop.f32.mrf.mxu1 }
 0x18c   : > { %v3306_v42 = vadd.f32 %v3197_v0, %v812_v3 }
 0x18d   : > { %2379 = vmatmul.mubr.bf16.gmra.mxu1 %v1043_v33  ;;  %v2520_v50 = vpop.f32.mrf.mxu1 }
 0x18e   : > { %2380 = vmatprep.mubr.bf16.mxu1 %v1044_v32  ;;  %v3309_v33 = vadd.f32 %v2520_v50, %v3197_v0  ;;  %v1033_v50 = vadd.f32 %v2560_v45, %v3146_v28 }
 0x18f   : > { %v825_v15 = vpop.f32.mrf.mxu1 }
 0x190   : > { %4099 = vst [vmem:[#allocation29_spill] sm:$0xff] %v3309_v33  ;;  %v3314_v29 = vadd.f32 %v3197_v0, %v825_v15  ;;  %v1046_v10 = vpack.c.bf16 %v1036_v25, %v1033_v50 }
 0x191   : > { %v2521_v12 = vpop.f32.mrf.mxu1 }
 0x192   : > { %v3317_v14 = vadd.f32 %v2521_v12, %v3197_v0 }
 0x193   : > { %v828_v5 = vpop.f32.mrf.mxu1 }
 0x194   : > { %v3322_v40 = vadd.f32 %v3197_v0, %v828_v5 }
 0x195   : > { %2381 = vmatmul.mubr.bf16.gmra.mxu1 %v1044_v32  ;;  %v2524_v13 = vpop.f32.mrf.mxu1 }
 0x196   : > { %2382 = vmatprep.mubr.bf16.mxu1 %v1045_v39  ;;  %v3329_v12 = vadd.f32 %v2524_v13, %v3197_v0 }
 0x197   : > { %v841_v23 = vpop.f32.mrf.mxu1 }
 0x198   : > { %4100 = vst [vmem:[#allocation30_spill] sm:$0xff] %v3329_v12  ;;  %v3332_v9 = vadd.f32 %v3197_v0, %v841_v23 }
 0x199   : > { %v2525_v32 = vpop.f32.mrf.mxu1 }
 0x19a   : > { %4101 = vst [vmem:[#allocation31_spill] sm:$0xff] %v3332_v9  ;;  %v3335_v5 = vadd.f32 %v2525_v32, %v3197_v0 }
 0x19b   : > { %v844_v3 = vpop.f32.mrf.mxu1 }
 0x19c   : > { %4102 = vst [vmem:[#allocation32_spill] sm:$0xff] %v3335_v5  ;;  %v3340_v45 = vadd.f32 %v3197_v0, %v844_v3 }
 0x19d   : > { %2383 = vmatmul.mubr.bf16.gmra.mxu1 %v1045_v39  ;;  %v2528_v34 = vpop.f32.mrf.mxu1 }
 0x19e   : > { %2384 = vmatprep.mubr.bf16.mxu1 %v1046_v10  ;;  %4103 = vst [vmem:[#allocation33_spill] sm:$0xff] %v3340_v45  ;;  %v3347_v23 = vadd.f32 %v2528_v34, %v3197_v0 }
 0x19f   : > { %v3344_v25 = vpop.f32.mrf.mxu1 }
 0x1a0   : > { %4104 = vst [vmem:[#allocation34_spill] sm:$0xff] %v3344_v25  ;;  %4105 = vst [vmem:[#allocation35_spill] sm:$0xff] %v3347_v23 }
 0x1a1   : > { %v2529_v50 = vpop.f32.mrf.mxu1 }
 0x1a2   : > { %v3350_v39 = vadd.f32 %v2529_v50, %v3197_v0 }
 0x1a4   : > { %4106 = vst [vmem:[#allocation36_spill] sm:$0xff] %v3350_v39 }
 0x1a5   : > { %2385 = vmatmul.mubr.bf16.gmra.mxu1 %v1046_v10  ;;  %v3362_v10 = vpop.f32.mrf.mxu1 }
 0x1a6   : > { %2578 = vmatprep.mubr.bf16.mxu1 %v3000_v41  ;;  %4107 = vst [vmem:[#allocation37_spill] sm:$0xff] %v3362_v10 }
 0x1ad   : > { %2579 = vmatmul.mubr.bf16.vlgmr.msra.gmra.mxu1 %v3017_v47 }
 0x1ae   : > { %2582 = vmatprep.mubr.bf16.mxu1 %v3019_v48 }
 0x1b5   : > { %2583 = vmatmul.mubr.bf16.gmra.mxu1 %v3028_v53 }
 0x1b6   : > { %2586 = vmatprep.mubr.bf16.mxu1 %v3030_v54 }
 0x1bd   : > { %2587 = vmatmul.mubr.bf16.gmra.mxu1 %v3038_v59 }
 0x1be   : > { %2590 = vmatprep.mubr.bf16.mxu1 %v3040_v60 }
 0x1c5   : > { %2591 = vmatmul.mubr.bf16.gmra.mxu1 %v3046_v63 }
 0x22d   : > { %v3364_v3 = vpop.f32.mrf.mxu1 }
 0x22f   : > { %v3366_v34 = vpop.f32.mrf.mxu1 }
 0x231   : > { %v3368_v41 = vpop.f32.mrf.mxu1 }
 0x233   : > { %v3370_v47 = vpop.f32.mrf.mxu1 }
 0x235   : > { %v3372_v48 = vpop.f32.mrf.mxu1 }
 0x237   : > { %v3374_v53 = vpop.f32.mrf.mxu1 }
 0x239   : > { %v3376_v54 = vpop.f32.mrf.mxu1 }
 0x23b   : > { %v3378_v59 = vpop.f32.mrf.mxu1 }
 0x23d   : > { %v3380_v60 = vpop.f32.mrf.mxu1 }
 0x23f   : > { %v3382_v63 = vpop.f32.mrf.mxu1 }
 0x241   : > { %v3384_v50 = vpop.f32.mrf.mxu1 }
 0x243   : > { %v3386_v32 = vpop.f32.mrf.mxu1 }
 0x244   : > { %v1175_v36 = vmax.f32 %v3384_v50, %v3386_v32 }
 0x245   : > { %v3388_v28 = vpop.f32.mrf.mxu1 }
 0x247   : > { %v3390_v13 = vpop.f32.mrf.mxu1 }
 0x249   : > { %v3392_v15 = vpop.f32.mrf.mxu1 }
 0x24b   : > { %v3394_v21 = vpop.f32.mrf.mxu1 }
 0x24d   : > { %v3396_v62 = vpop.f32.mrf.mxu1 }
 0x24f   : > { %v3398_v17 = vpop.f32.mrf.mxu1 }
 0x251   : > { %v3400_v57 = vpop.f32.mrf.mxu1 }
 0x253   : > { %v3402_v35 = vpop.f32.mrf.mxu1 }
 0x254   : > { %v1187_v1 = vmax.f32 %v3400_v57, %v3402_v35 }
 0x255   : > { %v3404_v38 = vpop.f32.mrf.mxu1 }
 0x257   : > { %v3406_v30 = vpop.f32.mrf.mxu1 }
 0x259   : > { %v3408_v4 = vpop.f32.mrf.mxu1 }
 0x25b   : > { %v3410_v6 = vpop.f32.mrf.mxu1 }
 0x25c   : > { %v1193_v16 = vmax.f32 %v3408_v4, %v3410_v6 }
 0x25d   : > { %v1141_v8 = vpop.f32.mrf.mxu1 }
 0x25f   : > { %v1143_v7 = vpop.f32.mrf.mxu1 }
 0x260   : > { %v1196_v56 = vmax.f32 %v1141_v8, %v1143_v7 }
 0x261   : > { %v1145_v55 = vpop.f32.mrf.mxu1 }
 0x262   : > { %1197 = vmax.xlane.f32.xlu1 %v1196_v56  ;;  %v1181_v56 = vmax.f32 %v3392_v15, %v3394_v21 }
 0x263   : > { %v1147_v27 = vpop.f32.mrf.mxu1 }
 0x264   : > { %v1199_v24 = vmax.f32 %v1145_v55, %v1147_v27 }
 0x265   : > { %v1151_v20 = vpop.f32.mrf.mxu1 }
 0x266   : > { %1200 = vmax.xlane.f32.xlu1 %v1199_v24  ;;  %v1190_v24 = vmax.f32 %v3404_v38, %v3406_v30 }
 0x267   : > { %v1153_v61 = vpop.f32.mrf.mxu1 }
 0x268   : > { %v1202_v23 = vmax.f32 %v1151_v20, %v1153_v61 }
 0x269   : > { %v1155_v39 = vpop.f32.mrf.mxu1 }
 0x26a   : > { %1194 = vmax.xlane.f32.xlu1 %v1193_v16  ;;  %1203 = vmax.xlane.f32.xlu0 %v1202_v23  ;;  %v1184_v16 = vmax.f32 %v3396_v62, %v3398_v17  ;;  %v1163_v23 = vmax.f32 %v3368_v41, %v3370_v47 }
 0x26b   : > { %v1157_v31 = vpop.f32.mrf.mxu1 }
 0x26c   : > { %v1205_v22 = vmax.f32 %v1155_v39, %v1157_v31 }
 0x26e   : > { %1188 = vmax.xlane.f32.xlu1 %v1187_v1  ;;  %1206 = vmax.xlane.f32.xlu0 %v1205_v22  ;;  %v1169_v1 = vmax.f32 %v3376_v54, %v3378_v59  ;;  %v1178_v22 = vmax.f32 %v3388_v28, %v3390_v13 }
 0x272   : > { %1182 = vmax.xlane.f32.xlu1 %v1181_v56  ;;  %1191 = vmax.xlane.f32.xlu0 %v1190_v24  ;;  %v1172_v56 = vmax.f32 %v3380_v60, %v3382_v63  ;;  %v1160_v24 = vmax.f32 %v3364_v3, %v3366_v34 }
 0x276   : > { %1176 = vmax.xlane.f32.xlu1 %v1175_v36  ;;  %1185 = vmax.xlane.f32.xlu0 %v1184_v16  ;;  %v1166_v36 = vmax.f32 %v3372_v48, %v3374_v53 }
 0x27a   : > { %1170 = vmax.xlane.f32.xlu1 %v1169_v1  ;;  %1179 = vmax.xlane.f32.xlu0 %v1178_v22 }
 0x27e   : > { %1164 = vmax.xlane.f32.xlu1 %v1163_v23  ;;  %1173 = vmax.xlane.f32.xlu0 %v1172_v56 }
 0x282   : > { %1167 = vmax.xlane.f32.xlu0 %v1166_v36 }
 0x286   : > { %1161 = vmax.xlane.f32.xlu0 %v1160_v24 }
 0x2eb   : > { %v1198_v16 = vpop.xlane.xlu1 %1197 }
 0x2ec   : > { %v1232_v1 = vsub.f32 %v1141_v8, %v1198_v16  ;;  %v1233_v22 = vsub.f32 %v1143_v7, %v1198_v16 }
 0x2ee   : > { %v1288_v58 = vmul.f32 1.442695, %v1232_v1  ;;  %v1290_v25 = vmul.f32 1.442695, %v1233_v22 }
 0x2ef   : > { %v1201_v12 = vpop.xlane.xlu1 %1200 }
 0x2f0   : > { %v1234_v10 = vsub.f32 %v1145_v55, %v1201_v12  ;;  %v1235_v23 = vsub.f32 %v1147_v27, %v1201_v12  ;;  %2626 = vpow2.f32 %v1288_v58 }
 0x2f1   : > { %2628 = vpow2.f32 %v1290_v25 }
 0x2f2   : > { %v1292_v37 = vmul.f32 1.442695, %v1234_v10  ;;  %v1294_v8 = vmul.f32 1.442695, %v1235_v23 }
 0x2f3   : > { %v1195_v5 = vpop.xlane.xlu1 %1194  ;;  %v1204_v46 = vpop.xlane.xlu0 %1203 }
 0x2f4   : > { %v1236_v0 = vsub.f32 %v1151_v20, %v1204_v46  ;;  %v1237_v56 = vsub.f32 %v1153_v61, %v1204_v46  ;;  %v1230_v24 = vsub.f32 %v3408_v4, %v1195_v5  ;;  %v1231_v7 = vsub.f32 %v3410_v6, %v1195_v5 }
 0x2f6   : > { %v1296_v9 = vmul.f32 1.442695, %v1236_v0  ;;  %v1298_v45 = vmul.f32 1.442695, %v1237_v56  ;;  %v1284_v0 = vmul.f32 1.442695, %v1230_v24 }
 0x2f7   : > { %v1189_v43 = vpop.xlane.xlu1 %1188  ;;  %v1207_v36 = vpop.xlane.xlu0 %1206  ;;  %v1286_v4 = vmul.f32 1.442695, %v1231_v7 }
 0x2f8   : > { %v1238_v33 = vsub.f32 %v1155_v39, %v1207_v36  ;;  %v1239_v16 = vsub.f32 %v1157_v31, %v1207_v36  ;;  %2630 = vpow2.f32 %v1296_v9  ;;  %v1226_v61 = vsub.f32 %v3400_v57, %v1189_v43 }
 0x2f9   : > { %2632 = vpow2.f32 %v1298_v45  ;;  %v1227_v12 = vsub.f32 %v3402_v35, %v1189_v43 }
 0x2fa   : > { %v1300_v55 = vmul.f32 1.442695, %v1238_v33  ;;  %v1302_v20 = vmul.f32 1.442695, %v1239_v16  ;;  %2634 = vpow2.f32 %v1292_v37  ;;  %v1276_v9 = vmul.f32 1.442695, %v1226_v61 }
 0x2fb   : > { %v1183_v27 = vpop.xlane.xlu1 %1182  ;;  %v1192_v46 = vpop.xlane.xlu0 %1191  ;;  %2636 = vpow2.f32 %v1294_v8  ;;  %v1278_v57 = vmul.f32 1.442695, %v1227_v12 }
 0x2fc   : > { %v1228_v58 = vsub.f32 %v3404_v38, %v1192_v46  ;;  %v1229_v25 = vsub.f32 %v3406_v30, %v1192_v46  ;;  %2638 = vpow2.f32 %v1300_v55  ;;  %v1222_v37 = vsub.f32 %v3392_v15, %v1183_v27 }
 0x2fd   : > { %2640 = vpow2.f32 %v1302_v20  ;;  %v1223_v38 = vsub.f32 %v3394_v21, %v1183_v27  ;;  %v3448_v22 = vpop.eup %2626 }
 0x2fe   : > { %v1280_v6 = vmul.f32 1.442695, %v1228_v58  ;;  %v1282_v31 = vmul.f32 1.442695, %v1229_v25  ;;  %2642 = vpow2.f32 %v1284_v0  ;;  %v1268_v10 = vmul.f32 1.442695, %v1222_v37 }
 0x2ff   : > { %v1186_v33 = vpop.xlane.xlu0 %1185  ;;  %2644 = vpow2.f32 %v1286_v4  ;;  %v1177_v45 = vpop.xlane.xlu1 %1176 }
 0x300   : > { %v1224_v5 = vsub.f32 %v3396_v62, %v1186_v33  ;;  %v1225_v35 = vsub.f32 %v3398_v17, %v1186_v33  ;;  %2646 = vpow2.f32 %v1280_v6  ;;  %v1218_v1 = vsub.f32 %v3384_v50, %v1177_v45  ;;  %v3452_v17 = vpop.eup %2628 }
 0x301   : > { %2648 = vpow2.f32 %v1282_v31  ;;  %v1270_v62 = vmul.f32 1.442695, %v1223_v38  ;;  %v1219_v21 = vsub.f32 %v3386_v32, %v1177_v45  ;;  %v1340_v31 = vadd.f32 %v3452_v17, %v3448_v22 }
 0x302   : > { %v1272_v30 = vmul.f32 1.442695, %v1224_v5  ;;  %v1274_v43 = vmul.f32 1.442695, %v1225_v35  ;;  %2650 = vpow2.f32 %v1276_v9 }
 0x303   : > { %v1180_v39 = vpop.xlane.xlu0 %1179  ;;  %2652 = vpow2.f32 %v1278_v57  ;;  %v1171_v24 = vpop.xlane.xlu1 %1170 }
 0x304   : > { %v1220_v15 = vsub.f32 %v3388_v28, %v1180_v39  ;;  %v1221_v23 = vsub.f32 %v3390_v13, %v1180_v39  ;;  %2654 = vpow2.f32 %v1272_v30  ;;  %v1260_v28 = vmul.f32 1.442695, %v1218_v1 }
 0x305   : > { %v3454_v36 = vpop.eup %2630  ;;  %2656 = vpow2.f32 %v1274_v43  ;;  %v1262_v13 = vmul.f32 1.442695, %v1219_v21  ;;  %v1214_v46 = vsub.f32 %v3376_v54, %v1171_v24  ;;  %v1215_v58 = vsub.f32 %v3378_v59, %v1171_v24 }
 0x306   : > { %v1264_v56 = vmul.f32 1.442695, %v1220_v15  ;;  %v1266_v8 = vmul.f32 1.442695, %v1221_v23  ;;  %v3456_v7 = vpop.eup %2632  ;;  %2658 = vpow2.f32 %v1268_v10 }
 0x307   : > { %v1174_v50 = vpop.xlane.xlu0 %1173  ;;  %v3459_v55 = vpop.eup %2634  ;;  %2660 = vpow2.f32 %v1270_v62  ;;  %v1346_v20 = vadd.f32 %v3456_v7, %v3454_v36  ;;  %v1252_v9 = vmul.f32 1.442695, %v1214_v46 }
 0x308   : > { %v1216_v16 = vsub.f32 %v3380_v60, %v1174_v50  ;;  %v1217_v32 = vsub.f32 %v3382_v63, %v1174_v50  ;;  %v3464_v27 = vpop.eup %2636  ;;  %2662 = vpow2.f32 %v1264_v56  ;;  %v1165_v54 = vpop.xlane.xlu1 %1164 }
 0x309   : > { %v3467_v61 = vpop.eup %2638  ;;  %2664 = vpow2.f32 %v1266_v8  ;;  %1347 = vadd.xlane.f32.xlu0 %v1346_v20  ;;  %v1210_v45 = vsub.f32 %v3368_v41, %v1165_v54  ;;  %v1211_v39 = vsub.f32 %v3370_v47, %v1165_v54  ;;  %v1343_v10 = vadd.f32 %v3464_v27, %v3459_v55 }
 0x30a   : > { %v1256_v0 = vmul.f32 1.442695, %v1216_v16  ;;  %v1258_v60 = vmul.f32 1.442695, %v1217_v32  ;;  %v3470_v12 = vpop.eup %2640  ;;  %2666 = vpow2.f32 %v1260_v28 }
 0x30b   : > { %v1168_v4 = vpop.xlane.xlu0 %1167  ;;  %v3474_v6 = vpop.eup %2642  ;;  %2668 = vpow2.f32 %v1262_v13  ;;  %v1349_v59 = vadd.f32 %v3470_v12, %v3467_v61  ;;  %v1246_v23 = vmul.f32 1.442695, %v1211_v39  ;;  %v4109_v39 = vpack.c.bf16 %v3219_v52, %v3216_v51  ;;  %v4116_v52 = vld [vmem:[#allocation20_spill] sm:$0xff] }
 0x30c   : > { %v1212_v63 = vsub.f32 %v3372_v48, %v1168_v4  ;;  %v1213_v25 = vsub.f32 %v3374_v53, %v1168_v4  ;;  %v3480_v33 = vpop.eup %2644  ;;  %2670 = vpow2.f32 %v1256_v0  ;;  %v1254_v48 = vmul.f32 1.442695, %v1215_v58 }
 0x30d   : > { %v3482_v57 = vpop.eup %2646  ;;  %2672 = vpow2.f32 %v1258_v60  ;;  %1341 = vadd.xlane.f32.xlu0 %v1340_v31  ;;  %1350 = vadd.xlane.f32.xlu1 %v1349_v59  ;;  %v1337_v56 = vadd.f32 %v3480_v33, %v3474_v6 }
 0x30e   : > { %v1248_v37 = vmul.f32 1.442695, %v1212_v63  ;;  %v1250_v5 = vmul.f32 1.442695, %v1213_v25  ;;  %v3484_v38 = vpop.eup %2648 }
 0x30f   : > { %v1162_v53 = vpop.xlane.xlu0 %1161  ;;  %v3489_v43 = vpop.eup %2650  ;;  %v1334_v1 = vadd.f32 %v3484_v38, %v3482_v57 }
 0x310   : > { %2674 = vpow2.f32 %v1248_v37  ;;  %v1208_v35 = vsub.f32 %v3364_v3, %v1162_v53  ;;  %v1209_v30 = vsub.f32 %v3366_v34, %v1162_v53  ;;  %v3496_v15 = vpop.eup %2652  ;;  %v1244_v34 = vmul.f32 1.442695, %v1210_v45 }
 0x311   : > { %2676 = vpow2.f32 %v1250_v5  ;;  %v3498_v21 = vpop.eup %2654  ;;  %1344 = vadd.xlane.f32.xlu1 %v1343_v10  ;;  %1335 = vadd.xlane.f32.xlu0 %v1334_v1  ;;  %v1331_v13 = vadd.f32 %v3496_v15, %v3489_v43  ;;  %v4110_v10 = vpack.c.bf16 %v3296_v26, %v3292_v2  ;;  %v4111_v1 = vpack.c.bf16 %v3206_v44, %v3203_v19  ;;  %v4119_v2 = vld [vmem:[#allocation33_spill] sm:$0xff]  ;;  %v4122_v44 = vld [vmem:[#allocation34_spill] sm:$0xff] }
 0x312   : > { %2678 = vpow2.f32 %v1252_v9  ;;  %v1240_v41 = vmul.f32 1.442695, %v1208_v35  ;;  %v1242_v62 = vmul.f32 1.442695, %v1209_v30  ;;  %v3500_v3 = vpop.eup %2656  ;;  %v4108_v30 = vpack.c.bf16 %v3306_v42, %v3303_v49  ;;  %v4114_v42 = vld [vmem:[#allocation29_spill] sm:$0xff] }
 0x313   : > { %2680 = vpow2.f32 %v1254_v48  ;;  %v3502_v47 = vpop.eup %2658  ;;  %v1328_v24 = vadd.f32 %v3500_v3, %v3498_v21  ;;  %v4113_v49 = vpack.c.bf16 %v3238_v18, %v3230_v11  ;;  %v4115_v51 = vpack.c.bf16 %v3317_v14, %v4114_v42  ;;  %v4125_v11 = vld [vmem:[#allocation24_spill] sm:$0xff]  ;;  %v4126_v18 = vld [vmem:[#allocation22_spill] sm:$0xff] }
 0x314   : > { %2682 = vpow2.f32 %v1240_v41  ;;  %v3508_v8 = vpop.eup %2660  ;;  %v4112_v41 = vpack.c.bf16 %v3322_v40, %v3314_v29  ;;  %v4124_v40 = vld [vmem:[#allocation37_spill] sm:$0xff]  ;;  %v4128_v14 = vld [vmem:[#allocation32_spill] sm:$0xff] }
 0x315   : > { %2684 = vpow2.f32 %v1242_v62  ;;  %v3510_v50 = vpop.eup %2662  ;;  %1338 = vadd.xlane.f32.xlu1 %v1337_v56  ;;  %1329 = vadd.xlane.f32.xlu0 %v1328_v24  ;;  %v1325_v60 = vadd.f32 %v3508_v8, %v3502_v47  ;;  %v4117_v62 = vld [vmem:[#allocation19_spill] sm:$0xff]  ;;  %v4127_v24 = vpack.c.bf16 %v4125_v11, %v4126_v18 }
 0x316   : > { %v3512_v28 = vpop.eup %2664  ;;  %2686 = vpow2.f32 %v1244_v34  ;;  %v4118_v26 = vpack.c.bf16 %v4116_v52, %v4117_v62  ;;  %v4120_v34 = vld [vmem:[#allocation31_spill] sm:$0xff] }
 0x317   : > { %v3514_v16 = vpop.eup %2666  ;;  %2688 = vpow2.f32 %v1246_v23  ;;  %v1322_v32 = vadd.f32 %v3512_v28, %v3510_v50  ;;  %v4121_v19 = vpack.c.bf16 %v4119_v2, %v4120_v34  ;;  %v4123_v23 = vld [vmem:[#allocation18_spill] sm:$0xff] }
 0x318   : > { %v3520_v20 = vpop.eup %2668  ;;  %v858_v29 = vadd.f32 %v4123_v23, %v4122_v44  ;;  %v861_v56 = vadd.f32 %v4123_v23, %v4124_v40 }
 0x319   : > { %v3522_v46 = vpop.eup %2670  ;;  %1332 = vadd.xlane.f32.xlu1 %v1331_v13  ;;  %1323 = vadd.xlane.f32.xlu0 %v1322_v32  ;;  %v1319_v9 = vadd.f32 %v3520_v20, %v3514_v16  ;;  %v4129_v13 = vld [vmem:[#allocation30_spill] sm:$0xff] }
 0x31a   : > { %v3524_v0 = vpop.eup %2672  ;;  %v4130_v32 = vpack.c.bf16 %v4128_v14, %v4129_v13 }
 0x31b   : > { %v1316_v4 = vadd.f32 %v3524_v0, %v3522_v46 }
 0x31d   : > { %v3526_v58 = vpop.eup %2674  ;;  %1326 = vadd.xlane.f32.xlu1 %v1325_v60  ;;  %1317 = vadd.xlane.f32.xlu0 %v1316_v4  ;;  %v886_v60 = vpack.c.bf16 %v861_v56, %v858_v29  ;;  %v4131_v4 = vld [vmem:[#allocation23_spill] sm:$0xff] }
 0x31e   : > { %v3532_v63 = vpop.eup %2676 }
 0x31f   : > { %v3534_v25 = vpop.eup %2678  ;;  %v1310_v54 = vadd.f32 %v3532_v63, %v3526_v58 }
 0x320   : > { %v3538_v31 = vpop.eup %2680 }
 0x321   : > { %v3540_v59 = vpop.eup %2682  ;;  %1320 = vadd.xlane.f32.xlu1 %v1319_v9  ;;  %1311 = vadd.xlane.f32.xlu0 %v1310_v54  ;;  %v1313_v53 = vadd.f32 %v3538_v31, %v3534_v25  ;;  %v4132_v54 = vld [vmem:[#allocation21_spill] sm:$0xff] }
 0x322   : > { %v3544_v37 = vpop.eup %2684  ;;  %v4133_v9 = vpack.c.bf16 %v4131_v4, %v4132_v54 }
 0x323   : > { %v1304_v5 = vadd.f32 %v3544_v37, %v3540_v59  ;;  %v3548_v48 = vpop.eup %2686 }
 0x324   : > { %v3552_v45 = vpop.eup %2688 }
 0x325   : > { %1314 = vadd.xlane.f32.xlu1 %v1313_v53  ;;  %1305 = vadd.xlane.f32.xlu0 %v1304_v5  ;;  %v1307_v35 = vadd.f32 %v3552_v45, %v3548_v48  ;;  %v4134_v5 = vld [vmem:[#allocation28_spill] sm:$0xff]  ;;  %v4135_v53 = vld [vmem:[#allocation26_spill] sm:$0xff] }
 0x329   : > { %1308 = vadd.xlane.f32.xlu1 %v1307_v35  ;;  %v4136_v35 = vpack.c.bf16 %v4134_v5, %v4135_v53 }
 0x352   : > { %1448 = vxpose.xlu0.c.b16.start [1/8] %v4108_v30, 128  ;;  %v4137_v30 = vld [vmem:[#allocation36_spill] sm:$0xff] }
 0x356   : > { %1432 = vxpose.xlu1.c.b16.start [1/8] %v4109_v39, 128  ;;  %1449 = vxpose.xlu0.c.b16.cont [2/8] %v4110_v10, 128  ;;  %v4138_v39 = vld [vmem:[#allocation35_spill] sm:$0xff] }
 0x357   : > { %v4139_v10 = vpack.c.bf16 %v4137_v30, %v4138_v39 }
 0x35a   : > { %1433 = vxpose.xlu1.c.b16.cont [2/8] %v4111_v1, 128  ;;  %1450 = vxpose.xlu0.c.b16.cont [3/8] %v4112_v41, 128  ;;  %v4140_v1 = vld [vmem:[#allocation27_spill] sm:$0xff]  ;;  %v4141_v41 = vld [vmem:[#allocation25_spill] sm:$0xff] }
 0x35e   : > { %1434 = vxpose.xlu1.c.b16.cont [3/8] %v4113_v49, 128  ;;  %1451 = vxpose.xlu0.c.b16.cont [4/8] %v4115_v51, 128  ;;  %v4142_v49 = vpack.c.bf16 %v4140_v1, %v4141_v41 }
 0x362   : > { %1435 = vxpose.xlu1.c.b16.cont [4/8] %v4118_v26, 128  ;;  %1452 = vxpose.xlu0.c.b16.cont [5/8] %v4121_v19, 128 }
 0x366   : > { %1436 = vxpose.xlu1.c.b16.cont [5/8] %v4127_v24, 128  ;;  %1453 = vxpose.xlu0.c.b16.cont [6/8] %v4130_v32, 128 }
 0x36a   : > { %1437 = vxpose.xlu1.c.b16.cont [6/8] %v4133_v9, 128  ;;  %1454 = vxpose.xlu0.c.b16.cont [7/8] %v886_v60, 128 }
 0x36e   : > { %1438 = vxpose.xlu1.c.b16.cont [7/8] %v4136_v35, 128  ;;  %1455 = vxpose.xlu0.c.b16.end [8/8] %v4139_v10, 128 }
 0x372   : > { %1439 = vxpose.xlu1.c.b16.end [8/8] %v4142_v49, 128 }
 0x392   : > { %v1348_v42 = vpop.xlane.xlu0 %1347 }
 0x393   : > { %2690 = vrcp.f32 %v1348_v42 }
 0x396   : > { %v1351_v51 = vpop.xlane.xlu1 %1350  ;;  %v1342_v52 = vpop.xlane.xlu0 %1341 }
 0x397   : > { %2692 = vrcp.f32 %v1351_v51 }
 0x398   : > { %2694 = vrcp.f32 %v1342_v52 }
 0x39a   : > { %v1345_v62 = vpop.xlane.xlu1 %1344  ;;  %v1336_v26 = vpop.xlane.xlu0 %1335 }
 0x39b   : > { %2696 = vrcp.f32 %v1345_v62 }
 0x39c   : > { %2698 = vrcp.f32 %v1336_v26 }
 0x39e   : > { %v1339_v2 = vpop.xlane.xlu1 %1338  ;;  %v1330_v34 = vpop.xlane.xlu0 %1329 }
 0x39f   : > { %2700 = vrcp.f32 %v1339_v2 }
 0x3a0   : > { %v2691_v19 = vpop.eup %2690 }
 0x3a1   : > { %v1397_v40 = vmul.f32 %v2691_v19, %v3456_v7  ;;  %v1396_v11 = vmul.f32 %v2691_v19, %v3454_v36 }
 0x3a2   : > { %v1333_v44 = vpop.xlane.xlu1 %1332  ;;  %v1324_v23 = vpop.xlane.xlu0 %1323 }
 0x3a3   : > { %2702 = vrcp.f32 %v1333_v44 }
 0x3a4   : > { %v2693_v29 = vpop.eup %2692  ;;  %2704 = vrcp.f32 %v1330_v34 }
 0x3a5   : > { %v1399_v56 = vmul.f32 %v2693_v29, %v3470_v12  ;;  %v1398_v18 = vmul.f32 %v2693_v29, %v3467_v61  ;;  %v2695_v24 = vpop.eup %2694 }
 0x3a6   : > { %v1318_v14 = vpop.xlane.xlu0 %1317  ;;  %v1393_v4 = vmul.f32 %v2695_v24, %v3452_v17  ;;  %v1327_v9 = vpop.xlane.xlu1 %1326  ;;  %v1392_v35 = vmul.f32 %v2695_v24, %v3448_v22 }
 0x3a7   : > { %v1415_v13 = vpack.c.bf16 %v1399_v56, %v1397_v40  ;;  %v1414_v32 = vpack.c.bf16 %v1398_v18, %v1396_v11  ;;  %2706 = vrcp.f32 %v1327_v9 }
 0x3a8   : > { %v2697_v60 = vpop.eup %2696  ;;  %2708 = vrcp.f32 %v1324_v23 }
 0x3a9   : > { %1464 = vmatprep.subr.bf16.mxu0 %v1415_v13  ;;  %v1395_v54 = vmul.f32 %v2697_v60, %v3464_v27  ;;  %v2699_v5 = vpop.eup %2698  ;;  %v1394_v36 = vmul.f32 %v2697_v60, %v3459_v55 }
 0x3aa   : > { %1465 = vmatpush1.bf16.xpose.msra.mxu0 %v1414_v32  ;;  %v1312_v7 = vpop.xlane.xlu0 %1311  ;;  %v1389_v30 = vmul.f32 %v2699_v5, %v3484_v38  ;;  %v1321_v1 = vpop.xlane.xlu1 %1320  ;;  %v1388_v22 = vmul.f32 %v2699_v5, %v3482_v57 }
 0x3ab   : > { %v1413_v12 = vpack.c.bf16 %v1395_v54, %v1393_v4  ;;  %v1412_v39 = vpack.c.bf16 %v1394_v36, %v1392_v35  ;;  %2710 = vrcp.f32 %v1321_v1  ;;  %v4149_v35 = vld [vmem:[#allocation14_spill] sm:$0xff] }
 0x3ac   : > { %v2701_v53 = vpop.eup %2700  ;;  %2712 = vrcp.f32 %v1318_v14 }
 0x3ad   : > { %1466 = vmatprep.subr.bf16.mxu0 %v1413_v12  ;;  %v1391_v61 = vmul.f32 %v2701_v53, %v3480_v33  ;;  %v1390_v49 = vmul.f32 %v2701_v53, %v3474_v6  ;;  %v4147_v12 = vld [vmem:[#allocation12_spill] sm:$0xff] }
 0x3ae   : > { %v1306_v17 = vpop.xlane.xlu0 %1305  ;;  %v1315_v62 = vpop.xlane.xlu1 %1314 }
 0x3af   : > { %v1411_v27 = vpack.c.bf16 %v1391_v61, %v1389_v30  ;;  %v1410_v38 = vpack.c.bf16 %v1390_v49, %v1388_v22  ;;  %2714 = vrcp.f32 %v1315_v62  ;;  %v4148_v61 = vld [vmem:[#allocation13_spill] sm:$0xff] }
 0x3b0   : > { %v2703_v10 = vpop.eup %2702  ;;  %2716 = vrcp.f32 %v1312_v7  ;;  %v4143_v7 = vld [vmem:[#allocation8_spill] sm:$0xff]  ;;  %v4153_v49 = vld [vmem:[#allocation17_spill] sm:$0xff] }
 0x3b1   : > { %v2705_v41 = vpop.eup %2704  ;;  %v1387_v42 = vmul.f32 %v2703_v10, %v3496_v15  ;;  %v1386_v6 = vmul.f32 %v2703_v10, %v3489_v43 }
 0x3b2   : > { %1467 = vmatpush1.bf16.xpose.msra.mxu0 %v1412_v39  ;;  %v1385_v33 = vmul.f32 %v2705_v41, %v3500_v3  ;;  %v1384_v15 = vmul.f32 %v2705_v41, %v3498_v21  ;;  %v1309_v44 = vpop.xlane.xlu1 %1308  ;;  %v4150_v39 = vld [vmem:[#allocation15_spill] sm:$0xff]  ;;  %v4152_v41 = vld [vmem:[#allocation4_spill] sm:$0xff] }
 0x3b3   : > { %1468 = vmatprep.subr.bf16.mxu0 %v1411_v27  ;;  %2718 = vrcp.f32 %v1309_v44  ;;  %v4151_v27 = vld [vmem:[#allocation16_spill] sm:$0xff] }
 0x3b4   : > { %v1456_v55 = vpop.trf.xlu0  ;;  %v1409_v51 = vpack.c.bf16 %v1387_v42, %v1385_v33  ;;  %v2707_v52 = vpop.eup %2706  ;;  %v1408_v34 = vpack.c.bf16 %v1386_v6, %v1384_v15  ;;  %2720 = vrcp.f32 %v1306_v17 }
 0x3b5   : > { %1496 = vmatprep.mubr.bf16.mxu0 %v1456_v55  ;;  %2099 = vmatprep.mubr.bf16.mxu1 %v1456_v55  ;;  %v2709_v26 = vpop.eup %2708  ;;  %v1383_v2 = vmul.f32 %v2707_v52, %v3508_v8  ;;  %v1382_v29 = vmul.f32 %v2707_v52, %v3502_v47  ;;  %v2580_v55 = vpop.f32.mrf.mxu1 }
 0x3b6   : > { %v1381_v57 = vmul.f32 %v2709_v26, %v3512_v28  ;;  %v1380_v40 = vmul.f32 %v2709_v26, %v3510_v50 }
 0x3b7   : > { %v1611_v33 = vpop.f32.mrf.mxu1 }
 0x3b8   : > { %v1407_v19 = vpack.c.bf16 %v1383_v2, %v1381_v57  ;;  %v2711_v3 = vpop.eup %2710  ;;  %v1406_v8 = vpack.c.bf16 %v1382_v29, %v1380_v40  ;;  %v3638_v5 = vpop.trf.xlu1  ;;  %v2818_v2 = vld [vmem:[%s4030_s3] ss:$0 sm:$0xff] }
 0x3b9   : > { %v2713_v23 = vpop.eup %2712  ;;  %v1379_v43 = vmul.f32 %v2711_v3, %v3520_v20  ;;  %v1378_v18 = vmul.f32 %v2711_v3, %v3514_v16  ;;  %v2581_v52 = vpop.f32.mrf.mxu1  ;;  %v1612_v15 = vadd.f32 %v2818_v2, %v1611_v33  ;;  %v4156_v57 = vld [vmem:[#allocation2_spill] sm:$0xff]  ;;  %v1417_v33 = vld [vmem:[%s3705_s30 + $0x10] sm:$0xff] }
 0x3ba   : > { %1469 = vmatpush1.bf16.xpose.msra.mxu0 %v1410_v38  ;;  %v1377_v21 = vmul.f32 %v2713_v23, %v3524_v0  ;;  %v1376_v47 = vmul.f32 %v2713_v23, %v3522_v46  ;;  %v4154_v38 = vld [vmem:[#allocation5_spill] sm:$0xff] }
 0x3bb   : > { %1470 = vmatprep.subr.bf16.mxu0 %v1409_v51  ;;  %v4155_v51 = vld [vmem:[#allocation6_spill] sm:$0xff]  ;;  %v1614_v26 = vpop.f32.mrf.mxu1 }
 0x3bc   : > { %v1405_v56 = vpack.c.bf16 %v1379_v43, %v1377_v21  ;;  %v2715_v28 = vpop.eup %2714  ;;  %v1404_v20 = vpack.c.bf16 %v1378_v18, %v1376_v47  ;;  %v4159_v43 = vld [vmem:[#allocation3_spill] sm:$0xff]  ;;  %v1620_v21 = vadd.f32 %v2818_v2, %v2580_v55 }
 0x3bd   : > { %v2717_v11 = vpop.eup %2716  ;;  %v1375_v24 = vmul.f32 %v2715_v28, %v3538_v31  ;;  %v1374_v32 = vmul.f32 %v2715_v28, %v3534_v25  ;;  %v3640_v25 = vpop.trf.xlu0 }
 0x3be   : > { %v1373_v14 = vmul.f32 %v2717_v11, %v3532_v63  ;;  %v1372_v4 = vmul.f32 %v2717_v11, %v3526_v58  ;;  %v4144_v58 = vld [vmem:[#allocation9_spill] sm:$0xff]  ;;  %v2584_v3 = vpop.f32.mrf.mxu1 }
 0x3c0   : > { %v1403_v13 = vpack.c.bf16 %v1375_v24, %v1373_v14  ;;  %v2719_v50 = vpop.eup %2718  ;;  %v1402_v54 = vpack.c.bf16 %v1374_v32, %v1372_v4  ;;  %v1627_v29 = vpop.f32.mrf.mxu1 }
 0x3c1   : > { %v2721_v0 = vpop.eup %2720  ;;  %v1371_v60 = vmul.f32 %v2719_v50, %v3552_v45  ;;  %v1370_v46 = vmul.f32 %v2719_v50, %v3548_v48  ;;  %v3646_v45 = vpop.trf.xlu1  ;;  %v1628_v11 = vadd.f32 %v2818_v2, %v1627_v29  ;;  %v1420_v29 = vld [vmem:[%s3705_s30 + $0x40] sm:$0xff] }
 0x3c2   : > { %1471 = vmatpush1.bf16.xpose.msra.mxu0 %v1408_v34  ;;  %v1369_v16 = vmul.f32 %v2721_v0, %v3544_v37  ;;  %v1368_v63 = vmul.f32 %v2721_v0, %v3540_v59  ;;  %v4145_v37 = vld [vmem:[#allocation10_spill] sm:$0xff]  ;;  %v3648_v48 = vpop.trf.xlu0  ;;  %v4146_v59 = vld [vmem:[#allocation11_spill] sm:$0xff]  ;;  %v1615_v34 = vadd.f32 %v2818_v2, %v1614_v26  ;;  %v2585_v40 = vpop.f32.mrf.mxu1 }
 0x3c3   : > { %1472 = vmatprep.subr.bf16.mxu0 %v1407_v19  ;;  %v4157_v19 = vld [vmem:[#allocation7_spill] sm:$0xff]  ;;  %v1639_v50 = vadd.f32 %v2818_v2, %v2585_v40  ;;  %v1418_v26 = vld [vmem:[%s3705_s30 + $0x20] sm:$0xff] }
 0x3c4   : > { %v1401_v31 = vpack.c.bf16 %v1371_v60, %v1369_v16  ;;  %v1400_v9 = vpack.c.bf16 %v1370_v46, %v1368_v63  ;;  %v1674_v44 = vpack.c.bf16 %v1615_v34, %v1612_v15  ;;  %v1419_v34 = vld [vmem:[%s3705_s30 + $0x30] sm:$0xff] }
 0x3c5   : > { %v3654_v53 = vpop.trf.xlu1 }
 0x3c6   : > { %v3656_v36 = vpop.trf.xlu0 }
 0x3c9   : > { %v3662_v30 = vpop.trf.xlu1 }
 0x3ca   : > { %1473 = vmatpush1.bf16.xpose.msra.mxu0 %v1406_v8  ;;  %v3664_v17 = vpop.trf.xlu0  ;;  %v1623_v8 = vadd.f32 %v2818_v2, %v2581_v52 }
 0x3cb   : > { %1474 = vmatprep.subr.bf16.mxu0 %v1405_v56  ;;  %v1630_v56 = vpop.f32.mrf.mxu1 }
 0x3cc   : > { %v1675_v28 = vpack.c.bf16 %v1623_v8, %v1620_v21  ;;  %v1631_v18 = vadd.f32 %v2818_v2, %v1630_v56  ;;  %v1421_v8 = vld [vmem:[%s3705_s30 + $0x50] sm:$0xff] }
 0x3cd   : > { %v3670_v10 = vpop.trf.xlu1  ;;  %v2588_v24 = vpop.f32.mrf.mxu1 }
 0x3ce   : > { %v3672_v1 = vpop.trf.xlu0  ;;  %v1676_v47 = vpack.c.bf16 %v1631_v18, %v1628_v11  ;;  %v1652_v63 = vadd.f32 %v2818_v2, %v2588_v24  ;;  %v1422_v18 = vld [vmem:[%s3705_s30 + $0x60] sm:$0xff] }
 0x3cf   : > { %v1643_v14 = vpop.f32.mrf.mxu1 }
 0x3d0   : > { %v1644_v60 = vadd.f32 %v2818_v2, %v1643_v14 }
 0x3d1   : > { %v3678_v42 = vpop.trf.xlu1 }
 0x3d2   : > { %1475 = vmatpush1.bf16.xpose.msra.mxu0 %v1404_v20  ;;  %v3680_v22 = vpop.trf.xlu0  ;;  %v2589_v20 = vpop.f32.mrf.mxu1 }
 0x3d3   : > { %1476 = vmatprep.subr.bf16.mxu0 %v1403_v13  ;;  %v1636_v13 = vadd.f32 %v2818_v2, %v2584_v3 }
 0x3d4   : > { %v1646_v0 = vpop.f32.mrf.mxu1 }
 0x3d5   : > { %v3686_v62 = vpop.trf.xlu1  ;;  %v1677_v32 = vpack.c.bf16 %v1639_v50, %v1636_v13  ;;  %v1647_v4 = vadd.f32 %v2818_v2, %v1646_v0 }
 0x3d6   : > { %v3688_v6 = vpop.trf.xlu0  ;;  %v2592_v16 = vpop.f32.mrf.mxu1 }
 0x3d9   : > { %v3697_v23 = vpop.trf.xlu1 }
 0x3da   : > { %1477 = vmatpush1.bf16.xpose.msra.mxu0 %v1402_v54  ;;  %4158 = vst [vmem:[#allocation29_spill] sm:$0xff] %v3697_v23  ;;  %v1678_v54 = vpack.c.bf16 %v1647_v4, %v1644_v60 }
 0x3db   : > { %1478 = vmatprep.subr.bf16.mxu0 %v1401_v31  ;;  %v1659_v31 = vpop.f32.mrf.mxu1 }
 0x3dd   : > { %v2593_v46 = vpop.f32.mrf.mxu1 }
 0x3e2   : > { %1479 = vmatpush1.bf16.xpose.msra.mxu0 %v1400_v9  ;;  %v1655_v9 = vadd.f32 %v2818_v2, %v2589_v20  ;;  %v1423_v20 = vld [vmem:[%s3705_s30 + $0x70] sm:$0xff] }
 0x3e3   : > { %2402 = vmatprep.subr.bf16.mxu0 %v4143_v7  ;;  %v1662_v7 = vpop.f32.mrf.mxu1 }
 0x3e9   : > { %1497 = vmatmul.mubr.bf16.vlgmr.msra.gmra.mxu0 %v3638_v5 }
 0x3ea   : > { %2403 = vmatpush3.bf16.xpose.msra.mxu0 %v4144_v58  ;;  %1504 = vmatprep.mubr.bf16.mxu0 %v3640_v25  ;;  %v1679_v58 = vpack.c.bf16 %v1655_v9, %v1652_v63  ;;  %v1426_v9 = vld [vmem:[%s3705_s30 + $0xa0] sm:$0xff] }
 0x3eb   : > { %2404 = vmatprep.subr.bf16.mxu0 %v4145_v37  ;;  %v1660_v37 = vadd.f32 %v2818_v2, %v1659_v31 }
 0x3f1   : > { %1505 = vmatmul.mubr.bf16.gmra.mxu0 %v3646_v45 }
 0x3f2   : > { %2405 = vmatpush3.bf16.xpose.msra.mxu0 %v4146_v59  ;;  %1512 = vmatprep.mubr.bf16.mxu0 %v3648_v48  ;;  %v1663_v59 = vadd.f32 %v2818_v2, %v1662_v7 }
 0x3f3   : > { %2406 = vmatprep.subr.bf16.mxu0 %v4147_v12 }
 0x3f4   : > { %v1680_v12 = vpack.c.bf16 %v1663_v59, %v1660_v37  ;;  %v1427_v59 = vld [vmem:[%s3705_s30 + $0xb0] sm:$0xff] }
 0x3f9   : > { %1513 = vmatmul.mubr.bf16.gmra.mxu0 %v3654_v53 }
 0x3fa   : > { %2407 = vmatpush3.bf16.xpose.msra.mxu0 %v4148_v61  ;;  %1520 = vmatprep.mubr.bf16.mxu0 %v3656_v36  ;;  %v1668_v61 = vadd.f32 %v2818_v2, %v2592_v16 }
 0x3fb   : > { %2408 = vmatprep.subr.bf16.mxu0 %v4149_v35  ;;  %v1671_v35 = vadd.f32 %v2818_v2, %v2593_v46 }
 0x401   : > { %1521 = vmatmul.mubr.bf16.gmra.mxu0 %v3662_v30 }
 0x402   : > { %2409 = vmatpush3.bf16.xpose.msra.mxu0 %v4150_v39  ;;  %1528 = vmatprep.mubr.bf16.mxu0 %v3664_v17  ;;  %v1681_v39 = vpack.c.bf16 %v1671_v35, %v1668_v61 }
 0x403   : > { %2410 = vmatprep.subr.bf16.mxu0 %v4151_v27  ;;  %v1416_v27 = vld [vmem:[%s3705_s30] sm:$0xff] }
 0x409   : > { %1529 = vmatmul.mubr.bf16.gmra.mxu0 %v3670_v10 }
 0x40a   : > { %2411 = vmatpush3.bf16.xpose.msra.mxu0 %v4152_v41  ;;  %1536 = vmatprep.mubr.bf16.mxu0 %v3672_v1 }
 0x40b   : > { %2412 = vmatprep.subr.bf16.mxu0 %v4153_v49 }
 0x411   : > { %1537 = vmatmul.mubr.bf16.gmra.mxu0 %v3678_v42 }
 0x412   : > { %2413 = vmatpush3.bf16.xpose.msra.mxu0 %v4154_v38  ;;  %1544 = vmatprep.mubr.bf16.mxu0 %v3680_v22 }
 0x413   : > { %2414 = vmatprep.subr.bf16.mxu0 %v4155_v51 }
 0x419   : > { %1545 = vmatmul.mubr.bf16.gmra.mxu0 %v3686_v62 }
 0x41a   : > { %2415 = vmatpush3.bf16.xpose.msra.mxu0 %v4156_v57  ;;  %1552 = vmatprep.mubr.bf16.mxu0 %v3688_v6 }
 0x41b   : > { %2416 = vmatprep.subr.bf16.mxu0 %v4157_v19 }
 0x421   : > { %1553 = vmatmul.mubr.bf16.gmra.mxu0 %v3697_v23 }
 0x422   : > { %2417 = vmatpush3.bf16.xpose.msra.mxu0 %v4159_v43  ;;  %2418 = vmatprep.mubr.bf16.mxu0 %v1674_v44 }
 0x429   : > { %2419 = vmatmul.mubr.bf16.vlgmr.msra.gmra.mxu0 %v1674_v44 }
 0x42a   : > { %2420 = vmatprep.mubr.bf16.mxu0 %v1675_v28 }
 0x431   : > { %2421 = vmatmul.mubr.bf16.gmra.mxu0 %v1675_v28 }
 0x432   : > { %2422 = vmatprep.mubr.bf16.mxu0 %v1676_v47 }
 0x439   : > { %2423 = vmatmul.mubr.bf16.gmra.mxu0 %v1676_v47 }
 0x43a   : > { %2424 = vmatprep.mubr.bf16.mxu0 %v1677_v32 }
 0x441   : > { %2425 = vmatmul.mubr.bf16.gmra.mxu0 %v1677_v32  ;;  %v1424_v32 = vld [vmem:[%s3705_s30 + $0x80] sm:$0xff] }
 0x442   : > { %2426 = vmatprep.mubr.bf16.mxu0 %v1678_v54 }
 0x449   : > { %2427 = vmatmul.mubr.bf16.gmra.mxu0 %v1678_v54  ;;  %v1425_v54 = vld [vmem:[%s3705_s30 + $0x90] sm:$0xff] }
 0x44a   : > { %2428 = vmatprep.mubr.bf16.mxu0 %v1679_v58 }
 0x451   : > { %2429 = vmatmul.mubr.bf16.gmra.mxu0 %v1679_v58 }
 0x452   : > { %2430 = vmatprep.mubr.bf16.mxu0 %v1680_v12 }
 0x459   : > { %2431 = vmatmul.mubr.bf16.gmra.mxu0 %v1680_v12 }
 0x45a   : > { %2432 = vmatprep.mubr.bf16.mxu0 %v1681_v39 }
 0x461   : > { %2433 = vmatmul.mubr.bf16.gmra.mxu0 %v1681_v39  ;;  %v1428_v39 = vld [vmem:[%s3705_s30 + $0xc0] sm:$0xff] }
 0x4a9   : > { %v1498_v41 = vpop.f32.mrf.mxu0 }
 0x4aa   : > { %v1499_v49 = vadd.f32 %v1498_v41, %v1416_v27 }
 0x4ab   : > { %v1500_v55 = vpop.f32.mrf.mxu0 }
 0x4ac   : > { %1561 = vst [vmem:[%s3712_s11] sm:$0xff] %v1499_v49  ;;  %v1429_v55 = vld [vmem:[%s3705_s30 + $0xd0] sm:$0xff] }
 0x4ad   : > { %v1501_v38 = vpop.f32.mrf.mxu0 }
 0x4ae   : > { %v1502_v51 = vadd.f32 %v1501_v38, %v1417_v33 }
 0x4af   : > { %v1503_v52 = vpop.f32.mrf.mxu0 }
 0x4b0   : > { %1562 = vst [vmem:[%s3712_s11 + $0x10] sm:$0xff] %v1502_v51  ;;  %v1430_v52 = vld [vmem:[%s3705_s30 + $0xe0] sm:$0xff] }
 0x4b1   : > { %v1506_v2 = vpop.f32.mrf.mxu0 }
 0x4b2   : > { %v1507_v15 = vadd.f32 %v1506_v2, %v1418_v26 }
 0x4b3   : > { %v1508_v57 = vpop.f32.mrf.mxu0 }
 0x4b4   : > { %1563 = vst [vmem:[%s3712_s11 + $0x20] sm:$0xff] %v1507_v15  ;;  %v1431_v57 = vld [vmem:[%s3705_s30 + $0xf0] sm:$0xff] }
 0x4b5   : > { %v1509_v19 = vpop.f32.mrf.mxu0 }
 0x4b6   : > { %v1510_v3 = vadd.f32 %v1509_v19, %v1419_v34 }
 0x4b7   : > { %v1511_v44 = vpop.f32.mrf.mxu0 }
 0x4b8   : > { %1564 = vst [vmem:[%s3712_s11 + $0x30] sm:$0xff] %v1510_v3 }
 0x4b9   : > { %v1514_v43 = vpop.f32.mrf.mxu0 }
 0x4ba   : > { %v1515_v40 = vadd.f32 %v1514_v43, %v1420_v29 }
 0x4bb   : > { %v1516_v21 = vpop.f32.mrf.mxu0 }
 0x4bc   : > { %1565 = vst [vmem:[%s3712_s11 + $0x40] sm:$0xff] %v1515_v40 }
 0x4bd   : > { %v1517_v56 = vpop.f32.mrf.mxu0 }
 0x4be   : > { %v1518_v28 = vadd.f32 %v1517_v56, %v1421_v8 }
 0x4bf   : > { %v1519_v11 = vpop.f32.mrf.mxu0 }
 0x4c0   : > { %1566 = vst [vmem:[%s3712_s11 + $0x50] sm:$0xff] %v1518_v28 }
 0x4c1   : > { %v1522_v24 = vpop.f32.mrf.mxu0 }
 0x4c2   : > { %v1523_v47 = vadd.f32 %v1522_v24, %v1422_v18 }
 0x4c3   : > { %v1524_v14 = vpop.f32.mrf.mxu0 }
 0x4c4   : > { %1567 = vst [vmem:[%s3712_s11 + $0x60] sm:$0xff] %v1523_v47 }
 0x4c5   : > { %v1525_v13 = vpop.f32.mrf.mxu0 }
 0x4c6   : > { %v1526_v50 = vadd.f32 %v1525_v13, %v1423_v20 }
 0x4c7   : > { %v1527_v0 = vpop.f32.mrf.mxu0 }
 0x4c8   : > { %1568 = vst [vmem:[%s3712_s11 + $0x70] sm:$0xff] %v1526_v50 }
 0x4c9   : > { %v1530_v60 = vpop.f32.mrf.mxu0 }
 0x4ca   : > { %v1531_v4 = vadd.f32 %v1530_v60, %v1424_v32 }
 0x4cb   : > { %v1532_v16 = vpop.f32.mrf.mxu0 }
 0x4cc   : > { %1569 = vst [vmem:[%s3712_s11 + $0x80] sm:$0xff] %v1531_v4 }
 0x4cd   : > { %v1533_v31 = vpop.f32.mrf.mxu0 }
 0x4ce   : > { %v1534_v46 = vadd.f32 %v1533_v31, %v1425_v54 }
 0x4cf   : > { %v1535_v63 = vpop.f32.mrf.mxu0 }
 0x4d0   : > { %1570 = vst [vmem:[%s3712_s11 + $0x90] sm:$0xff] %v1534_v46 }
 0x4d1   : > { %v1538_v7 = vpop.f32.mrf.mxu0 }
 0x4d2   : > { %v1539_v58 = vadd.f32 %v1538_v7, %v1426_v9 }
 0x4d3   : > { %v1540_v37 = vpop.f32.mrf.mxu0 }
 0x4d4   : > { %1571 = vst [vmem:[%s3712_s11 + $0xa0] sm:$0xff] %v1539_v58 }
 0x4d5   : > { %v1541_v12 = vpop.f32.mrf.mxu0 }
 0x4d6   : > { %v1542_v61 = vadd.f32 %v1541_v12, %v1427_v59 }
 0x4d7   : > { %v1543_v35 = vpop.f32.mrf.mxu0 }
 0x4d8   : > { %1572 = vst [vmem:[%s3712_s11 + $0xb0] sm:$0xff] %v1542_v61 }
 0x4d9   : > { %v1546_v27 = vpop.f32.mrf.mxu0 }
 0x4da   : > { %v1547_v41 = vadd.f32 %v1546_v27, %v1428_v39 }
 0x4db   : > { %v1548_v49 = vpop.f32.mrf.mxu0 }
 0x4dc   : > { %1573 = vst [vmem:[%s3712_s11 + $0xc0] sm:$0xff] %v1547_v41 }
 0x4dd   : > { %v1549_v33 = vpop.f32.mrf.mxu0 }
 0x4de   : > { %v1550_v38 = vadd.f32 %v1549_v33, %v1429_v55 }
 0x4df   : > { %v1551_v51 = vpop.f32.mrf.mxu0 }
 0x4e0   : > { %1574 = vst [vmem:[%s3712_s11 + $0xd0] sm:$0xff] %v1550_v38 }
 0x4e1   : > { %v1554_v26 = vpop.f32.mrf.mxu0 }
 0x4e2   : > { %v1555_v2 = vadd.f32 %v1554_v26, %v1430_v52 }
 0x4e3   : > { %v1556_v15 = vpop.f32.mrf.mxu0 }
 0x4e4   : > { %1575 = vst [vmem:[%s3712_s11 + $0xe0] sm:$0xff] %v1555_v2 }
 0x4e5   : > { %v1557_v34 = vpop.f32.mrf.mxu0 }
 0x4e6   : > { %v1558_v19 = vadd.f32 %v1557_v34, %v1431_v57 }
 0x4e7   : > { %v1559_v3 = vpop.f32.mrf.mxu0 }
 0x4e8   : > { %1576 = vst [vmem:[%s3712_s11 + $0xf0] sm:$0xff] %v1558_v19 }
 0x4e9   : > { %v3745_v44 = vpop.f32.mrf.mxu0 }
 0x4eb   : > { %v3747_v29 = vpop.f32.mrf.mxu0 }
 0x4ec   : > { %v1795_v57 = vmax.f32 %v3745_v44, %v3747_v29 }
 0x4ed   : > { %v3749_v43 = vpop.f32.mrf.mxu0 }
 0x4ef   : > { %v3751_v40 = vpop.f32.mrf.mxu0 }
 0x4f0   : > { %v1798_v19 = vmax.f32 %v3749_v43, %v3751_v40 }
 0x4f1   : > { %v3753_v21 = vpop.f32.mrf.mxu0 }
 0x4f3   : > { %v3755_v8 = vpop.f32.mrf.mxu0 }
 0x4f4   : > { %v1801_v2 = vmax.f32 %v3753_v21, %v3755_v8 }
 0x4f5   : > { %v3757_v56 = vpop.f32.mrf.mxu0 }
 0x4f7   : > { %v3759_v28 = vpop.f32.mrf.mxu0 }
 0x4f8   : > { %v1804_v34 = vmax.f32 %v3757_v56, %v3759_v28 }
 0x4f9   : > { %v3761_v11 = vpop.f32.mrf.mxu0 }
 0x4fb   : > { %v3763_v18 = vpop.f32.mrf.mxu0 }
 0x4fc   : > { %v1807_v52 = vmax.f32 %v3761_v11, %v3763_v18 }
 0x4fd   : > { %v3765_v24 = vpop.f32.mrf.mxu0 }
 0x4ff   : > { %v3767_v47 = vpop.f32.mrf.mxu0 }
 0x500   : > { %v1810_v15 = vmax.f32 %v3765_v24, %v3767_v47 }
 0x501   : > { %v3769_v14 = vpop.f32.mrf.mxu0 }
 0x503   : > { %v3771_v20 = vpop.f32.mrf.mxu0 }
 0x504   : > { %v1813_v38 = vmax.f32 %v3769_v14, %v3771_v20 }
 0x505   : > { %v3773_v13 = vpop.f32.mrf.mxu0 }
 0x507   : > { %v3775_v50 = vpop.f32.mrf.mxu0 }
 0x508   : > { %v1816_v26 = vmax.f32 %v3773_v13, %v3775_v50 }
 0x509   : > { %v3777_v0 = vpop.f32.mrf.mxu0 }
 0x50b   : > { %v3779_v32 = vpop.f32.mrf.mxu0 }
 0x50c   : > { %v1819_v55 = vmax.f32 %v3777_v0, %v3779_v32 }
 0x50d   : > { %v3781_v60 = vpop.f32.mrf.mxu0 }
 0x50f   : > { %v3783_v4 = vpop.f32.mrf.mxu0 }
 0x510   : > { %v1822_v51 = vmax.f32 %v3781_v60, %v3783_v4 }
 0x511   : > { %v3785_v16 = vpop.f32.mrf.mxu0 }
 0x513   : > { %v3787_v54 = vpop.f32.mrf.mxu0 }
 0x514   : > { %v1825_v41 = vmax.f32 %v3785_v16, %v3787_v54 }
 0x515   : > { %v3789_v31 = vpop.f32.mrf.mxu0 }
 0x517   : > { %v3791_v46 = vpop.f32.mrf.mxu0 }
 0x518   : > { %v1828_v33 = vmax.f32 %v3789_v31, %v3791_v46 }
 0x519   : > { %v1776_v63 = vpop.f32.mrf.mxu0 }
 0x51b   : > { %v1778_v9 = vpop.f32.mrf.mxu0 }
 0x51c   : > { %v1831_v27 = vmax.f32 %v1776_v63, %v1778_v9 }
 0x51d   : > { %v3793_v7 = vpop.f32.mrf.mxu0 }
 0x51f   : > { %v3795_v58 = vpop.f32.mrf.mxu0 }
 0x520   : > { %v1834_v49 = vmax.f32 %v3793_v7, %v3795_v58 }
 0x521   : > { %v1786_v37 = vpop.f32.mrf.mxu0 }
 0x523   : > { %v1788_v59 = vpop.f32.mrf.mxu0 }
 0x524   : > { %v1837_v12 = vmax.f32 %v1786_v37, %v1788_v59 }
 0x525   : > { %v1790_v61 = vpop.f32.mrf.mxu0 }
 0x526   : > { %1838 = vmax.xlane.f32.xlu0 %v1837_v12 }
 0x527   : > { %v1792_v35 = vpop.f32.mrf.mxu0 }
 0x528   : > { %v1840_v39 = vmax.f32 %v1790_v61, %v1792_v35 }
 0x52a   : > { %1832 = vmax.xlane.f32.xlu0 %v1831_v27  ;;  %1841 = vmax.xlane.f32.xlu1 %v1840_v39 }
 0x52e   : > { %1826 = vmax.xlane.f32.xlu0 %v1825_v41  ;;  %1835 = vmax.xlane.f32.xlu1 %v1834_v49 }
 0x532   : > { %1820 = vmax.xlane.f32.xlu0 %v1819_v55  ;;  %1829 = vmax.xlane.f32.xlu1 %v1828_v33 }
 0x536   : > { %1814 = vmax.xlane.f32.xlu0 %v1813_v38  ;;  %1823 = vmax.xlane.f32.xlu1 %v1822_v51 }
 0x53a   : > { %1808 = vmax.xlane.f32.xlu0 %v1807_v52  ;;  %1817 = vmax.xlane.f32.xlu1 %v1816_v26 }
 0x53e   : > { %1802 = vmax.xlane.f32.xlu0 %v1801_v2  ;;  %1811 = vmax.xlane.f32.xlu1 %v1810_v15 }
 0x542   : > { %1796 = vmax.xlane.f32.xlu0 %v1795_v57  ;;  %1805 = vmax.xlane.f32.xlu1 %v1804_v34 }
 0x546   : > { %1799 = vmax.xlane.f32.xlu1 %v1798_v19 }
 0x5af   : > { %v1839_v3 = vpop.xlane.xlu0 %1838 }
 0x5b0   : > { %v1871_v12 = vsub.f32 %v1786_v37, %v1839_v3  ;;  %v1872_v39 = vsub.f32 %v1788_v59, %v1839_v3 }
 0x5b2   : > { %v1931_v27 = vmul.f32 1.442695, %v1871_v12  ;;  %v1933_v41 = vmul.f32 1.442695, %v1872_v39 }
 0x5b3   : > { %v1833_v49 = vpop.xlane.xlu0 %1832  ;;  %v1842_v55 = vpop.xlane.xlu1 %1841 }
 0x5b4   : > { %2722 = vpow2.f32 %v1931_v27  ;;  %v1867_v33 = vsub.f32 %v1776_v63, %v1833_v49  ;;  %v1868_v38 = vsub.f32 %v1778_v9, %v1833_v49  ;;  %v1873_v51 = vsub.f32 %v1790_v61, %v1842_v55 }
 0x5b5   : > { %2724 = vpow2.f32 %v1933_v41  ;;  %v1874_v52 = vsub.f32 %v1792_v35, %v1842_v55 }
 0x5b6   : > { %v1923_v26 = vmul.f32 1.442695, %v1867_v33  ;;  %v1925_v2 = vmul.f32 1.442695, %v1868_v38  ;;  %v1935_v15 = vmul.f32 1.442695, %v1873_v51 }
 0x5b7   : > { %v1937_v57 = vmul.f32 1.442695, %v1874_v52  ;;  %v1827_v34 = vpop.xlane.xlu0 %1826  ;;  %v1836_v23 = vpop.xlane.xlu1 %1835 }
 0x5b8   : > { %2726 = vpow2.f32 %v1923_v26  ;;  %v1863_v37 = vsub.f32 %v3785_v16, %v1827_v34  ;;  %v1864_v59 = vsub.f32 %v3787_v54, %v1827_v34  ;;  %v1869_v19 = vsub.f32 %v3793_v7, %v1836_v23 }
 0x5b9   : > { %2728 = vpow2.f32 %v1925_v2  ;;  %v1870_v63 = vsub.f32 %v3795_v58, %v1836_v23 }
 0x5ba   : > { %2730 = vpow2.f32 %v1935_v15  ;;  %v1915_v9 = vmul.f32 1.442695, %v1863_v37  ;;  %v1917_v61 = vmul.f32 1.442695, %v1864_v59  ;;  %v1927_v35 = vmul.f32 1.442695, %v1869_v19 }
 0x5bb   : > { %2732 = vpow2.f32 %v1937_v57  ;;  %v1929_v3 = vmul.f32 1.442695, %v1870_v63  ;;  %v1821_v12 = vpop.xlane.xlu0 %1820  ;;  %v1830_v39 = vpop.xlane.xlu1 %1829 }
 0x5bc   : > { %2734 = vpow2.f32 %v1915_v9  ;;  %v1859_v27 = vsub.f32 %v3777_v0, %v1821_v12  ;;  %v1860_v16 = vsub.f32 %v3779_v32, %v1821_v12  ;;  %v1865_v54 = vsub.f32 %v3789_v31, %v1830_v39 }
 0x5bd   : > { %2736 = vpow2.f32 %v1917_v61  ;;  %v1866_v7 = vsub.f32 %v3791_v46, %v1830_v39 }
 0x5be   : > { %2738 = vpow2.f32 %v1927_v35  ;;  %v1907_v23 = vmul.f32 1.442695, %v1859_v27  ;;  %v1909_v58 = vmul.f32 1.442695, %v1860_v16  ;;  %v1919_v41 = vmul.f32 1.442695, %v1865_v54 }
 0x5bf   : > { %2740 = vpow2.f32 %v1929_v3  ;;  %v1921_v49 = vmul.f32 1.442695, %v1866_v7  ;;  %v1815_v55 = vpop.xlane.xlu0 %1814  ;;  %v1824_v33 = vpop.xlane.xlu1 %1823 }
 0x5c0   : > { %2742 = vpow2.f32 %v1907_v23  ;;  %v1855_v38 = vsub.f32 %v3769_v14, %v1815_v55  ;;  %v1856_v0 = vsub.f32 %v3771_v20, %v1815_v55  ;;  %v1861_v32 = vsub.f32 %v3781_v60, %v1824_v33 }
 0x5c1   : > { %v3834_v51 = vpop.eup %2722  ;;  %2744 = vpow2.f32 %v1909_v58  ;;  %v1862_v31 = vsub.f32 %v3783_v4, %v1824_v33 }
 0x5c2   : > { %v3837_v46 = vpop.eup %2724  ;;  %2746 = vpow2.f32 %v1919_v41  ;;  %v1899_v52 = vmul.f32 1.442695, %v1855_v38  ;;  %v1901_v26 = vmul.f32 1.442695, %v1856_v0  ;;  %v1911_v2 = vmul.f32 1.442695, %v1861_v32 }
 0x5c3   : > { %2748 = vpow2.f32 %v1921_v49  ;;  %v1913_v15 = vmul.f32 1.442695, %v1862_v31  ;;  %v1809_v57 = vpop.xlane.xlu0 %1808  ;;  %v1818_v34 = vpop.xlane.xlu1 %1817  ;;  %v1981_v14 = vadd.f32 %v3837_v46, %v3834_v51 }
 0x5c4   : > { %2750 = vpow2.f32 %v1899_v52  ;;  %v1851_v20 = vsub.f32 %v3761_v11, %v1809_v57  ;;  %v1852_v60 = vsub.f32 %v3763_v18, %v1809_v57  ;;  %v1857_v4 = vsub.f32 %v3773_v13, %v1818_v34 }
 0x5c5   : > { %v3844_v37 = vpop.eup %2726  ;;  %2752 = vpow2.f32 %v1901_v26  ;;  %v1858_v59 = vsub.f32 %v3775_v50, %v1818_v34  ;;  %1982 = vadd.xlane.f32.xlu0 %v1981_v14 }
 0x5c6   : > { %v3847_v19 = vpop.eup %2728  ;;  %2754 = vpow2.f32 %v1911_v2  ;;  %v1891_v63 = vmul.f32 1.442695, %v1851_v20  ;;  %v1893_v9 = vmul.f32 1.442695, %v1852_v60  ;;  %v1903_v61 = vmul.f32 1.442695, %v1857_v4 }
 0x5c7   : > { %v3849_v35 = vpop.eup %2730  ;;  %2756 = vpow2.f32 %v1913_v15  ;;  %v1905_v11 = vmul.f32 1.442695, %v1858_v59  ;;  %v1803_v3 = vpop.xlane.xlu0 %1802  ;;  %v1975_v13 = vadd.f32 %v3847_v19, %v3844_v37 }
 0x5c8   : > { %v1812_v18 = vpop.xlane.xlu1 %1811  ;;  %v3853_v12 = vpop.eup %2732  ;;  %2758 = vpow2.f32 %v1891_v63  ;;  %v1847_v50 = vsub.f32 %v3753_v21, %v1803_v3  ;;  %v1848_v39 = vsub.f32 %v3755_v8, %v1803_v3 }
 0x5c9   : > { %v1853_v27 = vsub.f32 %v3765_v24, %v1812_v18  ;;  %v3858_v16 = vpop.eup %2734  ;;  %2760 = vpow2.f32 %v1893_v9  ;;  %v1854_v54 = vsub.f32 %v3767_v47, %v1812_v18  ;;  %1976 = vadd.xlane.f32.xlu0 %v1975_v13  ;;  %v1984_v7 = vadd.f32 %v3853_v12, %v3849_v35 }
 0x5ca   : > { %v3863_v23 = vpop.eup %2736  ;;  %2762 = vpow2.f32 %v1903_v61  ;;  %v1883_v58 = vmul.f32 1.442695, %v1847_v50  ;;  %v1885_v41 = vmul.f32 1.442695, %v1848_v39 }
 0x5cb   : > { %v1895_v49 = vmul.f32 1.442695, %v1853_v27  ;;  %v3865_v21 = vpop.eup %2738  ;;  %2764 = vpow2.f32 %v1905_v11  ;;  %v1897_v8 = vmul.f32 1.442695, %v1854_v54  ;;  %1985 = vadd.xlane.f32.xlu1 %v1984_v7  ;;  %v1797_v24 = vpop.xlane.xlu0 %1796  ;;  %v1969_v47 = vadd.f32 %v3863_v23, %v3858_v16 }
 0x5cc   : > { %v1806_v55 = vpop.xlane.xlu1 %1805  ;;  %v3869_v33 = vpop.eup %2740  ;;  %2766 = vpow2.f32 %v1883_v58  ;;  %v1843_v38 = vsub.f32 %v3745_v44, %v1797_v24  ;;  %v1844_v0 = vsub.f32 %v3747_v29, %v1797_v24 }
 0x5cd   : > { %v1849_v32 = vsub.f32 %v3757_v56, %v1806_v55  ;;  %v3874_v31 = vpop.eup %2742  ;;  %2768 = vpow2.f32 %v1885_v41  ;;  %v1850_v52 = vsub.f32 %v3759_v28, %v1806_v55  ;;  %1970 = vadd.xlane.f32.xlu0 %v1969_v47  ;;  %v1978_v26 = vadd.f32 %v3869_v33, %v3865_v21 }
 0x5ce   : > { %v3879_v2 = vpop.eup %2744  ;;  %2770 = vpow2.f32 %v1895_v49  ;;  %v1875_v15 = vmul.f32 1.442695, %v1843_v38  ;;  %v1877_v57 = vmul.f32 1.442695, %v1844_v0 }
 0x5cf   : > { %v1887_v34 = vmul.f32 1.442695, %v1849_v32  ;;  %v3881_v44 = vpop.eup %2746  ;;  %2772 = vpow2.f32 %v1897_v8  ;;  %v1889_v29 = vmul.f32 1.442695, %v1850_v52  ;;  %1979 = vadd.xlane.f32.xlu1 %v1978_v26  ;;  %v1963_v14 = vadd.f32 %v3879_v2, %v3874_v31 }
 0x5d0   : > { %v1800_v56 = vpop.xlane.xlu1 %1799  ;;  %v3885_v28 = vpop.eup %2748  ;;  %2774 = vpow2.f32 %v1875_v15 }
 0x5d1   : > { %v1845_v20 = vsub.f32 %v3749_v43, %v1800_v56  ;;  %v1846_v60 = vsub.f32 %v3751_v40, %v1800_v56  ;;  %v3889_v4 = vpop.eup %2750  ;;  %2776 = vpow2.f32 %v1877_v57  ;;  %1964 = vadd.xlane.f32.xlu0 %v1963_v14  ;;  %v1972_v59 = vadd.f32 %v3885_v28, %v3881_v44 }
 0x5d2   : > { %v3893_v63 = vpop.eup %2752  ;;  %2778 = vpow2.f32 %v1887_v34 }
 0x5d3   : > { %v1879_v9 = vmul.f32 1.442695, %v1845_v20  ;;  %v1881_v61 = vmul.f32 1.442695, %v1846_v60  ;;  %v3895_v11 = vpop.eup %2754  ;;  %2780 = vpow2.f32 %v1889_v29  ;;  %1973 = vadd.xlane.f32.xlu1 %v1972_v59  ;;  %v1957_v43 = vadd.f32 %v3893_v63, %v3889_v4 }
 0x5d4   : > { %v3899_v40 = vpop.eup %2756 }
 0x5d5   : > { %2782 = vpow2.f32 %v1879_v9  ;;  %v3901_v3 = vpop.eup %2758  ;;  %1958 = vadd.xlane.f32.xlu0 %v1957_v43  ;;  %v1966_v18 = vadd.f32 %v3899_v40, %v3895_v11 }
 0x5d6   : > { %2784 = vpow2.f32 %v1881_v61  ;;  %v3905_v13 = vpop.eup %2760 }
 0x5d7   : > { %v3907_v50 = vpop.eup %2762  ;;  %1967 = vadd.xlane.f32.xlu1 %v1966_v18  ;;  %v1951_v39 = vadd.f32 %v3905_v13, %v3901_v3 }
 0x5d8   : > { %v3911_v27 = vpop.eup %2764 }
 0x5d9   : > { %v3913_v54 = vpop.eup %2766  ;;  %1952 = vadd.xlane.f32.xlu0 %v1951_v39  ;;  %v1960_v7 = vadd.f32 %v3911_v27, %v3907_v50 }
 0x5da   : > { %v3917_v58 = vpop.eup %2768 }
 0x5db   : > { %v3919_v41 = vpop.eup %2770  ;;  %1961 = vadd.xlane.f32.xlu1 %v1960_v7  ;;  %v1945_v49 = vadd.f32 %v3917_v58, %v3913_v54 }
 0x5dc   : > { %v3923_v8 = vpop.eup %2772 }
 0x5dd   : > { %v3925_v24 = vpop.eup %2774  ;;  %1946 = vadd.xlane.f32.xlu0 %v1945_v49  ;;  %v1954_v55 = vadd.f32 %v3923_v8, %v3919_v41 }
 0x5de   : > { %v3929_v47 = vpop.eup %2776 }
 0x5df   : > { %v3931_v38 = vpop.eup %2778  ;;  %1955 = vadd.xlane.f32.xlu1 %v1954_v55  ;;  %v1939_v0 = vadd.f32 %v3929_v47, %v3925_v24 }
 0x5e0   : > { %v3935_v32 = vpop.eup %2780 }
 0x5e1   : > { %1940 = vadd.xlane.f32.xlu0 %v1939_v0  ;;  %v1948_v26 = vadd.f32 %v3935_v32, %v3931_v38 }
 0x5e2   : > { %v3937_v52 = vpop.eup %2782 }
 0x5e3   : > { %v3941_v15 = vpop.eup %2784  ;;  %1949 = vadd.xlane.f32.xlu1 %v1948_v26 }
 0x5e4   : > { %v1942_v57 = vadd.f32 %v3941_v15, %v3937_v52 }
 0x5e7   : > { %1943 = vadd.xlane.f32.xlu1 %v1942_v57 }
 0x64e   : > { %v1983_v34 = vpop.xlane.xlu0 %1982 }
 0x64f   : > { %2786 = vrcp.f32 %v1983_v34 }
 0x652   : > { %v1977_v29 = vpop.xlane.xlu0 %1976 }
 0x654   : > { %v1986_v56 = vpop.xlane.xlu1 %1985 }
 0x655   : > { %2788 = vrcp.f32 %v1986_v56 }
 0x656   : > { %2790 = vrcp.f32 %v1977_v29  ;;  %v1971_v20 = vpop.xlane.xlu0 %1970 }
 0x658   : > { %v1980_v14 = vpop.xlane.xlu1 %1979 }
 0x659   : > { %2792 = vrcp.f32 %v1980_v14 }
 0x65a   : > { %2794 = vrcp.f32 %v1971_v20  ;;  %v1965_v43 = vpop.xlane.xlu0 %1964 }
 0x65c   : > { %v1974_v60 = vpop.xlane.xlu1 %1973  ;;  %v2787_v59 = vpop.eup %2786 }
 0x65d   : > { %2796 = vrcp.f32 %v1974_v60  ;;  %v2032_v18 = vmul.f32 %v2787_v59, %v3837_v46  ;;  %v2031_v7 = vmul.f32 %v2787_v59, %v3834_v51 }
 0x660   : > { %v1968_v9 = vpop.xlane.xlu1 %1967 }
 0x661   : > { %2798 = vrcp.f32 %v1968_v9 }
 0x662   : > { %v2789_v61 = vpop.eup %2788  ;;  %2800 = vrcp.f32 %v1965_v43 }
 0x663   : > { %v2034_v39 = vmul.f32 %v2789_v61, %v3853_v12  ;;  %v2033_v49 = vmul.f32 %v2789_v61, %v3849_v35  ;;  %v2791_v55 = vpop.eup %2790  ;;  %v1959_v12 = vpop.xlane.xlu0 %1958 }
 0x664   : > { %v2028_v34 = vmul.f32 %v2791_v55, %v3847_v19  ;;  %v1962_v56 = vpop.xlane.xlu1 %1961  ;;  %v2027_v60 = vmul.f32 %v2791_v55, %v3844_v37 }
 0x665   : > { %v2050_v0 = vpack.c.bf16 %v2034_v39, %v2032_v18  ;;  %v2049_v26 = vpack.c.bf16 %v2033_v49, %v2031_v7  ;;  %2802 = vrcp.f32 %v1962_v56 }
 0x666   : > { %v2793_v57 = vpop.eup %2792  ;;  %2804 = vrcp.f32 %v1959_v12 }
 0x667   : > { %2067 = vmatprep.subr.bf16.mxu1 %v2050_v0  ;;  %v2030_v29 = vmul.f32 %v2793_v57, %v3869_v33  ;;  %v2795_v46 = vpop.eup %2794  ;;  %v2029_v51 = vmul.f32 %v2793_v57, %v3865_v21  ;;  %v1953_v18 = vpop.xlane.xlu0 %1952 }
 0x668   : > { %2068 = vmatpush1.bf16.xpose.msra.mxu1 %v2049_v26  ;;  %v2024_v59 = vmul.f32 %v2795_v46, %v3863_v23  ;;  %v1956_v61 = vpop.xlane.xlu1 %1955 }
 0x669   : > { %v2048_v14 = vpack.c.bf16 %v2030_v29, %v2028_v34  ;;  %v2047_v19 = vpack.c.bf16 %v2029_v51, %v2027_v60  ;;  %2806 = vrcp.f32 %v1956_v61 }
 0x66a   : > { %v2797_v20 = vpop.eup %2796  ;;  %2808 = vrcp.f32 %v1953_v18 }
 0x66b   : > { %2069 = vmatprep.subr.bf16.mxu1 %v2048_v14  ;;  %v2026_v35 = vmul.f32 %v2797_v20, %v3885_v28  ;;  %v2025_v39 = vmul.f32 %v2797_v20, %v3881_v44  ;;  %v2023_v28 = vmul.f32 %v2795_v46, %v3858_v16  ;;  %v1947_v26 = vpop.xlane.xlu0 %1946 }
 0x66c   : > { %v1950_v55 = vpop.xlane.xlu1 %1949 }
 0x66d   : > { %v2046_v9 = vpack.c.bf16 %v2026_v35, %v2024_v59  ;;  %v2045_v7 = vpack.c.bf16 %v2025_v39, %v2023_v28  ;;  %2810 = vrcp.f32 %v1950_v55  ;;  %v2056_v28 = vld [vmem:[%s3705_s30 + $0x58] sm:$0xff] }
 0x66e   : > { %v2799_v33 = vpop.eup %2798  ;;  %2812 = vrcp.f32 %v1947_v26 }
 0x66f   : > { %v2801_v43 = vpop.eup %2800  ;;  %v2022_v21 = vmul.f32 %v2799_v33, %v3899_v40  ;;  %v2021_v57 = vmul.f32 %v2799_v33, %v3895_v11  ;;  %v1941_v14 = vpop.xlane.xlu0 %1940 }
 0x670   : > { %2070 = vmatpush1.bf16.xpose.msra.mxu1 %v2047_v19  ;;  %v2020_v37 = vmul.f32 %v2801_v43, %v3879_v2  ;;  %v2019_v40 = vmul.f32 %v2801_v43, %v3874_v31  ;;  %v1944_v56 = vpop.xlane.xlu1 %1943 }
 0x671   : > { %2071 = vmatprep.subr.bf16.mxu1 %v2046_v9  ;;  %2814 = vrcp.f32 %v1944_v56 }
 0x672   : > { %v2044_v23 = vpack.c.bf16 %v2022_v21, %v2020_v37  ;;  %v2803_v49 = vpop.eup %2802  ;;  %v2043_v34 = vpack.c.bf16 %v2021_v57, %v2019_v40  ;;  %2816 = vrcp.f32 %v1941_v14  ;;  %v2058_v57 = vld [vmem:[%s3705_s30 + $0x78] sm:$0xff] }
 0x673   : > { %v2805_v0 = vpop.eup %2804  ;;  %v2018_v44 = vmul.f32 %v2803_v49, %v3911_v27  ;;  %v2017_v20 = vmul.f32 %v2803_v49, %v3907_v50  ;;  %v2057_v49 = vld [vmem:[%s3705_s30 + $0x68] sm:$0xff] }
 0x674   : > { %v2016_v16 = vmul.f32 %v2805_v0, %v3893_v63  ;;  %v2015_v27 = vmul.f32 %v2805_v0, %v3889_v4 }
 0x676   : > { %v2042_v2 = vpack.c.bf16 %v2018_v44, %v2016_v16  ;;  %v2807_v29 = vpop.eup %2806  ;;  %v2041_v12 = vpack.c.bf16 %v2017_v20, %v2015_v27  ;;  %v2061_v27 = vld [vmem:[%s3705_s30 + $0xa8] sm:$0xff] }
 0x677   : > { %v2809_v46 = vpop.eup %2808  ;;  %v2014_v11 = vmul.f32 %v2807_v29, %v3923_v8  ;;  %v2013_v60 = vmul.f32 %v2807_v29, %v3919_v41 }
 0x678   : > { %2072 = vmatpush1.bf16.xpose.msra.mxu1 %v2045_v7  ;;  %v2012_v31 = vmul.f32 %v2809_v46, %v3905_v13  ;;  %v2011_v50 = vmul.f32 %v2809_v46, %v3901_v3  ;;  %v2060_v46 = vld [vmem:[%s3705_s30 + $0x98] sm:$0xff] }
 0x679   : > { %2073 = vmatprep.subr.bf16.mxu1 %v2044_v23 }
 0x67a   : > { %v2040_v63 = vpack.c.bf16 %v2014_v11, %v2012_v31  ;;  %v2811_v51 = vpop.eup %2810  ;;  %v2039_v8 = vpack.c.bf16 %v2013_v60, %v2011_v50  ;;  %v2063_v50 = vld [vmem:[%s3705_s30 + $0xc8] sm:$0xff] }
 0x67b   : > { %v2813_v35 = vpop.eup %2812  ;;  %v2010_v59 = vmul.f32 %v2811_v51, %v3935_v32  ;;  %v2009_v33 = vmul.f32 %v2811_v51, %v3931_v38  ;;  %v2055_v38 = vld [vmem:[%s3705_s30 + $0x48] sm:$0xff]  ;;  %v2062_v51 = vld [vmem:[%s3705_s30 + $0xb8] sm:$0xff] }
 0x67c   : > { %v2008_v19 = vmul.f32 %v2813_v35, %v3917_v58  ;;  %v2007_v43 = vmul.f32 %v2813_v35, %v3913_v54 }
 0x67e   : > { %v2038_v9 = vpack.c.bf16 %v2010_v59, %v2008_v19  ;;  %v2815_v4 = vpop.eup %2814  ;;  %v2037_v18 = vpack.c.bf16 %v2009_v33, %v2007_v43  ;;  %v2065_v43 = vld [vmem:[%s3705_s30 + $0xe8] sm:$0xff] }
 0x67f   : > { %v2817_v13 = vpop.eup %2816  ;;  %v2006_v61 = vmul.f32 %v2815_v4, %v3941_v15  ;;  %v2005_v3 = vmul.f32 %v2815_v4, %v3937_v52  ;;  %v2064_v4 = vld [vmem:[%s3705_s30 + $0xd8] sm:$0xff] }
 0x680   : > { %2074 = vmatpush1.bf16.xpose.msra.mxu1 %v2043_v34  ;;  %v2004_v41 = vmul.f32 %v2817_v13, %v3929_v47  ;;  %v2003_v58 = vmul.f32 %v2817_v13, %v3925_v24  ;;  %v2059_v34 = vld [vmem:[%s3705_s30 + $0x88] sm:$0xff] }
 0x681   : > { %2075 = vmatprep.subr.bf16.mxu1 %v2042_v2 }
 0x682   : > { %v2036_v32 = vpack.c.bf16 %v2006_v61, %v2004_v41  ;;  %v2035_v39 = vpack.c.bf16 %v2005_v3, %v2003_v58  ;;  %v2066_v3 = vld [vmem:[%s3705_s30 + $0xf8] sm:$0xff] }
 0x688   : > { %2076 = vmatpush1.bf16.xpose.msra.mxu1 %v2041_v12 }
 0x689   : > { %2077 = vmatprep.subr.bf16.mxu1 %v2040_v63 }
 0x690   : > { %2078 = vmatpush1.bf16.xpose.msra.mxu1 %v2039_v8 }
 0x691   : > { %2079 = vmatprep.subr.bf16.mxu1 %v2038_v9 }
 0x698   : > { %2080 = vmatpush1.bf16.xpose.msra.mxu1 %v2037_v18 }
 0x699   : > { %2081 = vmatprep.subr.bf16.mxu1 %v2036_v32 }
 0x6a0   : > { %2082 = vmatpush1.bf16.xpose.msra.mxu1 %v2035_v39 }
 0x6a7   : > { %2100 = vmatmul.mubr.bf16.vlgmr.msra.gmra.mxu1 %v3638_v5  ;;  %v4160_v5 = vld [vmem:[#allocation29_spill] sm:$0xff] }
 0x6a8   : > { %2107 = vmatprep.mubr.bf16.mxu1 %v3640_v25  ;;  %v2051_v25 = vld [vmem:[%s3705_s30 + $0x8] sm:$0xff] }
 0x6af   : > { %2108 = vmatmul.mubr.bf16.gmra.mxu1 %v3646_v45 }
 0x6b0   : > { %2115 = vmatprep.mubr.bf16.mxu1 %v3648_v48 }
 0x6b7   : > { %2116 = vmatmul.mubr.bf16.gmra.mxu1 %v3654_v53 }
 0x6b8   : > { %2123 = vmatprep.mubr.bf16.mxu1 %v3656_v36  ;;  %v2052_v36 = vld [vmem:[%s3705_s30 + $0x18] sm:$0xff] }
 0x6bf   : > { %2124 = vmatmul.mubr.bf16.gmra.mxu1 %v3662_v30 }
 0x6c0   : > { %2131 = vmatprep.mubr.bf16.mxu1 %v3664_v17 }
 0x6c7   : > { %2132 = vmatmul.mubr.bf16.gmra.mxu1 %v3670_v10 }
 0x6c8   : > { %2139 = vmatprep.mubr.bf16.mxu1 %v3672_v1  ;;  %v2053_v1 = vld [vmem:[%s3705_s30 + $0x28] sm:$0xff] }
 0x6cf   : > { %2140 = vmatmul.mubr.bf16.gmra.mxu1 %v3678_v42 }
 0x6d0   : > { %2147 = vmatprep.mubr.bf16.mxu1 %v3680_v22 }
 0x6d7   : > { %2148 = vmatmul.mubr.bf16.gmra.mxu1 %v3686_v62 }
 0x6d8   : > { %2155 = vmatprep.mubr.bf16.mxu1 %v3688_v6  ;;  %v2054_v6 = vld [vmem:[%s3705_s30 + $0x38] sm:$0xff] }
 0x6df   : > { %2156 = vmatmul.mubr.bf16.gmra.mxu1 %v4160_v5 }
 0x767   : > { %v2101_v45 = vpop.f32.mrf.mxu1 }
 0x768   : > { %v2102_v48 = vadd.f32 %v2101_v45, %v2051_v25 }
 0x769   : > { %v2103_v53 = vpop.f32.mrf.mxu1 }
 0x76a   : > { %2164 = vst [vmem:[%s3712_s11 + $0x8] sm:$0xff] %v2102_v48 }
 0x76b   : > { %v2104_v30 = vpop.f32.mrf.mxu1 }
 0x76c   : > { %v2105_v17 = vadd.f32 %v2104_v30, %v2052_v36 }
 0x76d   : > { %v2106_v10 = vpop.f32.mrf.mxu1 }
 0x76e   : > { %2165 = vst [vmem:[%s3712_s11 + $0x18] sm:$0xff] %v2105_v17 }
 0x76f   : > { %v2109_v42 = vpop.f32.mrf.mxu1 }
 0x770   : > { %v2110_v22 = vadd.f32 %v2109_v42, %v2053_v1 }
 0x771   : > { %v2111_v62 = vpop.f32.mrf.mxu1 }
 0x772   : > { %2166 = vst [vmem:[%s3712_s11 + $0x28] sm:$0xff] %v2110_v22 }
 0x773   : > { %v2112_v54 = vpop.f32.mrf.mxu1 }
 0x774   : > { %v2113_v24 = vadd.f32 %v2112_v54, %v2054_v6 }
 0x775   : > { %v2114_v47 = vpop.f32.mrf.mxu1 }
 0x776   : > { %2167 = vst [vmem:[%s3712_s11 + $0x38] sm:$0xff] %v2113_v24 }
 0x777   : > { %v2117_v52 = vpop.f32.mrf.mxu1 }
 0x778   : > { %v2118_v15 = vadd.f32 %v2117_v52, %v2055_v38 }
 0x779   : > { %v2119_v21 = vpop.f32.mrf.mxu1 }
 0x77a   : > { %2168 = vst [vmem:[%s3712_s11 + $0x48] sm:$0xff] %v2118_v15 }
 0x77b   : > { %v2120_v37 = vpop.f32.mrf.mxu1 }
 0x77c   : > { %v2121_v7 = vadd.f32 %v2120_v37, %v2056_v28 }
 0x77d   : > { %v2122_v23 = vpop.f32.mrf.mxu1 }
 0x77e   : > { %2169 = vst [vmem:[%s3712_s11 + $0x58] sm:$0xff] %v2121_v7 }
 0x77f   : > { %v2125_v55 = vpop.f32.mrf.mxu1 }
 0x780   : > { %v2126_v0 = vadd.f32 %v2125_v55, %v2057_v49 }
 0x781   : > { %v2127_v26 = vpop.f32.mrf.mxu1 }
 0x782   : > { %2170 = vst [vmem:[%s3712_s11 + $0x68] sm:$0xff] %v2126_v0 }
 0x783   : > { %v2128_v44 = vpop.f32.mrf.mxu1 }
 0x784   : > { %v2129_v40 = vadd.f32 %v2128_v44, %v2058_v57 }
 0x785   : > { %v2130_v16 = vpop.f32.mrf.mxu1 }
 0x786   : > { %2171 = vst [vmem:[%s3712_s11 + $0x78] sm:$0xff] %v2129_v40 }
 0x787   : > { %v2133_v2 = vpop.f32.mrf.mxu1 }
 0x788   : > { %v2134_v29 = vadd.f32 %v2133_v2, %v2059_v34 }
 0x789   : > { %v2135_v56 = vpop.f32.mrf.mxu1 }
 0x78a   : > { %2172 = vst [vmem:[%s3712_s11 + $0x88] sm:$0xff] %v2134_v29 }
 0x78b   : > { %v2136_v14 = vpop.f32.mrf.mxu1 }
 0x78c   : > { %v2137_v20 = vadd.f32 %v2136_v14, %v2060_v46 }
 0x78d   : > { %v2138_v11 = vpop.f32.mrf.mxu1 }
 0x78e   : > { %2173 = vst [vmem:[%s3712_s11 + $0x98] sm:$0xff] %v2137_v20 }
 0x78f   : > { %v2141_v31 = vpop.f32.mrf.mxu1 }
 0x790   : > { %v2142_v12 = vadd.f32 %v2141_v31, %v2061_v27 }
 0x791   : > { %v2143_v63 = vpop.f32.mrf.mxu1 }
 0x792   : > { %2174 = vst [vmem:[%s3712_s11 + $0xa8] sm:$0xff] %v2142_v12 }
 0x793   : > { %v2144_v35 = vpop.f32.mrf.mxu1 }
 0x794   : > { %v2145_v60 = vadd.f32 %v2144_v35, %v2062_v51 }
 0x795   : > { %v2146_v59 = vpop.f32.mrf.mxu1 }
 0x796   : > { %2175 = vst [vmem:[%s3712_s11 + $0xb8] sm:$0xff] %v2145_v60 }
 0x797   : > { %v2149_v19 = vpop.f32.mrf.mxu1 }
 0x798   : > { %v2150_v8 = vadd.f32 %v2149_v19, %v2063_v50 }
 0x799   : > { %v2151_v9 = vpop.f32.mrf.mxu1 }
 0x79a   : > { %2176 = vst [vmem:[%s3712_s11 + $0xc8] sm:$0xff] %v2150_v8 }
 0x79b   : > { %v2152_v13 = vpop.f32.mrf.mxu1 }
 0x79c   : > { %v2153_v33 = vadd.f32 %v2152_v13, %v2064_v4 }
 0x79d   : > { %v2154_v61 = vpop.f32.mrf.mxu1 }
 0x79e   : > { %2177 = vst [vmem:[%s3712_s11 + $0xd8] sm:$0xff] %v2153_v33 }
 0x79f   : > { %v2157_v41 = vpop.f32.mrf.mxu1 }
 0x7a0   : > { %v2158_v18 = vadd.f32 %v2157_v41, %v2065_v43 }
 0x7a1   : > { %v2159_v32 = vpop.f32.mrf.mxu1 }
 0x7a2   : > { %2178 = vst [vmem:[%s3712_s11 + $0xe8] sm:$0xff] %v2158_v18 }
 0x7a3   : > { %v2160_v58 = vpop.f32.mrf.mxu1 }
 0x7a4   : > { %v2161_v39 = vadd.f32 %v2160_v58, %v2066_v3 }
 0x7a5   : > { %v2162_v5 = vpop.f32.mrf.mxu1 }
 0x7a6   : > { %2179 = vst [vmem:[%s3712_s11 + $0xf8] sm:$0xff] %v2161_v39 }
 0x7a7 PF: > { %s18_s27 = sadd.s32 1, %s2825_s27  }
 0x7a8   : > { %p15_p4 = scmp.ge.s32.totalorder %s18_s27, 6  }
 0x7aa   :  { %17 = sbr.rel (!%p15_p4) target bundleno = 1 (0x1), region = 85 }

// kernel: tablock_chain.2
= control target key start
LH: loop header
LB: loop body
LE: loop exit
PB: predicated region body
PF: predicated region fallthrough
CT: control target
= control target key end

     0   :  { %s2872_s27 = smov 0   ;;  %s4027_s0 = inlined_call_operand.vmem [shape: f32[4,256,128], index: 0, kind: input, shape index: {}]   ;;  %s4028_s1 = inlined_call_operand.vmem [shape: f32[4,128,256], index: 1, kind: input, shape index: {}]   ;;  %s4029_s2 = inlined_call_operand.vmem [shape: bf16[128,128], index: 2, kind: input, shape index: {}]   ;;  %s4030_s3 = inlined_call_operand.vmem [shape: f32[1,128], index: 3, kind: input, shape index: {}]   ;;  %s4031_s4 = inlined_call_operand.vmem [shape: bf16[128,128], index: 4, kind: input, shape index: {}]   ;;  %s4032_s5 = inlined_call_operand.vmem [shape: f32[1,128], index: 5, kind: input, shape index: {}]   ;;  %s4033_s6 = inlined_call_operand.vmem [shape: bf16[128,128], index: 6, kind: input, shape index: {}]   ;;  %s4034_s7 = inlined_call_operand.vmem [shape: f32[1,128], index: 7, kind: input, shape index: {}]   ;;  %s4035_s8 = inlined_call_operand.vmem [shape: f32[4,128,256], index: 8, kind: output, shape index: {}]  }
   0x1 LB: > { %s2247_s28 = sadd.s32 4294967295, %s2825_s27   ;;  %p2251_p0 = scmp.ge.s32.totalorder %s2825_s27, 1  ;;  %s2825_s27 = sphi %s2872_s27, %s18_s27  }
   0x2   : > { %p272_p1 = scmp.lt.s32.totalorder %s2825_s27, 5 }
   0x4   : > { %p273_p2 = pnand %p2251_p0, %p272_p1 }
   0x6   : > { %276 = sbr.rel (%p273_p2) target bundleno = 1959 (0x7a7), region = 52 }
   0xb   : > { %v2602_v0 = vld [vmem:[%s4031_s4 + $0x38] sm:$0xff]   ;;  %p311_p3 = scmp.lt.s32.totalorder %s2247_s28, 3  ;;  %v2603_v1 = vld [vmem:[%s4031_s4 + $0x30] sm:$0xff]   ;;  %v2604_v2 = vld [vmem:[%s4031_s4 + $0x28] sm:$0xff]  }
   0xc   : > { %2434 = vmatprep.subr.bf16.mxu0 %v2602_v0  ;;  %v2605_v3 = vld [vmem:[%s4031_s4 + $0x20] sm:$0xff]   ;;  %v2606_v7 = vld [vmem:[%s4031_s4 + $0x18] sm:$0xff]   ;;  %v2607_v8 = vld [vmem:[%s4031_s4 + $0x10] sm:$0xff]  }
   0xd   : > { %s4162_s28 = smov (!%p311_p3, %s2247_s28), 3  ;;  %2435 = vmatpush3.bf16.msra.mxu0 %v2602_v0  ;;  %v2608_v9 = vld [vmem:[%s4031_s4 + $0x8] sm:$0xff]   ;;  %v2609_v10 = vld [vmem:[%s4031_s4] sm:$0xff]   ;;  %v2925_v15 = vld [vmem:[%s4029_s2 + $0x38] sm:$0xff]  }
   0xe   : > { %2436 = vmatprep.subr.bf16.mxu0 %v2603_v1  ;;  %s2889_s13 = sshll.u32 %s4162_s28, 8  ;;  %v2935_v18 = vld [vmem:[%s4029_s2 + $0x30] sm:$0xff]   ;;  %v2948_v23 = vld [vmem:[%s4029_s2 + $0x28] sm:$0xff]   ;;  %v2959_v26 = vld [vmem:[%s4029_s2 + $0x20] sm:$0xff]  }
   0xf   : > { %s2895_s16 = scalar_lea.vmem %s4027_s0, %s2889_s13  ;;  %v2972_v31 = vld [vmem:[%s4029_s2 + $0x18] sm:$0xff]   ;;  %v2983_v34 = vld [vmem:[%s4029_s2 + $0x10] sm:$0xff]   ;;  %v2996_v39 = vld [vmem:[%s4029_s2 + $0x8] sm:$0xff]   ;;  %s3705_s30 = scalar_lea.vmem %s4028_s1, %s2889_s13 }
  0x10   : > { %v378_v4 = vld [vmem:[%s2895_s16] sm:$0xff]  ;;  %v379_v5 = vld [vmem:[%s2895_s16 + $0x8] sm:$0xff]  ;;  %v380_v11 = vld [vmem:[%s2895_s16 + $0x10] sm:$0xff]  ;;  %s3712_s11 = scalar_lea.vmem %s4035_s8, %s2889_s13 }
  0x11   : > { %2437 = vmatpush3.bf16.msra.mxu0 %v2603_v1  ;;  %v2902_v6 = vpack.c.bf16 %v379_v5, %v378_v4  ;;  %v381_v12 = vld [vmem:[%s2895_s16 + $0x18] sm:$0xff]  ;;  %v382_v13 = vld [vmem:[%s2895_s16 + $0x20] sm:$0xff]  ;;  %v383_v14 = vld [vmem:[%s2895_s16 + $0x28] sm:$0xff] }
  0x12   : > { %2438 = vmatprep.subr.bf16.mxu0 %v2604_v2  ;;  %v2927_v16 = vpack.c.bf16 %v381_v12, %v380_v11  ;;  %v2929_v17 = vpack.c.bf16 %v383_v14, %v382_v13  ;;  %v384_v19 = vld [vmem:[%s2895_s16 + $0x30] sm:$0xff]  ;;  %v385_v20 = vld [vmem:[%s2895_s16 + $0x38] sm:$0xff]  ;;  %v386_v21 = vld [vmem:[%s2895_s16 + $0x40] sm:$0xff] }
  0x13   : > { %2450 = vmatprep.mubr.bf16.mxu0 %v2902_v6  ;;  %2498 = vmatprep.mubr.bf16.mxu1 %v2902_v6  ;;  %v387_v22 = vld [vmem:[%s2895_s16 + $0x48] sm:$0xff]  ;;  %v2950_v24 = vpack.c.bf16 %v385_v20, %v384_v19  ;;  %v388_v27 = vld [vmem:[%s2895_s16 + $0x50] sm:$0xff]  ;;  %v389_v28 = vld [vmem:[%s2895_s16 + $0x58] sm:$0xff] }
  0x14   : > { %v2952_v25 = vpack.c.bf16 %v387_v22, %v386_v21  ;;  %v390_v29 = vld [vmem:[%s2895_s16 + $0x60] sm:$0xff]  ;;  %v391_v30 = vld [vmem:[%s2895_s16 + $0x68] sm:$0xff]  ;;  %v2974_v32 = vpack.c.bf16 %v389_v28, %v388_v27  ;;  %v392_v35 = vld [vmem:[%s2895_s16 + $0x70] sm:$0xff] }
  0x15   : > { %2439 = vmatpush3.bf16.msra.mxu0 %v2604_v2  ;;  %v2976_v33 = vpack.c.bf16 %v391_v30, %v390_v29  ;;  %v393_v36 = vld [vmem:[%s2895_s16 + $0x78] sm:$0xff]  ;;  %v394_v37 = vld [vmem:[%s2895_s16 + $0x80] sm:$0xff]  ;;  %v395_v38 = vld [vmem:[%s2895_s16 + $0x88] sm:$0xff] }
  0x16   : > { %2440 = vmatprep.subr.bf16.mxu0 %v2605_v3  ;;  %v2998_v40 = vpack.c.bf16 %v393_v36, %v392_v35  ;;  %v3000_v41 = vpack.c.bf16 %v395_v38, %v394_v37  ;;  %v3007_v42 = vld [vmem:[%s4029_s2] sm:$0xff]   ;;  %v396_v43 = vld [vmem:[%s2895_s16 + $0x90] sm:$0xff]  ;;  %v397_v44 = vld [vmem:[%s2895_s16 + $0x98] sm:$0xff] }
  0x17   : > { %v398_v45 = vld [vmem:[%s2895_s16 + $0xa0] sm:$0xff]  ;;  %v399_v46 = vld [vmem:[%s2895_s16 + $0xa8] sm:$0xff]  ;;  %v3017_v47 = vpack.c.bf16 %v397_v44, %v396_v43  ;;  %v400_v49 = vld [vmem:[%s2895_s16 + $0xb0] sm:$0xff] }
  0x18   : > { %v3019_v48 = vpack.c.bf16 %v399_v46, %v398_v45  ;;  %v401_v50 = vld [vmem:[%s2895_s16 + $0xb8] sm:$0xff]  ;;  %v402_v51 = vld [vmem:[%s2895_s16 + $0xc0] sm:$0xff]  ;;  %v403_v52 = vld [vmem:[%s2895_s16 + $0xc8] sm:$0xff] }
  0x19   : > { %2441 = vmatpush3.bf16.msra.mxu0 %v2605_v3  ;;  %v3028_v53 = vpack.c.bf16 %v401_v50, %v400_v49  ;;  %v3030_v54 = vpack.c.bf16 %v403_v52, %v402_v51  ;;  %v404_v55 = vld [vmem:[%s2895_s16 + $0xd0] sm:$0xff]  ;;  %v405_v56 = vld [vmem:[%s2895_s16 + $0xd8] sm:$0xff]  ;;  %v406_v57 = vld [vmem:[%s2895_s16 + $0xe0] sm:$0xff] }
  0x1a   : > { %2442 = vmatprep.subr.bf16.mxu0 %v2606_v7  ;;  %v407_v58 = vld [vmem:[%s2895_s16 + $0xe8] sm:$0xff]  ;;  %v3038_v59 = vpack.c.bf16 %v405_v56, %v404_v55  ;;  %v408_v61 = vld [vmem:[%s2895_s16 + $0xf0] sm:$0xff]  ;;  %v409_v62 = vld [vmem:[%s2895_s16 + $0xf8] sm:$0xff] }
  0x1b   : > { %v3040_v60 = vpack.c.bf16 %v407_v58, %v406_v57  ;;  %v3046_v63 = vpack.c.bf16 %v409_v62, %v408_v61  ;;  %v2618_v0 = vld [vmem:[%s4033_s6 + $0x38] sm:$0xff]   ;;  %v2619_v1 = vld [vmem:[%s4033_s6 + $0x30] sm:$0xff]   ;;  %v2620_v2 = vld [vmem:[%s4033_s6 + $0x28] sm:$0xff]  }
  0x1c   : > { %2482 = vmatprep.subr.bf16.mxu1 %v2618_v0  ;;  %v2621_v3 = vld [vmem:[%s4033_s6 + $0x20] sm:$0xff]   ;;  %v2622_v4 = vld [vmem:[%s4033_s6 + $0x18] sm:$0xff]   ;;  %v2623_v5 = vld [vmem:[%s4033_s6 + $0x10] sm:$0xff]  }
  0x1d   : > { %2443 = vmatpush3.bf16.msra.mxu0 %v2606_v7  ;;  %2483 = vmatpush3.bf16.msra.mxu1 %v2618_v0  ;;  %v2625_v7 = vld [vmem:[%s4033_s6] sm:$0xff]  }
  0x1e   : > { %2444 = vmatprep.subr.bf16.mxu0 %v2607_v8  ;;  %2484 = vmatprep.subr.bf16.mxu1 %v2619_v1 }
  0x21   : > { %2445 = vmatpush3.bf16.msra.mxu0 %v2607_v8  ;;  %2485 = vmatpush3.bf16.msra.mxu1 %v2619_v1 }
  0x22   : > { %2446 = vmatprep.subr.bf16.mxu0 %v2608_v9  ;;  %2486 = vmatprep.subr.bf16.mxu1 %v2620_v2 }
  0x25   : > { %2447 = vmatpush3.bf16.msra.mxu0 %v2608_v9  ;;  %2487 = vmatpush3.bf16.msra.mxu1 %v2620_v2  ;;  %v3099_v9 = vld [vmem:[%s4032_s5] ss:$0 sm:$0xff] }
  0x26   : > { %2448 = vmatprep.subr.bf16.mxu0 %v2609_v10  ;;  %2488 = vmatprep.subr.bf16.mxu1 %v2621_v3 }
  0x29   : > { %2449 = vmatpush3.bf16.msra.mxu0 %v2609_v10  ;;  %2489 = vmatpush3.bf16.msra.mxu1 %v2621_v3 }
  0x2a   : > { %2530 = vmatprep.subr.bf16.mxu0 %v2925_v15  ;;  %2490 = vmatprep.subr.bf16.mxu1 %v2622_v4 }
  0x2c   : > { %2451 = vmatmul.mubr.bf16.vlgmr.msra.gmra.mxu0 %v2927_v16 }
  0x2d   : > { %2454 = vmatprep.mubr.bf16.mxu0 %v2929_v17  ;;  %2531 = vmatpush3.bf16.msra.mxu0 %v2925_v15 }
  0x2e   : > { %2532 = vmatprep.subr.bf16.mxu0 %v2935_v18  ;;  %2491 = vmatpush3.bf16.msra.mxu1 %v2622_v4 }
  0x2f   : > { %2492 = vmatprep.subr.bf16.mxu1 %v2623_v5 }
  0x31   : > { %2533 = vmatpush3.bf16.msra.mxu0 %v2935_v18 }
  0x32   : > { %2534 = vmatprep.subr.bf16.mxu0 %v2948_v23  ;;  %2493 = vmatpush3.bf16.msra.mxu1 %v2623_v5 }
  0x34   : > { %2455 = vmatmul.mubr.bf16.gmra.mxu0 %v2950_v24 }
  0x35   : > { %2458 = vmatprep.mubr.bf16.mxu0 %v2952_v25  ;;  %2535 = vmatpush3.bf16.msra.mxu0 %v2948_v23 }
  0x36   : > { %2536 = vmatprep.subr.bf16.mxu0 %v2959_v26 }
  0x39   : > { %2537 = vmatpush3.bf16.msra.mxu0 %v2959_v26 }
  0x3a   : > { %2538 = vmatprep.subr.bf16.mxu0 %v2972_v31 }
  0x3c   : > { %2459 = vmatmul.mubr.bf16.gmra.mxu0 %v2974_v32 }
  0x3d   : > { %2462 = vmatprep.mubr.bf16.mxu0 %v2976_v33  ;;  %2539 = vmatpush3.bf16.msra.mxu0 %v2972_v31 }
  0x3e   : > { %2540 = vmatprep.subr.bf16.mxu0 %v2983_v34 }
  0x41   : > { %2541 = vmatpush3.bf16.msra.mxu0 %v2983_v34 }
  0x42   : > { %2542 = vmatprep.subr.bf16.mxu0 %v2996_v39 }
  0x44   : > { %2463 = vmatmul.mubr.bf16.gmra.mxu0 %v2998_v40 }
  0x45   : > { %2466 = vmatprep.mubr.bf16.mxu0 %v3000_v41  ;;  %2543 = vmatpush3.bf16.msra.mxu0 %v2996_v39 }
  0x46   : > { %2544 = vmatprep.subr.bf16.mxu0 %v3007_v42 }
  0x49   : > { %2545 = vmatpush3.bf16.msra.mxu0 %v3007_v42 }
  0x4c   : > { %2467 = vmatmul.mubr.bf16.gmra.mxu0 %v3017_v47 }
  0x4d   : > { %2470 = vmatprep.mubr.bf16.mxu0 %v3019_v48 }
  0x54   : > { %2471 = vmatmul.mubr.bf16.gmra.mxu0 %v3028_v53 }
  0x55   : > { %2474 = vmatprep.mubr.bf16.mxu0 %v3030_v54 }
  0x5c   : > { %2475 = vmatmul.mubr.bf16.gmra.mxu0 %v3038_v59 }
  0x5d   : > { %2478 = vmatprep.mubr.bf16.mxu0 %v3040_v60 }
  0x64   : > { %2479 = vmatmul.mubr.bf16.gmra.mxu0 %v3046_v63 }
  0x65   : > { %2546 = vmatprep.mubr.bf16.mxu0 %v2902_v6  ;;  %v2624_v6 = vld [vmem:[%s4033_s6 + $0x8] sm:$0xff]  }
  0x66   : > { %2494 = vmatprep.subr.bf16.mxu1 %v2624_v6 }
  0x67   : > { %2495 = vmatpush3.bf16.msra.mxu1 %v2624_v6 }
  0x68   : > { %2496 = vmatprep.subr.bf16.mxu1 %v2625_v7 }
  0x6b   : > { %2497 = vmatpush3.bf16.msra.mxu1 %v2625_v7 }
  0x6c   : > { %2547 = vmatmul.mubr.bf16.vlgmr.msra.gmra.mxu0 %v2927_v16 }
  0x6d   : > { %2550 = vmatprep.mubr.bf16.mxu0 %v2929_v17 }
  0x6e   : > { %2499 = vmatmul.mubr.bf16.vlgmr.msra.gmra.mxu1 %v2927_v16 }
  0x6f   : > { %2502 = vmatprep.mubr.bf16.mxu1 %v2929_v17 }
  0x74   : > { %2551 = vmatmul.mubr.bf16.gmra.mxu0 %v2950_v24 }
  0x75   : > { %2554 = vmatprep.mubr.bf16.mxu0 %v2952_v25 }
  0x76   : > { %2503 = vmatmul.mubr.bf16.gmra.mxu1 %v2950_v24 }
  0x77   : > { %2506 = vmatprep.mubr.bf16.mxu1 %v2952_v25 }
  0x7c   : > { %2555 = vmatmul.mubr.bf16.gmra.mxu0 %v2974_v32 }
  0x7d   : > { %2558 = vmatprep.mubr.bf16.mxu0 %v2976_v33 }
  0x7e   : > { %2507 = vmatmul.mubr.bf16.gmra.mxu1 %v2974_v32 }
  0x7f   : > { %2510 = vmatprep.mubr.bf16.mxu1 %v2976_v33 }
  0x84   : > { %2559 = vmatmul.mubr.bf16.gmra.mxu0 %v2998_v40 }
  0x86   : > { %2511 = vmatmul.mubr.bf16.gmra.mxu1 %v2998_v40 }
  0x87   : > { %2514 = vmatprep.mubr.bf16.mxu1 %v3000_v41 }
  0x8e   : > { %2515 = vmatmul.mubr.bf16.gmra.mxu1 %v3017_v47 }
  0x8f   : > { %2518 = vmatprep.mubr.bf16.mxu1 %v3019_v48 }
  0x96   : > { %2519 = vmatmul.mubr.bf16.gmra.mxu1 %v3028_v53 }
  0x97   : > { %2522 = vmatprep.mubr.bf16.mxu1 %v3030_v54 }
  0x9e   : > { %2523 = vmatmul.mubr.bf16.gmra.mxu1 %v3038_v59 }
  0x9f   : > { %2526 = vmatprep.mubr.bf16.mxu1 %v3040_v60 }
  0xa6   : > { %2527 = vmatmul.mubr.bf16.gmra.mxu1 %v3046_v63 }
  0xec   : > { %v2452_v8 = vpop.f32.mrf.mxu0 }
  0xed   : > { %v523_v12 = vadd.f32 %v2452_v8, %v3099_v9 }
  0xee   : > { %v514_v10 = vpop.f32.mrf.mxu0 }
  0xef   : > { %v515_v16 = vadd.f32 %v3099_v9, %v514_v10 }
  0xf0   : > { %v2453_v11 = vpop.f32.mrf.mxu0 }
  0xf1   : > { %v526_v13 = vadd.f32 %v2453_v11, %v3099_v9 }
  0xf2   : > { %v517_v14 = vpop.f32.mrf.mxu0 }
  0xf3   : > { %v3104_v17 = vpack.c.bf16 %v526_v13, %v523_v12  ;;  %v518_v19 = vadd.f32 %v3099_v9, %v517_v14 }
  0xf4   : > { %v2456_v20 = vpop.f32.mrf.mxu0 }
  0xf5   : > { %4072 = vst [vmem:[#allocation2_spill] sm:$0xff] %v3104_v17  ;;  %v3107_v21 = vpack.c.bf16 %v518_v19, %v515_v16  ;;  %v539_v25 = vadd.f32 %v2456_v20, %v3099_v9 }
  0xf6   : > { %v530_v22 = vpop.f32.mrf.mxu0 }
  0xf7   : > { %4073 = vst [vmem:[#allocation3_spill] sm:$0xff] %v3107_v21  ;;  %v531_v29 = vadd.f32 %v3099_v9, %v530_v22 }
  0xf8   : > { %v2457_v24 = vpop.f32.mrf.mxu0 }
  0xf9   : > { %v542_v27 = vadd.f32 %v2457_v24, %v3099_v9 }
  0xfa   : > { %v533_v28 = vpop.f32.mrf.mxu0 }
  0xfb   : > { %v3112_v30 = vpack.c.bf16 %v542_v27, %v539_v25  ;;  %v534_v32 = vadd.f32 %v3099_v9, %v533_v28  ;;  %v3146_v28 = vld [vmem:[%s4030_s3] ss:$0 sm:$0xff] }
  0xfc   : > { %v2460_v33 = vpop.f32.mrf.mxu0 }
  0xfd   : > { %4074 = vst [vmem:[#allocation4_spill] sm:$0xff] %v3112_v30  ;;  %v3115_v35 = vpack.c.bf16 %v534_v32, %v531_v29 }
  0xfe   : > { %v3117_v36 = vpop.f32.mrf.mxu0 }
  0xff   : > { %4075 = vst [vmem:[#allocation5_spill] sm:$0xff] %v3115_v35 }
 0x100   : > { %v2461_v37 = vpop.f32.mrf.mxu0 }
 0x102   : > { %v3119_v38 = vpop.f32.mrf.mxu0 }
 0x104   : > { %v2464_v40 = vpop.f32.mrf.mxu0 }
 0x105   : > { %v571_v14 = vadd.f32 %v2464_v40, %v3099_v9 }
 0x106   : > { %v562_v43 = vpop.f32.mrf.mxu0 }
 0x108   : > { %v2465_v44 = vpop.f32.mrf.mxu0 }
 0x109   : > { %v574_v10 = vadd.f32 %v2465_v44, %v3099_v9 }
 0x10a   : > { %v565_v45 = vpop.f32.mrf.mxu0 }
 0x10b   : > { %v3137_v24 = vpack.c.bf16 %v574_v10, %v571_v14  ;;  %v566_v32 = vadd.f32 %v3099_v9, %v565_v45  ;;  %v558_v45 = vadd.f32 %v2461_v37, %v3099_v9  ;;  %v550_v10 = vadd.f32 %v3099_v9, %v3119_v38 }
 0x10c   : > { %v2468_v46 = vpop.f32.mrf.mxu0  ;;  %v547_v37 = vadd.f32 %v3099_v9, %v3117_v36 }
 0x10d   : > { %v587_v51 = vadd.f32 %v2468_v46, %v3099_v9  ;;  %4079 = vst [vmem:[#allocation9_spill] sm:$0xff] %v3137_v24 }
 0x10e   : > { %v578_v49 = vpop.f32.mrf.mxu0 }
 0x10f   : > { %v579_v56 = vadd.f32 %v3099_v9, %v578_v49  ;;  %v563_v49 = vadd.f32 %v3099_v9, %v562_v43  ;;  %v555_v43 = vadd.f32 %v2460_v33, %v3099_v9 }
 0x110   : > { %v2469_v50 = vpop.f32.mrf.mxu0 }
 0x111   : > { %v590_v52 = vadd.f32 %v2469_v50, %v3099_v9 }
 0x112   : > { %v581_v55 = vpop.f32.mrf.mxu0 }
 0x113   : > { %v3124_v57 = vpack.c.bf16 %v590_v52, %v587_v51  ;;  %v582_v58 = vadd.f32 %v3099_v9, %v581_v55  ;;  %v3155_v55 = vpack.c.bf16 %v566_v32, %v563_v49 }
 0x114   : > { %v2472_v61 = vpop.f32.mrf.mxu0 }
 0x115   : > { %4076 = vst [vmem:[#allocation6_spill] sm:$0xff] %v3124_v57  ;;  %v3127_v62 = vpack.c.bf16 %v582_v58, %v579_v56  ;;  %4081 = vst [vmem:[#allocation11_spill] sm:$0xff] %v3155_v55  ;;  %v603_v33 = vadd.f32 %v2472_v61, %v3099_v9 }
 0x116   : > { %v594_v0 = vpop.f32.mrf.mxu0 }
 0x117   : > { %4077 = vst [vmem:[#allocation7_spill] sm:$0xff] %v3127_v62 }
 0x118   : > { %v2473_v1 = vpop.f32.mrf.mxu0 }
 0x11a   : > { %v597_v2 = vpop.f32.mrf.mxu0 }
 0x11c   : > { %v2476_v3 = vpop.f32.mrf.mxu0 }
 0x11d   : > { %v619_v51 = vadd.f32 %v2476_v3, %v3099_v9 }
 0x11e   : > { %v610_v4 = vpop.f32.mrf.mxu0 }
 0x11f   : > { %v611_v3 = vadd.f32 %v3099_v9, %v610_v4 }
 0x120   : > { %v2477_v5 = vpop.f32.mrf.mxu0 }
 0x121   : > { %v622_v44 = vadd.f32 %v2477_v5, %v3099_v9 }
 0x122   : > { %v613_v6 = vpop.f32.mrf.mxu0 }
 0x123   : > { %v3157_v56 = vpack.c.bf16 %v622_v44, %v619_v51  ;;  %v614_v5 = vadd.f32 %v3099_v9, %v613_v6  ;;  %v3177_v6 = vpack.c.bf16 %v550_v10, %v547_v37 }
 0x124   : > { %v2480_v7 = vpop.f32.mrf.mxu0 }
 0x125   : > { %v635_v12 = vadd.f32 %v2480_v7, %v3099_v9  ;;  %4082 = vst [vmem:[#allocation12_spill] sm:$0xff] %v3157_v56  ;;  %v3165_v7 = vpack.c.bf16 %v558_v45, %v555_v43  ;;  %4085 = vst [vmem:[#allocation15_spill] sm:$0xff] %v3177_v6 }
 0x126   : > { %v626_v8 = vpop.f32.mrf.mxu0 }
 0x127   : > { %v627_v19 = vadd.f32 %v3099_v9, %v626_v8  ;;  %4083 = vst [vmem:[#allocation13_spill] sm:$0xff] %v3165_v7  ;;  %v3167_v8 = vpack.c.bf16 %v614_v5, %v611_v3 }
 0x128   : > { %v2481_v11 = vpop.f32.mrf.mxu0 }
 0x129   : > { %v638_v13 = vadd.f32 %v2481_v11, %v3099_v9  ;;  %4084 = vst [vmem:[#allocation14_spill] sm:$0xff] %v3167_v8  ;;  %v606_v11 = vadd.f32 %v2473_v1, %v3099_v9 }
 0x12a   : > { %v629_v16 = vpop.f32.mrf.mxu0 }
 0x12b   : > { %v3134_v20 = vpack.c.bf16 %v638_v13, %v635_v12  ;;  %v630_v22 = vadd.f32 %v3099_v9, %v629_v16  ;;  %v3179_v4 = vpack.c.bf16 %v606_v11, %v603_v33  ;;  %v598_v12 = vadd.f32 %v3099_v9, %v597_v2 }
 0x12c   : > { %v2548_v25 = vpop.f32.mrf.mxu0  ;;  %v595_v13 = vadd.f32 %v3099_v9, %v594_v0  ;;  %v3197_v0 = vld [vmem:[%s4034_s7] ss:$0 sm:$0xff] }
 0x12d   : > { %4078 = vst [vmem:[#allocation8_spill] sm:$0xff] %v3134_v20  ;;  %v3139_v27 = vpack.c.bf16 %v630_v22, %v627_v19  ;;  %2354 = vmatprep.subr.bf16.mxu1 %v3134_v20  ;;  %4086 = vst [vmem:[#allocation16_spill] sm:$0xff] %v3179_v4  ;;  %v985_v2 = vadd.f32 %v2548_v25, %v3146_v28 }
 0x12e   : > { %2355 = vmatpush3.bf16.xpose.msra.mxu1 %v3137_v24  ;;  %v976_v29 = vpop.f32.mrf.mxu0  ;;  %v3185_v38 = vpack.c.bf16 %v598_v12, %v595_v13  ;;  %v2500_v9 = vpop.f32.mrf.mxu1  ;;  %4088 = vst [vmem:[#allocation18_spill] sm:$0xff] %v3197_v0 }
 0x12f   : > { %4080 = vst [vmem:[#allocation10_spill] sm:$0xff] %v3139_v27  ;;  %2356 = vmatprep.subr.bf16.mxu1 %v3139_v27  ;;  %v977_v46 = vadd.f32 %v3146_v28, %v976_v29  ;;  %v3203_v19 = vadd.f32 %v2500_v9, %v3197_v0 }
 0x130   : > { %v2549_v40 = vpop.f32.mrf.mxu0  ;;  %4087 = vst [vmem:[#allocation17_spill] sm:$0xff] %v3185_v38  ;;  %v745_v16 = vpop.f32.mrf.mxu1 }
 0x131   : > { %v988_v14 = vadd.f32 %v2549_v40, %v3146_v28  ;;  %v3216_v51 = vadd.f32 %v3197_v0, %v745_v16 }
 0x132   : > { %v979_v50 = vpop.f32.mrf.mxu0  ;;  %v2501_v29 = vpop.f32.mrf.mxu1 }
 0x133   : > { %v980_v52 = vadd.f32 %v3146_v28, %v979_v50  ;;  %v1040_v32 = vpack.c.bf16 %v988_v14, %v985_v2  ;;  %v3206_v44 = vadd.f32 %v2501_v29, %v3197_v0 }
 0x134   : > { %v2552_v36 = vpop.f32.mrf.mxu0 }
 0x135   : > { %v1039_v58 = vpack.c.bf16 %v980_v52, %v977_v46  ;;  %v748_v46 = vpop.f32.mrf.mxu1  ;;  %v1001_v9 = vadd.f32 %v2552_v36, %v3146_v28 }
 0x136   : > { %2357 = vmatpush3.bf16.xpose.msra.mxu1 %v3155_v55  ;;  %v992_v61 = vpop.f32.mrf.mxu0  ;;  %v3219_v52 = vadd.f32 %v3197_v0, %v748_v46 }
 0x137   : > { %2358 = vmatprep.subr.bf16.mxu1 %v3157_v56  ;;  %2370 = vmatprep.mubr.bf16.mxu1 %v1039_v58  ;;  %v993_v49 = vadd.f32 %v3146_v28, %v992_v61 }
 0x138   : > { %v2553_v1 = vpop.f32.mrf.mxu0 }
 0x139   : > { %v1004_v2 = vadd.f32 %v2553_v1, %v3146_v28 }
 0x13a   : > { %v995_v22 = vpop.f32.mrf.mxu0 }
 0x13b   : > { %v996_v50 = vadd.f32 %v3146_v28, %v995_v22 }
 0x13c   : > { %v3213_v40 = vpop.f32.mrf.mxu0 }
 0x13d   : > { %v1041_v5 = vpack.c.bf16 %v996_v50, %v993_v49 }
 0x13e   : > { %2359 = vmatpush3.bf16.xpose.msra.mxu1 %v3165_v7  ;;  %v1008_v3 = vpop.f32.mrf.mxu0 }
 0x13f   : > { %2360 = vmatprep.subr.bf16.mxu1 %v3167_v8  ;;  %v1009_v1 = vadd.f32 %v3146_v28, %v1008_v3 }
 0x140   : > { %v2557_v13 = vpop.f32.mrf.mxu0 }
 0x142   : > { %v1011_v29 = vpop.f32.mrf.mxu0 }
 0x143   : > { %v1012_v50 = vadd.f32 %v3146_v28, %v1011_v29 }
 0x146   : > { %2361 = vmatpush3.bf16.xpose.msra.mxu1 %v3177_v6 }
 0x147   : > { %2362 = vmatprep.subr.bf16.mxu1 %v3179_v4 }
 0x14e   : > { %2363 = vmatpush3.bf16.xpose.msra.mxu1 %v3112_v30 }
 0x14f   : > { %2364 = vmatprep.subr.bf16.mxu1 %v3185_v38 }
 0x156   : > { %2365 = vmatpush3.bf16.xpose.msra.mxu1 %v3115_v35 }
 0x157   : > { %2366 = vmatprep.subr.bf16.mxu1 %v3124_v57 }
 0x15e   : > { %2367 = vmatpush3.bf16.xpose.msra.mxu1 %v3104_v17 }
 0x15f   : > { %2368 = vmatprep.subr.bf16.mxu1 %v3127_v62 }
 0x166   : > { %2369 = vmatpush3.bf16.xpose.msra.mxu1 %v3107_v21 }
 0x167   : > { %2562 = vmatprep.subr.bf16.mxu1 %v2925_v15 }
 0x16d   : > { %2371 = vmatmul.mubr.bf16.vlgmr.msra.gmra.mxu1 %v1039_v58  ;;  %v2504_v58 = vpop.f32.mrf.mxu1 }
 0x16e   : > { %2372 = vmatprep.mubr.bf16.mxu1 %v1040_v32  ;;  %2563 = vmatpush3.bf16.msra.mxu1 %v2925_v15  ;;  %v3223_v43 = vadd.f32 %v2504_v58, %v3197_v0 }
 0x16f   : > { %2564 = vmatprep.subr.bf16.mxu1 %v2935_v18  ;;  %v761_v45 = vpop.f32.mrf.mxu1 }
 0x170   : > { %4089 = vst [vmem:[#allocation19_spill] sm:$0xff] %v3223_v43  ;;  %v3230_v11 = vadd.f32 %v3197_v0, %v761_v45  ;;  %v2560_v45 = vpop.f32.mrf.mxu0 }
 0x171   : > { %v2505_v15 = vpop.f32.mrf.mxu1 }
 0x172   : > { %2565 = vmatpush3.bf16.msra.mxu1 %v2935_v18  ;;  %v3233_v37 = vadd.f32 %v2505_v15, %v3197_v0 }
 0x173   : > { %2566 = vmatprep.subr.bf16.mxu1 %v2948_v23  ;;  %v764_v33 = vpop.f32.mrf.mxu1 }
 0x174   : > { %4090 = vst [vmem:[#allocation20_spill] sm:$0xff] %v3233_v37  ;;  %v3238_v18 = vadd.f32 %v3197_v0, %v764_v33  ;;  %v1043_v33 = vpack.c.bf16 %v1012_v50, %v1009_v1  ;;  %v1017_v50 = vadd.f32 %v3213_v40, %v3146_v28 }
 0x175   : > { %2373 = vmatmul.mubr.bf16.gmra.mxu1 %v1040_v32  ;;  %v2508_v61 = vpop.f32.mrf.mxu1 }
 0x176   : > { %2374 = vmatprep.mubr.bf16.mxu1 %v1041_v5  ;;  %2567 = vmatpush3.bf16.msra.mxu1 %v2948_v23  ;;  %v3247_v22 = vadd.f32 %v2508_v61, %v3197_v0  ;;  %v1042_v23 = vpack.c.bf16 %v1004_v2, %v1001_v9  ;;  %v1024_v9 = vpop.f32.mrf.mxu0 }
 0x177   : > { %2568 = vmatprep.subr.bf16.mxu1 %v2959_v26  ;;  %v777_v16 = vpop.f32.mrf.mxu1  ;;  %v1025_v40 = vadd.f32 %v3146_v28, %v1024_v9 }
 0x178   : > { %4091 = vst [vmem:[#allocation21_spill] sm:$0xff] %v3247_v22  ;;  %v3252_v46 = vadd.f32 %v3197_v0, %v777_v16 }
 0x179   : > { %v2509_v32 = vpop.f32.mrf.mxu1 }
 0x17a   : > { %2569 = vmatpush3.bf16.msra.mxu1 %v2959_v26  ;;  %4092 = vst [vmem:[#allocation22_spill] sm:$0xff] %v3252_v46  ;;  %v3255_v36 = vadd.f32 %v2509_v32, %v3197_v0 }
 0x17b   : > { %2570 = vmatprep.subr.bf16.mxu1 %v2972_v31  ;;  %v780_v49 = vpop.f32.mrf.mxu1 }
 0x17c   : > { %4093 = vst [vmem:[#allocation23_spill] sm:$0xff] %v3255_v36  ;;  %v3262_v58 = vadd.f32 %v3197_v0, %v780_v49 }
 0x17d   : > { %2375 = vmatmul.mubr.bf16.gmra.mxu1 %v1041_v5  ;;  %v2512_v15 = vpop.f32.mrf.mxu1 }
 0x17e   : > { %2376 = vmatprep.mubr.bf16.mxu1 %v1042_v23  ;;  %4094 = vst [vmem:[#allocation24_spill] sm:$0xff] %v3262_v58  ;;  %2571 = vmatpush3.bf16.msra.mxu1 %v2972_v31  ;;  %v3269_v61 = vadd.f32 %v2512_v15, %v3197_v0  ;;  %v1020_v15 = vadd.f32 %v2557_v13, %v3146_v28 }
 0x17f   : > { %2572 = vmatprep.subr.bf16.mxu1 %v2983_v34  ;;  %v793_v5 = vpop.f32.mrf.mxu1 }
 0x180   : > { %4095 = vst [vmem:[#allocation25_spill] sm:$0xff] %v3269_v61  ;;  %v3274_v31 = vadd.f32 %v3197_v0, %v793_v5  ;;  %v1044_v32 = vpack.c.bf16 %v1020_v15, %v1017_v50 }
 0x181   : > { %v2513_v2 = vpop.f32.mrf.mxu1 }
 0x182   : > { %2573 = vmatpush3.bf16.msra.mxu1 %v2983_v34  ;;  %4096 = vst [vmem:[#allocation26_spill] sm:$0xff] %v3274_v31  ;;  %v3277_v16 = vadd.f32 %v2513_v2, %v3197_v0  ;;  %v2561_v34 = vpop.f32.mrf.mxu0 }
 0x183   : > { %2574 = vmatprep.subr.bf16.mxu1 %v2996_v39  ;;  %v796_v29 = vpop.f32.mrf.mxu1  ;;  %v1036_v25 = vadd.f32 %v2561_v34, %v3146_v28 }
 0x184   : > { %4097 = vst [vmem:[#allocation27_spill] sm:$0xff] %v3277_v16  ;;  %v3282_v1 = vadd.f32 %v3197_v0, %v796_v29  ;;  %v1027_v29 = vpop.f32.mrf.mxu0 }
 0x185   : > { %2377 = vmatmul.mubr.bf16.gmra.mxu1 %v1042_v23  ;;  %v2516_v49 = vpop.f32.mrf.mxu1  ;;  %v1028_v13 = vadd.f32 %v3146_v28, %v1027_v29 }
 0x186   : > { %2378 = vmatprep.mubr.bf16.mxu1 %v1043_v33  ;;  %4098 = vst [vmem:[#allocation28_spill] sm:$0xff] %v3282_v1  ;;  %2575 = vmatpush3.bf16.msra.mxu1 %v2996_v39  ;;  %v3292_v2 = vadd.f32 %v2516_v49, %v3197_v0 }
 0x187   : > { %2576 = vmatprep.subr.bf16.mxu1 %v3007_v42  ;;  %v809_v5 = vpop.f32.mrf.mxu1 }
 0x188   : > { %v3303_v49 = vadd.f32 %v3197_v0, %v809_v5 }
 0x189   : > { %v2517_v39 = vpop.f32.mrf.mxu1 }
 0x18a   : > { %2577 = vmatpush3.bf16.msra.mxu1 %v3007_v42  ;;  %v3296_v26 = vadd.f32 %v2517_v39, %v3197_v0  ;;  %v1045_v39 = vpack.c.bf16 %v1028_v13, %v1025_v40 }
 0x18b   : > { %v812_v3 = vpop.f32.mrf.mxu1 }
 0x18c   : > { %v3306_v42 = vadd.f32 %v3197_v0, %v812_v3 }
 0x18d   : > { %2379 = vmatmul.mubr.bf16.gmra.mxu1 %v1043_v33  ;;  %v2520_v50 = vpop.f32.mrf.mxu1 }
 0x18e   : > { %2380 = vmatprep.mubr.bf16.mxu1 %v1044_v32  ;;  %v3309_v33 = vadd.f32 %v2520_v50, %v3197_v0  ;;  %v1033_v50 = vadd.f32 %v2560_v45, %v3146_v28 }
 0x18f   : > { %v825_v15 = vpop.f32.mrf.mxu1 }
 0x190   : > { %4099 = vst [vmem:[#allocation29_spill] sm:$0xff] %v3309_v33  ;;  %v3314_v29 = vadd.f32 %v3197_v0, %v825_v15  ;;  %v1046_v10 = vpack.c.bf16 %v1036_v25, %v1033_v50 }
 0x191   : > { %v2521_v12 = vpop.f32.mrf.mxu1 }
 0x192   : > { %v3317_v14 = vadd.f32 %v2521_v12, %v3197_v0 }
 0x193   : > { %v828_v5 = vpop.f32.mrf.mxu1 }
 0x194   : > { %v3322_v40 = vadd.f32 %v3197_v0, %v828_v5 }
 0x195   : > { %2381 = vmatmul.mubr.bf16.gmra.mxu1 %v1044_v32  ;;  %v2524_v13 = vpop.f32.mrf.mxu1 }
 0x196   : > { %2382 = vmatprep.mubr.bf16.mxu1 %v1045_v39  ;;  %v3329_v12 = vadd.f32 %v2524_v13, %v3197_v0 }
 0x197   : > { %v841_v23 = vpop.f32.mrf.mxu1 }
 0x198   : > { %4100 = vst [vmem:[#allocation30_spill] sm:$0xff] %v3329_v12  ;;  %v3332_v9 = vadd.f32 %v3197_v0, %v841_v23 }
 0x199   : > { %v2525_v32 = vpop.f32.mrf.mxu1 }
 0x19a   : > { %4101 = vst [vmem:[#allocation31_spill] sm:$0xff] %v3332_v9  ;;  %v3335_v5 = vadd.f32 %v2525_v32, %v3197_v0 }
 0x19b   : > { %v844_v3 = vpop.f32.mrf.mxu1 }
 0x19c   : > { %4102 = vst [vmem:[#allocation32_spill] sm:$0xff] %v3335_v5  ;;  %v3340_v45 = vadd.f32 %v3197_v0, %v844_v3 }
 0x19d   : > { %2383 = vmatmul.mubr.bf16.gmra.mxu1 %v1045_v39  ;;  %v2528_v34 = vpop.f32.mrf.mxu1 }
 0x19e   : > { %2384 = vmatprep.mubr.bf16.mxu1 %v1046_v10  ;;  %4103 = vst [vmem:[#allocation33_spill] sm:$0xff] %v3340_v45  ;;  %v3347_v23 = vadd.f32 %v2528_v34, %v3197_v0 }
 0x19f   : > { %v3344_v25 = vpop.f32.mrf.mxu1 }
 0x1a0   : > { %4104 = vst [vmem:[#allocation34_spill] sm:$0xff] %v3344_v25  ;;  %4105 = vst [vmem:[#allocation35_spill] sm:$0xff] %v3347_v23 }
 0x1a1   : > { %v2529_v50 = vpop.f32.mrf.mxu1 }
 0x1a2   : > { %v3350_v39 = vadd.f32 %v2529_v50, %v3197_v0 }
 0x1a4   : > { %4106 = vst [vmem:[#allocation36_spill] sm:$0xff] %v3350_v39 }
 0x1a5   : > { %2385 = vmatmul.mubr.bf16.gmra.mxu1 %v1046_v10  ;;  %v3362_v10 = vpop.f32.mrf.mxu1 }
 0x1a6   : > { %2578 = vmatprep.mubr.bf16.mxu1 %v3000_v41  ;;  %4107 = vst [vmem:[#allocation37_spill] sm:$0xff] %v3362_v10 }
 0x1ad   : > { %2579 = vmatmul.mubr.bf16.vlgmr.msra.gmra.mxu1 %v3017_v47 }
 0x1ae   : > { %2582 = vmatprep.mubr.bf16.mxu1 %v3019_v48 }
 0x1b5   : > { %2583 = vmatmul.mubr.bf16.gmra.mxu1 %v3028_v53 }
 0x1b6   : > { %2586 = vmatprep.mubr.bf16.mxu1 %v3030_v54 }
 0x1bd   : > { %2587 = vmatmul.mubr.bf16.gmra.mxu1 %v3038_v59 }
 0x1be   : > { %2590 = vmatprep.mubr.bf16.mxu1 %v3040_v60 }
 0x1c5   : > { %2591 = vmatmul.mubr.bf16.gmra.mxu1 %v3046_v63 }
 0x22d   : > { %v3364_v3 = vpop.f32.mrf.mxu1 }
 0x22f   : > { %v3366_v34 = vpop.f32.mrf.mxu1 }
 0x231   : > { %v3368_v41 = vpop.f32.mrf.mxu1 }
 0x233   : > { %v3370_v47 = vpop.f32.mrf.mxu1 }
 0x235   : > { %v3372_v48 = vpop.f32.mrf.mxu1 }
 0x237   : > { %v3374_v53 = vpop.f32.mrf.mxu1 }
 0x239   : > { %v3376_v54 = vpop.f32.mrf.mxu1 }
 0x23b   : > { %v3378_v59 = vpop.f32.mrf.mxu1 }
 0x23d   : > { %v3380_v60 = vpop.f32.mrf.mxu1 }
 0x23f   : > { %v3382_v63 = vpop.f32.mrf.mxu1 }
 0x241   : > { %v3384_v50 = vpop.f32.mrf.mxu1 }
 0x243   : > { %v3386_v32 = vpop.f32.mrf.mxu1 }
 0x244   : > { %v1175_v36 = vmax.f32 %v3384_v50, %v3386_v32 }
 0x245   : > { %v3388_v28 = vpop.f32.mrf.mxu1 }
 0x247   : > { %v3390_v13 = vpop.f32.mrf.mxu1 }
 0x249   : > { %v3392_v15 = vpop.f32.mrf.mxu1 }
 0x24b   : > { %v3394_v21 = vpop.f32.mrf.mxu1 }
 0x24d   : > { %v3396_v62 = vpop.f32.mrf.mxu1 }
 0x24f   : > { %v3398_v17 = vpop.f32.mrf.mxu1 }
 0x251   : > { %v3400_v57 = vpop.f32.mrf.mxu1 }
 0x253   : > { %v3402_v35 = vpop.f32.mrf.mxu1 }
 0x254   : > { %v1187_v1 = vmax.f32 %v3400_v57, %v3402_v35 }
 0x255   : > { %v3404_v38 = vpop.f32.mrf.mxu1 }
 0x257   : > { %v3406_v30 = vpop.f32.mrf.mxu1 }
 0x259   : > { %v3408_v4 = vpop.f32.mrf.mxu1 }
 0x25b   : > { %v3410_v6 = vpop.f32.mrf.mxu1 }
 0x25c   : > { %v1193_v16 = vmax.f32 %v3408_v4, %v3410_v6 }
 0x25d   : > { %v1141_v8 = vpop.f32.mrf.mxu1 }
 0x25f   : > { %v1143_v7 = vpop.f32.mrf.mxu1 }
 0x260   : > { %v1196_v56 = vmax.f32 %v1141_v8, %v1143_v7 }
 0x261   : > { %v1145_v55 = vpop.f32.mrf.mxu1 }
 0x262   : > { %1197 = vmax.xlane.f32.xlu1 %v1196_v56  ;;  %v1181_v56 = vmax.f32 %v3392_v15, %v3394_v21 }
 0x263   : > { %v1147_v27 = vpop.f32.mrf.mxu1 }
 0x264   : > { %v1199_v24 = vmax.f32 %v1145_v55, %v1147_v27 }
 0x265   : > { %v1151_v20 = vpop.f32.mrf.mxu1 }
 0x266   : > { %1200 = vmax.xlane.f32.xlu1 %v1199_v24  ;;  %v1190_v24 = vmax.f32 %v3404_v38, %v3406_v30 }
 0x267   : > { %v1153_v61 = vpop.f32.mrf.mxu1 }
 0x268   : > { %v1202_v23 = vmax.f32 %v1151_v20, %v1153_v61 }
 0x269   : > { %v1155_v39 = vpop.f32.mrf.mxu1 }
 0x26a   : > { %1194 = vmax.xlane.f32.xlu1 %v1193_v16  ;;  %1203 = vmax.xlane.f32.xlu0 %v1202_v23  ;;  %v1184_v16 = vmax.f32 %v3396_v62, %v3398_v17  ;;  %v1163_v23 = vmax.f32 %v3368_v41, %v3370_v47 }
 0x26b   : > { %v1157_v31 = vpop.f32.mrf.mxu1 }
 0x26c   : > { %v1205_v22 = vmax.f32 %v1155_v39, %v1157_v31 }
 0x26e   : > { %1188 = vmax.xlane.f32.xlu1 %v1187_v1  ;;  %1206 = vmax.xlane.f32.xlu0 %v1205_v22  ;;  %v1169_v1 = vmax.f32 %v3376_v54, %v3378_v59  ;;  %v1178_v22 = vmax.f32 %v3388_v28, %v3390_v13 }
 0x272   : > { %1182 = vmax.xlane.f32.xlu1 %v1181_v56  ;;  %1191 = vmax.xlane.f32.xlu0 %v1190_v24  ;;  %v1172_v56 = vmax.f32 %v3380_v60, %v3382_v63  ;;  %v1160_v24 = vmax.f32 %v3364_v3, %v3366_v34 }
 0x276   : > { %1176 = vmax.xlane.f32.xlu1 %v1175_v36  ;;  %1185 = vmax.xlane.f32.xlu0 %v1184_v16  ;;  %v1166_v36 = vmax.f32 %v3372_v48, %v3374_v53 }
 0x27a   : > { %1170 = vmax.xlane.f32.xlu1 %v1169_v1  ;;  %1179 = vmax.xlane.f32.xlu0 %v1178_v22 }
 0x27e   : > { %1164 = vmax.xlane.f32.xlu1 %v1163_v23  ;;  %1173 = vmax.xlane.f32.xlu0 %v1172_v56 }
 0x282   : > { %1167 = vmax.xlane.f32.xlu0 %v1166_v36 }
 0x286   : > { %1161 = vmax.xlane.f32.xlu0 %v1160_v24 }
 0x2eb   : > { %v1198_v16 = vpop.xlane.xlu1 %1197 }
 0x2ec   : > { %v1232_v1 = vsub.f32 %v1141_v8, %v1198_v16  ;;  %v1233_v22 = vsub.f32 %v1143_v7, %v1198_v16 }
 0x2ee   : > { %v1288_v58 = vmul.f32 1.442695, %v1232_v1  ;;  %v1290_v25 = vmul.f32 1.442695, %v1233_v22 }
 0x2ef   : > { %v1201_v12 = vpop.xlane.xlu1 %1200 }
 0x2f0   : > { %v1234_v10 = vsub.f32 %v1145_v55, %v1201_v12  ;;  %v1235_v23 = vsub.f32 %v1147_v27, %v1201_v12  ;;  %2626 = vpow2.f32 %v1288_v58 }
 0x2f1   : > { %2628 = vpow2.f32 %v1290_v25 }
 0x2f2   : > { %v1292_v37 = vmul.f32 1.442695, %v1234_v10  ;;  %v1294_v8 = vmul.f32 1.442695, %v1235_v23 }
 0x2f3   : > { %v1195_v5 = vpop.xlane.xlu1 %1194  ;;  %v1204_v46 = vpop.xlane.xlu0 %1203 }
 0x2f4   : > { %v1236_v0 = vsub.f32 %v1151_v20, %v1204_v46  ;;  %v1237_v56 = vsub.f32 %v1153_v61, %v1204_v46  ;;  %v1230_v24 = vsub.f32 %v3408_v4, %v1195_v5  ;;  %v1231_v7 = vsub.f32 %v3410_v6, %v1195_v5 }
 0x2f6   : > { %v1296_v9 = vmul.f32 1.442695, %v1236_v0  ;;  %v1298_v45 = vmul.f32 1.442695, %v1237_v56  ;;  %v1284_v0 = vmul.f32 1.442695, %v1230_v24 }
 0x2f7   : > { %v1189_v43 = vpop.xlane.xlu1 %1188  ;;  %v1207_v36 = vpop.xlane.xlu0 %1206  ;;  %v1286_v4 = vmul.f32 1.442695, %v1231_v7 }
 0x2f8   : > { %v1238_v33 = vsub.f32 %v1155_v39, %v1207_v36  ;;  %v1239_v16 = vsub.f32 %v1157_v31, %v1207_v36  ;;  %2630 = vpow2.f32 %v1296_v9  ;;  %v1226_v61 = vsub.f32 %v3400_v57, %v1189_v43 }
 0x2f9   : > { %2632 = vpow2.f32 %v1298_v45  ;;  %v1227_v12 = vsub.f32 %v3402_v35, %v1189_v43 }
 0x2fa   : > { %v1300_v55 = vmul.f32 1.442695, %v1238_v33  ;;  %v1302_v20 = vmul.f32 1.442695, %v1239_v16  ;;  %2634 = vpow2.f32 %v1292_v37  ;;  %v1276_v9 = vmul.f32 1.442695, %v1226_v61 }
 0x2fb   : > { %v1183_v27 = vpop.xlane.xlu1 %1182  ;;  %v1192_v46 = vpop.xlane.xlu0 %1191  ;;  %2636 = vpow2.f32 %v1294_v8  ;;  %v1278_v57 = vmul.f32 1.442695, %v1227_v12 }
 0x2fc   : > { %v1228_v58 = vsub.f32 %v3404_v38, %v1192_v46  ;;  %v1229_v25 = vsub.f32 %v3406_v30, %v1192_v46  ;;  %2638 = vpow2.f32 %v1300_v55  ;;  %v1222_v37 = vsub.f32 %v3392_v15, %v1183_v27 }
 0x2fd   : > { %2640 = vpow2.f32 %v1302_v20  ;;  %v1223_v38 = vsub.f32 %v3394_v21, %v1183_v27  ;;  %v3448_v22 = vpop.eup %2626 }
 0x2fe   : > { %v1280_v6 = vmul.f32 1.442695, %v1228_v58  ;;  %v1282_v31 = vmul.f32 1.442695, %v1229_v25  ;;  %2642 = vpow2.f32 %v1284_v0  ;;  %v1268_v10 = vmul.f32 1.442695, %v1222_v37 }
 0x2ff   : > { %v1186_v33 = vpop.xlane.xlu0 %1185  ;;  %2644 = vpow2.f32 %v1286_v4  ;;  %v1177_v45 = vpop.xlane.xlu1 %1176 }
 0x300   : > { %v1224_v5 = vsub.f32 %v3396_v62, %v1186_v33  ;;  %v1225_v35 = vsub.f32 %v3398_v17, %v1186_v33  ;;  %2646 = vpow2.f32 %v1280_v6  ;;  %v1218_v1 = vsub.f32 %v3384_v50, %v1177_v45  ;;  %v3452_v17 = vpop.eup %2628 }
 0x301   : > { %2648 = vpow2.f32 %v1282_v31  ;;  %v1270_v62 = vmul.f32 1.442695, %v1223_v38  ;;  %v1219_v21 = vsub.f32 %v3386_v32, %v1177_v45  ;;  %v1340_v31 = vadd.f32 %v3452_v17, %v3448_v22 }
 0x302   : > { %v1272_v30 = vmul.f32 1.442695, %v1224_v5  ;;  %v1274_v43 = vmul.f32 1.442695, %v1225_v35  ;;  %2650 = vpow2.f32 %v1276_v9 }
 0x303   : > { %v1180_v39 = vpop.xlane.xlu0 %1179  ;;  %2652 = vpow2.f32 %v1278_v57  ;;  %v1171_v24 = vpop.xlane.xlu1 %1170 }
 0x304   : > { %v1220_v15 = vsub.f32 %v3388_v28, %v1180_v39  ;;  %v1221_v23 = vsub.f32 %v3390_v13, %v1180_v39  ;;  %2654 = vpow2.f32 %v1272_v30  ;;  %v1260_v28 = vmul.f32 1.442695, %v1218_v1 }
 0x305   : > { %v3454_v36 = vpop.eup %2630  ;;  %2656 = vpow2.f32 %v1274_v43  ;;  %v1262_v13 = vmul.f32 1.442695, %v1219_v21  ;;  %v1214_v46 = vsub.f32 %v3376_v54, %v1171_v24  ;;  %v1215_v58 = vsub.f32 %v3378_v59, %v1171_v24 }
 0x306   : > { %v1264_v56 = vmul.f32 1.442695, %v1220_v15  ;;  %v1266_v8 = vmul.f32 1.442695, %v1221_v23  ;;  %v3456_v7 = vpop.eup %2632  ;;  %2658 = vpow2.f32 %v1268_v10 }
 0x307   : > { %v1174_v50 = vpop.xlane.xlu0 %1173  ;;  %v3459_v55 = vpop.eup %2634  ;;  %2660 = vpow2.f32 %v1270_v62  ;;  %v1346_v20 = vadd.f32 %v3456_v7, %v3454_v36  ;;  %v1252_v9 = vmul.f32 1.442695, %v1214_v46 }
 0x308   : > { %v1216_v16 = vsub.f32 %v3380_v60, %v1174_v50  ;;  %v1217_v32 = vsub.f32 %v3382_v63, %v1174_v50  ;;  %v3464_v27 = vpop.eup %2636  ;;  %2662 = vpow2.f32 %v1264_v56  ;;  %v1165_v54 = vpop.xlane.xlu1 %1164 }
 0x309   : > { %v3467_v61 = vpop.eup %2638  ;;  %2664 = vpow2.f32 %v1266_v8  ;;  %1347 = vadd.xlane.f32.xlu0 %v1346_v20  ;;  %v1210_v45 = vsub.f32 %v3368_v41, %v1165_v54  ;;  %v1211_v39 = vsub.f32 %v3370_v47, %v1165_v54  ;;  %v1343_v10 = vadd.f32 %v3464_v27, %v3459_v55 }
 0x30a   : > { %v1256_v0 = vmul.f32 1.442695, %v1216_v16  ;;  %v1258_v60 = vmul.f32 1.442695, %v1217_v32  ;;  %v3470_v12 = vpop.eup %2640  ;;  %2666 = vpow2.f32 %v1260_v28 }
 0x30b   : > { %v1168_v4 = vpop.xlane.xlu0 %1167  ;;  %v3474_v6 = vpop.eup %2642  ;;  %2668 = vpow2.f32 %v1262_v13  ;;  %v1349_v59 = vadd.f32 %v3470_v12, %v3467_v61  ;;  %v1246_v23 = vmul.f32 1.442695, %v1211_v39  ;;  %v4109_v39 = vpack.c.bf16 %v3219_v52, %v3216_v51  ;;  %v4116_v52 = vld [vmem:[#allocation20_spill] sm:$0xff] }
 0x30c   : > { %v1212_v63 = vsub.f32 %v3372_v48, %v1168_v4  ;;  %v1213_v25 = vsub.f32 %v3374_v53, %v1168_v4  ;;  %v3480_v33 = vpop.eup %2644  ;;  %2670 = vpow2.f32 %v1256_v0  ;;  %v1254_v48 = vmul.f32 1.442695, %v1215_v58 }
 0x30d   : > { %v3482_v57 = vpop.eup %2646  ;;  %2672 = vpow2.f32 %v1258_v60  ;;  %1341 = vadd.xlane.f32.xlu0 %v1340_v31  ;;  %1350 = vadd.xlane.f32.xlu1 %v1349_v59  ;;  %v1337_v56 = vadd.f32 %v3480_v33, %v3474_v6 }
 0x30e   : > { %v1248_v37 = vmul.f32 1.442695, %v1212_v63  ;;  %v1250_v5 = vmul.f32 1.442695, %v1213_v25  ;;  %v3484_v38 = vpop.eup %2648 }
 0x30f   : > { %v1162_v53 = vpop.xlane.xlu0 %1161  ;;  %v3489_v43 = vpop.eup %2650  ;;  %v1334_v1 = vadd.f32 %v3484_v38, %v3482_v57 }
 0x310   : > { %2674 = vpow2.f32 %v1248_v37  ;;  %v1208_v35 = vsub.f32 %v3364_v3, %v1162_v53  ;;  %v1209_v30 = vsub.f32 %v3366_v34, %v1162_v53  ;;  %v3496_v15 = vpop.eup %2652  ;;  %v1244_v34 = vmul.f32 1.442695, %v1210_v45 }
 0x311   : > { %2676 = vpow2.f32 %v1250_v5  ;;  %v3498_v21 = vpop.eup %2654  ;;  %1344 = vadd.xlane.f32.xlu1 %v1343_v10  ;;  %1335 = vadd.xlane.f32.xlu0 %v1334_v1  ;;  %v1331_v13 = vadd.f32 %v3496_v15, %v3489_v43  ;;  %v4110_v10 = vpack.c.bf16 %v3296_v26, %v3292_v2  ;;  %v4111_v1 = vpack.c.bf16 %v3206_v44, %v3203_v19  ;;  %v4119_v2 = vld [vmem:[#allocation33_spill] sm:$0xff]  ;;  %v4122_v44 = vld [vmem:[#allocation34_spill] sm:$0xff] }
 0x312   : > { %2678 = vpow2.f32 %v1252_v9  ;;  %v1240_v41 = vmul.f32 1.442695, %v1208_v35  ;;  %v1242_v62 = vmul.f32 1.442695, %v1209_v30  ;;  %v3500_v3 = vpop.eup %2656  ;;  %v4108_v30 = vpack.c.bf16 %v3306_v42, %v3303_v49  ;;  %v4114_v42 = vld [vmem:[#allocation29_spill] sm:$0xff] }
 0x313   : > { %2680 = vpow2.f32 %v1254_v48  ;;  %v3502_v47 = vpop.eup %2658  ;;  %v1328_v24 = vadd.f32 %v3500_v3, %v3498_v21  ;;  %v4113_v49 = vpack.c.bf16 %v3238_v18, %v3230_v11  ;;  %v4115_v51 = vpack.c.bf16 %v3317_v14, %v4114_v42  ;;  %v4125_v11 = vld [vmem:[#allocation24_spill] sm:$0xff]  ;;  %v4126_v18 = vld [vmem:[#allocation22_spill] sm:$0xff] }
 0x314   : > { %2682 = vpow2.f32 %v1240_v41  ;;  %v3508_v8 = vpop.eup %2660  ;;  %v4112_v41 = vpack.c.bf16 %v3322_v40, %v3314_v29  ;;  %v4124_v40 = vld [vmem:[#allocation37_spill] sm:$0xff]  ;;  %v4128_v14 = vld [vmem:[#allocation32_spill] sm:$0xff] }
 0x315   : > { %2684 = vpow2.f32 %v1242_v62  ;;  %v3510_v50 = vpop.eup %2662  ;;  %1338 = vadd.xlane.f32.xlu1 %v1337_v56  ;;  %1329 = vadd.xlane.f32.xlu0 %v1328_v24  ;;  %v1325_v60 = vadd.f32 %v3508_v8, %v3502_v47  ;;  %v4117_v62 = vld [vmem:[#allocation19_spill] sm:$0xff]  ;;  %v4127_v24 = vpack.c.bf16 %v4125_v11, %v4126_v18 }
 0x316   : > { %v3512_v28 = vpop.eup %2664  ;;  %2686 = vpow2.f32 %v1244_v34  ;;  %v4118_v26 = vpack.c.bf16 %v4116_v52, %v4117_v62  ;;  %v4120_v34 = vld [vmem:[#allocation31_spill] sm:$0xff] }
 0x317   : > { %v3514_v16 = vpop.eup %2666  ;;  %2688 = vpow2.f32 %v1246_v23  ;;  %v1322_v32 = vadd.f32 %v3512_v28, %v3510_v50  ;;  %v4121_v19 = vpack.c.bf16 %v4119_v2, %v4120_v34  ;;  %v4123_v23 = vld [vmem:[#allocation18_spill] sm:$0xff] }
 0x318   : > { %v3520_v20 = vpop.eup %2668  ;;  %v858_v29 = vadd.f32 %v4123_v23, %v4122_v44  ;;  %v861_v56 = vadd.f32 %v4123_v23, %v4124_v40 }
 0x319   : > { %v3522_v46 = vpop.eup %2670  ;;  %1332 = vadd.xlane.f32.xlu1 %v1331_v13  ;;  %1323 = vadd.xlane.f32.xlu0 %v1322_v32  ;;  %v1319_v9 = vadd.f32 %v3520_v20, %v3514_v16  ;;  %v4129_v13 = vld [vmem:[#allocation30_spill] sm:$0xff] }
 0x31a   : > { %v3524_v0 = vpop.eup %2672  ;;  %v4130_v32 = vpack.c.bf16 %v4128_v14, %v4129_v13 }
 0x31b   : > { %v1316_v4 = vadd.f32 %v3524_v0, %v3522_v46 }
 0x31d   : > { %v3526_v58 = vpop.eup %2674  ;;  %1326 = vadd.xlane.f32.xlu1 %v1325_v60  ;;  %1317 = vadd.xlane.f32.xlu0 %v1316_v4  ;;  %v886_v60 = vpack.c.bf16 %v861_v56, %v858_v29  ;;  %v4131_v4 = vld [vmem:[#allocation23_spill] sm:$0xff] }
 0x31e   : > { %v3532_v63 = vpop.eup %2676 }
 0x31f   : > { %v3534_v25 = vpop.eup %2678  ;;  %v1310_v54 = vadd.f32 %v3532_v63, %v3526_v58 }
 0x320   : > { %v3538_v31 = vpop.eup %2680 }
 0x321   : > { %v3540_v59 = vpop.eup %2682  ;;  %1320 = vadd.xlane.f32.xlu1 %v1319_v9  ;;  %1311 = vadd.xlane.f32.xlu0 %v1310_v54  ;;  %v1313_v53 = vadd.f32 %v3538_v31, %v3534_v25  ;;  %v4132_v54 = vld [vmem:[#allocation21_spill] sm:$0xff] }
 0x322   : > { %v3544_v37 = vpop.eup %2684  ;;  %v4133_v9 = vpack.c.bf16 %v4131_v4, %v4132_v54 }
 0x323   : > { %v1304_v5 = vadd.f32 %v3544_v37, %v3540_v59  ;;  %v3548_v48 = vpop.eup %2686 }
 0x324   : > { %v3552_v45 = vpop.eup %2688 }
 0x325   : > { %1314 = vadd.xlane.f32.xlu1 %v1313_v53  ;;  %1305 = vadd.xlane.f32.xlu0 %v1304_v5  ;;  %v1307_v35 = vadd.f32 %v3552_v45, %v3548_v48  ;;  %v4134_v5 = vld [vmem:[#allocation28_spill] sm:$0xff]  ;;  %v4135_v53 = vld [vmem:[#allocation26_spill] sm:$0xff] }
 0x329   : > { %1308 = vadd.xlane.f32.xlu1 %v1307_v35  ;;  %v4136_v35 = vpack.c.bf16 %v4134_v5, %v4135_v53 }
 0x352   : > { %1448 = vxpose.xlu0.c.b16.start [1/8] %v4108_v30, 128  ;;  %v4137_v30 = vld [vmem:[#allocation36_spill] sm:$0xff] }
 0x356   : > { %1432 = vxpose.xlu1.c.b16.start [1/8] %v4109_v39, 128  ;;  %1449 = vxpose.xlu0.c.b16.cont [2/8] %v4110_v10, 128  ;;  %v4138_v39 = vld [vmem:[#allocation35_spill] sm:$0xff] }
 0x357   : > { %v4139_v10 = vpack.c.bf16 %v4137_v30, %v4138_v39 }
 0x35a   : > { %1433 = vxpose.xlu1.c.b16.cont [2/8] %v4111_v1, 128  ;;  %1450 = vxpose.xlu0.c.b16.cont [3/8] %v4112_v41, 128  ;;  %v4140_v1 = vld [vmem:[#allocation27_spill] sm:$0xff]  ;;  %v4141_v41 = vld [vmem:[#allocation25_spill] sm:$0xff] }
 0x35e   : > { %1434 = vxpose.xlu1.c.b16.cont [3/8] %v4113_v49, 128  ;;  %1451 = vxpose.xlu0.c.b16.cont [4/8] %v4115_v51, 128  ;;  %v4142_v49 = vpack.c.bf16 %v4140_v1, %v4141_v41 }
 0x362   : > { %1435 = vxpose.xlu1.c.b16.cont [4/8] %v4118_v26, 128  ;;  %1452 = vxpose.xlu0.c.b16.cont [5/8] %v4121_v19, 128 }
 0x366   : > { %1436 = vxpose.xlu1.c.b16.cont [5/8] %v4127_v24, 128  ;;  %1453 = vxpose.xlu0.c.b16.cont [6/8] %v4130_v32, 128 }
 0x36a   : > { %1437 = vxpose.xlu1.c.b16.cont [6/8] %v4133_v9, 128  ;;  %1454 = vxpose.xlu0.c.b16.cont [7/8] %v886_v60, 128 }
 0x36e   : > { %1438 = vxpose.xlu1.c.b16.cont [7/8] %v4136_v35, 128  ;;  %1455 = vxpose.xlu0.c.b16.end [8/8] %v4139_v10, 128 }
 0x372   : > { %1439 = vxpose.xlu1.c.b16.end [8/8] %v4142_v49, 128 }
 0x392   : > { %v1348_v42 = vpop.xlane.xlu0 %1347 }
 0x393   : > { %2690 = vrcp.f32 %v1348_v42 }
 0x396   : > { %v1351_v51 = vpop.xlane.xlu1 %1350  ;;  %v1342_v52 = vpop.xlane.xlu0 %1341 }
 0x397   : > { %2692 = vrcp.f32 %v1351_v51 }
 0x398   : > { %2694 = vrcp.f32 %v1342_v52 }
 0x39a   : > { %v1345_v62 = vpop.xlane.xlu1 %1344  ;;  %v1336_v26 = vpop.xlane.xlu0 %1335 }
 0x39b   : > { %2696 = vrcp.f32 %v1345_v62 }
 0x39c   : > { %2698 = vrcp.f32 %v1336_v26 }
 0x39e   : > { %v1339_v2 = vpop.xlane.xlu1 %1338  ;;  %v1330_v34 = vpop.xlane.xlu0 %1329 }
 0x39f   : > { %2700 = vrcp.f32 %v1339_v2 }
 0x3a0   : > { %v2691_v19 = vpop.eup %2690 }
 0x3a1   : > { %v1397_v40 = vmul.f32 %v2691_v19, %v3456_v7  ;;  %v1396_v11 = vmul.f32 %v2691_v19, %v3454_v36 }
 0x3a2   : > { %v1333_v44 = vpop.xlane.xlu1 %1332  ;;  %v1324_v23 = vpop.xlane.xlu0 %1323 }
 0x3a3   : > { %2702 = vrcp.f32 %v1333_v44 }
 0x3a4   : > { %v2693_v29 = vpop.eup %2692  ;;  %2704 = vrcp.f32 %v1330_v34 }
 0x3a5   : > { %v1399_v56 = vmul.f32 %v2693_v29, %v3470_v12  ;;  %v1398_v18 = vmul.f32 %v2693_v29, %v3467_v61  ;;  %v2695_v24 = vpop.eup %2694 }
 0x3a6   : > { %v1318_v14 = vpop.xlane.xlu0 %1317  ;;  %v1393_v4 = vmul.f32 %v2695_v24, %v3452_v17  ;;  %v1327_v9 = vpop.xlane.xlu1 %1326  ;;  %v1392_v35 = vmul.f32 %v2695_v24, %v3448_v22 }
 0x3a7   : > { %v1415_v13 = vpack.c.bf16 %v1399_v56, %v1397_v40  ;;  %v1414_v32 = vpack.c.bf16 %v1398_v18, %v1396_v11  ;;  %2706 = vrcp.f32 %v1327_v9 }
 0x3a8   : > { %v2697_v60 = vpop.eup %2696  ;;  %2708 = vrcp.f32 %v1324_v23 }
 0x3a9   : > { %1464 = vmatprep.subr.bf16.mxu0 %v1415_v13  ;;  %v1395_v54 = vmul.f32 %v2697_v60, %v3464_v27  ;;  %v2699_v5 = vpop.eup %2698  ;;  %v1394_v36 = vmul.f32 %v2697_v60, %v3459_v55 }
 0x3aa   : > { %1465 = vmatpush1.bf16.xpose.msra.mxu0 %v1414_v32  ;;  %v1312_v7 = vpop.xlane.xlu0 %1311  ;;  %v1389_v30 = vmul.f32 %v2699_v5, %v3484_v38  ;;  %v1321_v1 = vpop.xlane.xlu1 %1320  ;;  %v1388_v22 = vmul.f32 %v2699_v5, %v3482_v57 }
 0x3ab   : > { %v1413_v12 = vpack.c.bf16 %v1395_v54, %v1393_v4  ;;  %v1412_v39 = vpack.c.bf16 %v1394_v36, %v1392_v35  ;;  %2710 = vrcp.f32 %v1321_v1  ;;  %v4149_v35 = vld [vmem:[#allocation14_spill] sm:$0xff] }
 0x3ac   : > { %v2701_v53 = vpop.eup %2700  ;;  %2712 = vrcp.f32 %v1318_v14 }
 0x3ad   : > { %1466 = vmatprep.subr.bf16.mxu0 %v1413_v12  ;;  %v1391_v61 = vmul.f32 %v2701_v53, %v3480_v33  ;;  %v1390_v49 = vmul.f32 %v2701_v53, %v3474_v6  ;;  %v4147_v12 = vld [vmem:[#allocation12_spill] sm:$0xff] }
 0x3ae   : > { %v1306_v17 = vpop.xlane.xlu0 %1305  ;;  %v1315_v62 = vpop.xlane.xlu1 %1314 }
 0x3af   : > { %v1411_v27 = vpack.c.bf16 %v1391_v61, %v1389_v30  ;;  %v1410_v38 = vpack.c.bf16 %v1390_v49, %v1388_v22  ;;  %2714 = vrcp.f32 %v1315_v62  ;;  %v4148_v61 = vld [vmem:[#allocation13_spill] sm:$0xff] }
 0x3b0   : > { %v2703_v10 = vpop.eup %2702  ;;  %2716 = vrcp.f32 %v1312_v7  ;;  %v4143_v7 = vld [vmem:[#allocation8_spill] sm:$0xff]  ;;  %v4153_v49 = vld [vmem:[#allocation17_spill] sm:$0xff] }
 0x3b1   : > { %v2705_v41 = vpop.eup %2704  ;;  %v1387_v42 = vmul.f32 %v2703_v10, %v3496_v15  ;;  %v1386_v6 = vmul.f32 %v2703_v10, %v3489_v43 }
 0x3b2   : > { %1467 = vmatpush1.bf16.xpose.msra.mxu0 %v1412_v39  ;;  %v1385_v33 = vmul.f32 %v2705_v41, %v3500_v3  ;;  %v1384_v15 = vmul.f32 %v2705_v41, %v3498_v21  ;;  %v1309_v44 = vpop.xlane.xlu1 %1308  ;;  %v4150_v39 = vld [vmem:[#allocation15_spill] sm:$0xff]  ;;  %v4152_v41 = vld [vmem:[#allocation4_spill] sm:$0xff] }
 0x3b3   : > { %1468 = vmatprep.subr.bf16.mxu0 %v1411_v27  ;;  %2718 = vrcp.f32 %v1309_v44  ;;  %v4151_v27 = vld [vmem:[#allocation16_spill] sm:$0xff] }
 0x3b4   : > { %v1456_v55 = vpop.trf.xlu0  ;;  %v1409_v51 = vpack.c.bf16 %v1387_v42, %v1385_v33  ;;  %v2707_v52 = vpop.eup %2706  ;;  %v1408_v34 = vpack.c.bf16 %v1386_v6, %v1384_v15  ;;  %2720 = vrcp.f32 %v1306_v17 }
 0x3b5   : > { %1496 = vmatprep.mubr.bf16.mxu0 %v1456_v55  ;;  %2099 = vmatprep.mubr.bf16.mxu1 %v1456_v55  ;;  %v2709_v26 = vpop.eup %2708  ;;  %v1383_v2 = vmul.f32 %v2707_v52, %v3508_v8  ;;  %v1382_v29 = vmul.f32 %v2707_v52, %v3502_v47  ;;  %v2580_v55 = vpop.f32.mrf.mxu1 }
 0x3b6   : > { %v1381_v57 = vmul.f32 %v2709_v26, %v3512_v28  ;;  %v1380_v40 = vmul.f32 %v2709_v26, %v3510_v50 }
 0x3b7   : > { %v1611_v33 = vpop.f32.mrf.mxu1 }
 0x3b8   : > { %v1407_v19 = vpack.c.bf16 %v1383_v2, %v1381_v57  ;;  %v2711_v3 = vpop.eup %2710  ;;  %v1406_v8 = vpack.c.bf16 %v1382_v29, %v1380_v40  ;;  %v3638_v5 = vpop.trf.xlu1  ;;  %v2818_v2 = vld [vmem:[%s4030_s3] ss:$0 sm:$0xff] }
 0x3b9   : > { %v2713_v23 = vpop.eup %2712  ;;  %v1379_v43 = vmul.f32 %v2711_v3, %v3520_v20  ;;  %v1378_v18 = vmul.f32 %v2711_v3, %v3514_v16  ;;  %v2581_v52 = vpop.f32.mrf.mxu1  ;;  %v1612_v15 = vadd.f32 %v2818_v2, %v1611_v33  ;;  %v4156_v57 = vld [vmem:[#allocation2_spill] sm:$0xff]  ;;  %v1417_v33 = vld [vmem:[%s3705_s30 + $0x10] sm:$0xff] }
 0x3ba   : > { %1469 = vmatpush1.bf16.xpose.msra.mxu0 %v1410_v38  ;;  %v1377_v21 = vmul.f32 %v2713_v23, %v3524_v0  ;;  %v1376_v47 = vmul.f32 %v2713_v23, %v3522_v46  ;;  %v4154_v38 = vld [vmem:[#allocation5_spill] sm:$0xff] }
 0x3bb   : > { %1470 = vmatprep.subr.bf16.mxu0 %v1409_v51  ;;  %v4155_v51 = vld [vmem:[#allocation6_spill] sm:$0xff]  ;;  %v1614_v26 = vpop.f32.mrf.mxu1 }
 0x3bc   : > { %v1405_v56 = vpack.c.bf16 %v1379_v43, %v1377_v21  ;;  %v2715_v28 = vpop.eup %2714  ;;  %v1404_v20 = vpack.c.bf16 %v1378_v18, %v1376_v47  ;;  %v4159_v43 = vld [vmem:[#allocation3_spill] sm:$0xff]  ;;  %v1620_v21 = vadd.f32 %v2818_v2, %v2580_v55 }
 0x3bd   : > { %v2717_v11 = vpop.eup %2716  ;;  %v1375_v24 = vmul.f32 %v2715_v28, %v3538_v31  ;;  %v1374_v32 = vmul.f32 %v2715_v28, %v3534_v25  ;;  %v3640_v25 = vpop.trf.xlu0 }
 0x3be   : > { %v1373_v14 = vmul.f32 %v2717_v11, %v3532_v63  ;;  %v1372_v4 = vmul.f32 %v2717_v11, %v3526_v58  ;;  %v4144_v58 = vld [vmem:[#allocation9_spill] sm:$0xff]  ;;  %v2584_v3 = vpop.f32.mrf.mxu1 }
 0x3c0   : > { %v1403_v13 = vpack.c.bf16 %v1375_v24, %v1373_v14  ;;  %v2719_v50 = vpop.eup %2718  ;;  %v1402_v54 = vpack.c.bf16 %v1374_v32, %v1372_v4  ;;  %v1627_v29 = vpop.f32.mrf.mxu1 }
 0x3c1   : > { %v2721_v0 = vpop.eup %2720  ;;  %v1371_v60 = vmul.f32 %v2719_v50, %v3552_v45  ;;  %v1370_v46 = vmul.f32 %v2719_v50, %v3548_v48  ;;  %v3646_v45 = vpop.trf.xlu1  ;;  %v1628_v11 = vadd.f32 %v2818_v2, %v1627_v29  ;;  %v1420_v29 = vld [vmem:[%s3705_s30 + $0x40] sm:$0xff] }
 0x3c2   : > { %1471 = vmatpush1.bf16.xpose.msra.mxu0 %v1408_v34  ;;  %v1369_v16 = vmul.f32 %v2721_v0, %v3544_v37  ;;  %v1368_v63 = vmul.f32 %v2721_v0, %v3540_v59  ;;  %v4145_v37 = vld [vmem:[#allocation10_spill] sm:$0xff]  ;;  %v3648_v48 = vpop.trf.xlu0  ;;  %v4146_v59 = vld [vmem:[#allocation11_spill] sm:$0xff]  ;;  %v1615_v34 = vadd.f32 %v2818_v2, %v1614_v26  ;;  %v2585_v40 = vpop.f32.mrf.mxu1 }
 0x3c3   : > { %1472 = vmatprep.subr.bf16.mxu0 %v1407_v19  ;;  %v4157_v19 = vld [vmem:[#allocation7_spill] sm:$0xff]  ;;  %v1639_v50 = vadd.f32 %v2818_v2, %v2585_v40  ;;  %v1418_v26 = vld [vmem:[%s3705_s30 + $0x20] sm:$0xff] }
 0x3c4   : > { %v1401_v31 = vpack.c.bf16 %v1371_v60, %v1369_v16  ;;  %v1400_v9 = vpack.c.bf16 %v1370_v46, %v1368_v63  ;;  %v1674_v44 = vpack.c.bf16 %v1615_v34, %v1612_v15  ;;  %v1419_v34 = vld [vmem:[%s3705_s30 + $0x30] sm:$0xff] }
 0x3c5   : > { %v3654_v53 = vpop.trf.xlu1 }
 0x3c6   : > { %v3656_v36 = vpop.trf.xlu0 }
 0x3c9   : > { %v3662_v30 = vpop.trf.xlu1 }
 0x3ca   : > { %1473 = vmatpush1.bf16.xpose.msra.mxu0 %v1406_v8  ;;  %v3664_v17 = vpop.trf.xlu0  ;;  %v1623_v8 = vadd.f32 %v2818_v2, %v2581_v52 }
 0x3cb   : > { %1474 = vmatprep.subr.bf16.mxu0 %v1405_v56  ;;  %v1630_v56 = vpop.f32.mrf.mxu1 }
 0x3cc   : > { %v1675_v28 = vpack.c.bf16 %v1623_v8, %v1620_v21  ;;  %v1631_v18 = vadd.f32 %v2818_v2, %v1630_v56  ;;  %v1421_v8 = vld [vmem:[%s3705_s30 + $0x50] sm:$0xff] }
 0x3cd   : > { %v3670_v10 = vpop.trf.xlu1  ;;  %v2588_v24 = vpop.f32.mrf.mxu1 }
 0x3ce   : > { %v3672_v1 = vpop.trf.xlu0  ;;  %v1676_v47 = vpack.c.bf16 %v1631_v18, %v1628_v11  ;;  %v1652_v63 = vadd.f32 %v2818_v2, %v2588_v24  ;;  %v1422_v18 = vld [vmem:[%s3705_s30 + $0x60] sm:$0xff] }
 0x3cf   : > { %v1643_v14 = vpop.f32.mrf.mxu1 }
 0x3d0   : > { %v1644_v60 = vadd.f32 %v2818_v2, %v1643_v14 }
 0x3d1   : > { %v3678_v42 = vpop.trf.xlu1 }
 0x3d2   : > { %1475 = vmatpush1.bf16.xpose.msra.mxu0 %v1404_v20  ;;  %v3680_v22 = vpop.trf.xlu0  ;;  %v2589_v20 = vpop.f32.mrf.mxu1 }
 0x3d3   : > { %1476 = vmatprep.subr.bf16.mxu0 %v1403_v13  ;;  %v1636_v13 = vadd.f32 %v2818_v2, %v2584_v3 }
 0x3d4   : > { %v1646_v0 = vpop.f32.mrf.mxu1 }
 0x3d5   : > { %v3686_v62 = vpop.trf.xlu1  ;;  %v1677_v32 = vpack.c.bf16 %v1639_v50, %v1636_v13  ;;  %v1647_v4 = vadd.f32 %v2818_v2, %v1646_v0 }
 0x3d6   : > { %v3688_v6 = vpop.trf.xlu0  ;;  %v2592_v16 = vpop.f32.mrf.mxu1 }
 0x3d9   : > { %v3697_v23 = vpop.trf.xlu1 }
 0x3da   : > { %1477 = vmatpush1.bf16.xpose.msra.mxu0 %v1402_v54  ;;  %4158 = vst [vmem:[#allocation29_spill] sm:$0xff] %v3697_v23  ;;  %v1678_v54 = vpack.c.bf16 %v1647_v4, %v1644_v60 }
 0x3db   : > { %1478 = vmatprep.subr.bf16.mxu0 %v1401_v31  ;;  %v1659_v31 = vpop.f32.mrf.mxu1 }
 0x3dd   : > { %v2593_v46 = vpop.f32.mrf.mxu1 }
 0x3e2   : > { %1479 = vmatpush1.bf16.xpose.msra.mxu0 %v1400_v9  ;;  %v1655_v9 = vadd.f32 %v2818_v2, %v2589_v20  ;;  %v1423_v20 = vld [vmem:[%s3705_s30 + $0x70] sm:$0xff] }
 0x3e3   : > { %2402 = vmatprep.subr.bf16.mxu0 %v4143_v7  ;;  %v1662_v7 = vpop.f32.mrf.mxu1 }
 0x3e9   : > { %1497 = vmatmul.mubr.bf16.vlgmr.msra.gmra.mxu0 %v3638_v5 }
 0x3ea   : > { %2403 = vmatpush3.bf16.xpose.msra.mxu0 %v4144_v58  ;;  %1504 = vmatprep.mubr.bf16.mxu0 %v3640_v25  ;;  %v1679_v58 = vpack.c.bf16 %v1655_v9, %v1652_v63  ;;  %v1426_v9 = vld [vmem:[%s3705_s30 + $0xa0] sm:$0xff] }
 0x3eb   : > { %2404 = vmatprep.subr.bf16.mxu0 %v4145_v37  ;;  %v1660_v37 = vadd.f32 %v2818_v2, %v1659_v31 }
 0x3f1   : > { %1505 = vmatmul.mubr.bf16.gmra.mxu0 %v3646_v45 }
 0x3f2   : > { %2405 = vmatpush3.bf16.xpose.msra.mxu0 %v4146_v59  ;;  %1512 = vmatprep.mubr.bf16.mxu0 %v3648_v48  ;;  %v1663_v59 = vadd.f32 %v2818_v2, %v1662_v7 }
 0x3f3   : > { %2406 = vmatprep.subr.bf16.mxu0 %v4147_v12 }
 0x3f4   : > { %v1680_v12 = vpack.c.bf16 %v1663_v59, %v1660_v37  ;;  %v1427_v59 = vld [vmem:[%s3705_s30 + $0xb0] sm:$0xff] }
 0x3f9   : > { %1513 = vmatmul.mubr.bf16.gmra.mxu0 %v3654_v53 }
 0x3fa   : > { %2407 = vmatpush3.bf16.xpose.msra.mxu0 %v4148_v61  ;;  %1520 = vmatprep.mubr.bf16.mxu0 %v3656_v36  ;;  %v1668_v61 = vadd.f32 %v2818_v2, %v2592_v16 }
 0x3fb   : > { %2408 = vmatprep.subr.bf16.mxu0 %v4149_v35  ;;  %v1671_v35 = vadd.f32 %v2818_v2, %v2593_v46 }
 0x401   : > { %1521 = vmatmul.mubr.bf16.gmra.mxu0 %v3662_v30 }
 0x402   : > { %2409 = vmatpush3.bf16.xpose.msra.mxu0 %v4150_v39  ;;  %1528 = vmatprep.mubr.bf16.mxu0 %v3664_v17  ;;  %v1681_v39 = vpack.c.bf16 %v1671_v35, %v1668_v61 }
 0x403   : > { %2410 = vmatprep.subr.bf16.mxu0 %v4151_v27  ;;  %v1416_v27 = vld [vmem:[%s3705_s30] sm:$0xff] }
 0x409   : > { %1529 = vmatmul.mubr.bf16.gmra.mxu0 %v3670_v10 }
 0x40a   : > { %2411 = vmatpush3.bf16.xpose.msra.mxu0 %v4152_v41  ;;  %1536 = vmatprep.mubr.bf16.mxu0 %v3672_v1 }
 0x40b   : > { %2412 = vmatprep.subr.bf16.mxu0 %v4153_v49 }
 0x411   : > { %1537 = vmatmul.mubr.bf16.gmra.mxu0 %v3678_v42 }
 0x412   : > { %2413 = vmatpush3.bf16.xpose.msra.mxu0 %v4154_v38  ;;  %1544 = vmatprep.mubr.bf16.mxu0 %v3680_v22 }
 0x413   : > { %2414 = vmatprep.subr.bf16.mxu0 %v4155_v51 }
 0x419   : > { %1545 = vmatmul.mubr.bf16.gmra.mxu0 %v3686_v62 }
 0x41a   : > { %2415 = vmatpush3.bf16.xpose.msra.mxu0 %v4156_v57  ;;  %1552 = vmatprep.mubr.bf16.mxu0 %v3688_v6 }
 0x41b   : > { %2416 = vmatprep.subr.bf16.mxu0 %v4157_v19 }
 0x421   : > { %1553 = vmatmul.mubr.bf16.gmra.mxu0 %v3697_v23 }
 0x422   : > { %2417 = vmatpush3.bf16.xpose.msra.mxu0 %v4159_v43  ;;  %2418 = vmatprep.mubr.bf16.mxu0 %v1674_v44 }
 0x429   : > { %2419 = vmatmul.mubr.bf16.vlgmr.msra.gmra.mxu0 %v1674_v44 }
 0x42a   : > { %2420 = vmatprep.mubr.bf16.mxu0 %v1675_v28 }
 0x431   : > { %2421 = vmatmul.mubr.bf16.gmra.mxu0 %v1675_v28 }
 0x432   : > { %2422 = vmatprep.mubr.bf16.mxu0 %v1676_v47 }
 0x439   : > { %2423 = vmatmul.mubr.bf16.gmra.mxu0 %v1676_v47 }
 0x43a   : > { %2424 = vmatprep.mubr.bf16.mxu0 %v1677_v32 }
 0x441   : > { %2425 = vmatmul.mubr.bf16.gmra.mxu0 %v1677_v32  ;;  %v1424_v32 = vld [vmem:[%s3705_s30 + $0x80] sm:$0xff] }
 0x442   : > { %2426 = vmatprep.mubr.bf16.mxu0 %v1678_v54 }
 0x449   : > { %2427 = vmatmul.mubr.bf16.gmra.mxu0 %v1678_v54  ;;  %v1425_v54 = vld [vmem:[%s3705_s30 + $0x90] sm:$0xff] }
 0x44a   : > { %2428 = vmatprep.mubr.bf16.mxu0 %v1679_v58 }
 0x451   : > { %2429 = vmatmul.mubr.bf16.gmra.mxu0 %v1679_v58 }
 0x452   : > { %2430 = vmatprep.mubr.bf16.mxu0 %v1680_v12 }
 0x459   : > { %2431 = vmatmul.mubr.bf16.gmra.mxu0 %v1680_v12 }
 0x45a   : > { %2432 = vmatprep.mubr.bf16.mxu0 %v1681_v39 }
 0x461   : > { %2433 = vmatmul.mubr.bf16.gmra.mxu0 %v1681_v39  ;;  %v1428_v39 = vld [vmem:[%s3705_s30 + $0xc0] sm:$0xff] }
 0x4a9   : > { %v1498_v41 = vpop.f32.mrf.mxu0 }
 0x4aa   : > { %v1499_v49 = vadd.f32 %v1498_v41, %v1416_v27 }
 0x4ab   : > { %v1500_v55 = vpop.f32.mrf.mxu0 }
 0x4ac   : > { %1561 = vst [vmem:[%s3712_s11] sm:$0xff] %v1499_v49  ;;  %v1429_v55 = vld [vmem:[%s3705_s30 + $0xd0] sm:$0xff] }
 0x4ad   : > { %v1501_v38 = vpop.f32.mrf.mxu0 }
 0x4ae   : > { %v1502_v51 = vadd.f32 %v1501_v38, %v1417_v33 }
 0x4af   : > { %v1503_v52 = vpop.f32.mrf.mxu0 }
 0x4b0   : > { %1562 = vst [vmem:[%s3712_s11 + $0x10] sm:$0xff] %v1502_v51  ;;  %v1430_v52 = vld [vmem:[%s3705_s30 + $0xe0] sm:$0xff] }
 0x4b1   : > { %v1506_v2 = vpop.f32.mrf.mxu0 }
 0x4b2   : > { %v1507_v15 = vadd.f32 %v1506_v2, %v1418_v26 }
 0x4b3   : > { %v1508_v57 = vpop.f32.mrf.mxu0 }
 0x4b4   : > { %1563 = vst [vmem:[%s3712_s11 + $0x20] sm:$0xff] %v1507_v15  ;;  %v1431_v57 = vld [vmem:[%s3705_s30 + $0xf0] sm:$0xff] }
 0x4b5   : > { %v1509_v19 = vpop.f32.mrf.mxu0 }
 0x4b6   : > { %v1510_v3 = vadd.f32 %v1509_v19, %v1419_v34 }
 0x4b7   : > { %v1511_v44 = vpop.f32.mrf.mxu0 }
 0x4b8   : > { %1564 = vst [vmem:[%s3712_s11 + $0x30] sm:$0xff] %v1510_v3 }
 0x4b9   : > { %v1514_v43 = vpop.f32.mrf.mxu0 }
 0x4ba   : > { %v1515_v40 = vadd.f32 %v1514_v43, %v1420_v29 }
 0x4bb   : > { %v1516_v21 = vpop.f32.mrf.mxu0 }
 0x4bc   : > { %1565 = vst [vmem:[%s3712_s11 + $0x40] sm:$0xff] %v1515_v40 }
 0x4bd   : > { %v1517_v56 = vpop.f32.mrf.mxu0 }
 0x4be   : > { %v1518_v28 = vadd.f32 %v1517_v56, %v1421_v8 }
 0x4bf   : > { %v1519_v11 = vpop.f32.mrf.mxu0 }
 0x4c0   : > { %1566 = vst [vmem:[%s3712_s11 + $0x50] sm:$0xff] %v1518_v28 }
 0x4c1   : > { %v1522_v24 = vpop.f32.mrf.mxu0 }
 0x4c2   : > { %v1523_v47 = vadd.f32 %v1522_v24, %v1422_v18 }
 0x4c3   : > { %v1524_v14 = vpop.f32.mrf.mxu0 }
 0x4c4   : > { %1567 = vst [vmem:[%s3712_s11 + $0x60] sm:$0xff] %v1523_v47 }
 0x4c5   : > { %v1525_v13 = vpop.f32.mrf.mxu0 }
 0x4c6   : > { %v1526_v50 = vadd.f32 %v1525_v13, %v1423_v20 }
 0x4c7   : > { %v1527_v0 = vpop.f32.mrf.mxu0 }
 0x4c8   : > { %1568 = vst [vmem:[%s3712_s11 + $0x70] sm:$0xff] %v1526_v50 }
 0x4c9   : > { %v1530_v60 = vpop.f32.mrf.mxu0 }
 0x4ca   : > { %v1531_v4 = vadd.f32 %v1530_v60, %v1424_v32 }
 0x4cb   : > { %v1532_v16 = vpop.f32.mrf.mxu0 }
 0x4cc   : > { %1569 = vst [vmem:[%s3712_s11 + $0x80] sm:$0xff] %v1531_v4 }
 0x4cd   : > { %v1533_v31 = vpop.f32.mrf.mxu0 }
 0x4ce   : > { %v1534_v46 = vadd.f32 %v1533_v31, %v1425_v54 }
 0x4cf   : > { %v1535_v63 = vpop.f32.mrf.mxu0 }
 0x4d0   : > { %1570 = vst [vmem:[%s3712_s11 + $0x90] sm:$0xff] %v1534_v46 }
 0x4d1   : > { %v1538_v7 = vpop.f32.mrf.mxu0 }
 0x4d2   : > { %v1539_v58 = vadd.f32 %v1538_v7, %v1426_v9 }
 0x4d3   : > { %v1540_v37 = vpop.f32.mrf.mxu0 }
 0x4d4   : > { %1571 = vst [vmem:[%s3712_s11 + $0xa0] sm:$0xff] %v1539_v58 }
 0x4d5   : > { %v1541_v12 = vpop.f32.mrf.mxu0 }
 0x4d6   : > { %v1542_v61 = vadd.f32 %v1541_v12, %v1427_v59 }
 0x4d7   : > { %v1543_v35 = vpop.f32.mrf.mxu0 }
 0x4d8   : > { %1572 = vst [vmem:[%s3712_s11 + $0xb0] sm:$0xff] %v1542_v61 }
 0x4d9   : > { %v1546_v27 = vpop.f32.mrf.mxu0 }
 0x4da   : > { %v1547_v41 = vadd.f32 %v1546_v27, %v1428_v39 }
 0x4db   : > { %v1548_v49 = vpop.f32.mrf.mxu0 }
 0x4dc   : > { %1573 = vst [vmem:[%s3712_s11 + $0xc0] sm:$0xff] %v1547_v41 }
 0x4dd   : > { %v1549_v33 = vpop.f32.mrf.mxu0 }
 0x4de   : > { %v1550_v38 = vadd.f32 %v1549_v33, %v1429_v55 }
 0x4df   : > { %v1551_v51 = vpop.f32.mrf.mxu0 }
 0x4e0   : > { %1574 = vst [vmem:[%s3712_s11 + $0xd0] sm:$0xff] %v1550_v38 }
 0x4e1   : > { %v1554_v26 = vpop.f32.mrf.mxu0 }
 0x4e2   : > { %v1555_v2 = vadd.f32 %v1554_v26, %v1430_v52 }
 0x4e3   : > { %v1556_v15 = vpop.f32.mrf.mxu0 }
 0x4e4   : > { %1575 = vst [vmem:[%s3712_s11 + $0xe0] sm:$0xff] %v1555_v2 }
 0x4e5   : > { %v1557_v34 = vpop.f32.mrf.mxu0 }
 0x4e6   : > { %v1558_v19 = vadd.f32 %v1557_v34, %v1431_v57 }
 0x4e7   : > { %v1559_v3 = vpop.f32.mrf.mxu0 }
 0x4e8   : > { %1576 = vst [vmem:[%s3712_s11 + $0xf0] sm:$0xff] %v1558_v19 }
 0x4e9   : > { %v3745_v44 = vpop.f32.mrf.mxu0 }
 0x4eb   : > { %v3747_v29 = vpop.f32.mrf.mxu0 }
 0x4ec   : > { %v1795_v57 = vmax.f32 %v3745_v44, %v3747_v29 }
 0x4ed   : > { %v3749_v43 = vpop.f32.mrf.mxu0 }
 0x4ef   : > { %v3751_v40 = vpop.f32.mrf.mxu0 }
 0x4f0   : > { %v1798_v19 = vmax.f32 %v3749_v43, %v3751_v40 }
 0x4f1   : > { %v3753_v21 = vpop.f32.mrf.mxu0 }
 0x4f3   : > { %v3755_v8 = vpop.f32.mrf.mxu0 }
 0x4f4   : > { %v1801_v2 = vmax.f32 %v3753_v21, %v3755_v8 }
 0x4f5   : > { %v3757_v56 = vpop.f32.mrf.mxu0 }
 0x4f7   : > { %v3759_v28 = vpop.f32.mrf.mxu0 }
 0x4f8   : > { %v1804_v34 = vmax.f32 %v3757_v56, %v3759_v28 }
 0x4f9   : > { %v3761_v11 = vpop.f32.mrf.mxu0 }
 0x4fb   : > { %v3763_v18 = vpop.f32.mrf.mxu0 }
 0x4fc   : > { %v1807_v52 = vmax.f32 %v3761_v11, %v3763_v18 }
 0x4fd   : > { %v3765_v24 = vpop.f32.mrf.mxu0 }
 0x4ff   : > { %v3767_v47 = vpop.f32.mrf.mxu0 }
 0x500   : > { %v1810_v15 = vmax.f32 %v3765_v24, %v3767_v47 }
 0x501   : > { %v3769_v14 = vpop.f32.mrf.mxu0 }
 0x503   : > { %v3771_v20 = vpop.f32.mrf.mxu0 }
 0x504   : > { %v1813_v38 = vmax.f32 %v3769_v14, %v3771_v20 }
 0x505   : > { %v3773_v13 = vpop.f32.mrf.mxu0 }
 0x507   : > { %v3775_v50 = vpop.f32.mrf.mxu0 }
 0x508   : > { %v1816_v26 = vmax.f32 %v3773_v13, %v3775_v50 }
 0x509   : > { %v3777_v0 = vpop.f32.mrf.mxu0 }
 0x50b   : > { %v3779_v32 = vpop.f32.mrf.mxu0 }
 0x50c   : > { %v1819_v55 = vmax.f32 %v3777_v0, %v3779_v32 }
 0x50d   : > { %v3781_v60 = vpop.f32.mrf.mxu0 }
 0x50f   : > { %v3783_v4 = vpop.f32.mrf.mxu0 }
 0x510   : > { %v1822_v51 = vmax.f32 %v3781_v60, %v3783_v4 }
 0x511   : > { %v3785_v16 = vpop.f32.mrf.mxu0 }
 0x513   : > { %v3787_v54 = vpop.f32.mrf.mxu0 }
 0x514   : > { %v1825_v41 = vmax.f32 %v3785_v16, %v3787_v54 }
 0x515   : > { %v3789_v31 = vpop.f32.mrf.mxu0 }
 0x517   : > { %v3791_v46 = vpop.f32.mrf.mxu0 }
 0x518   : > { %v1828_v33 = vmax.f32 %v3789_v31, %v3791_v46 }
 0x519   : > { %v1776_v63 = vpop.f32.mrf.mxu0 }
 0x51b   : > { %v1778_v9 = vpop.f32.mrf.mxu0 }
 0x51c   : > { %v1831_v27 = vmax.f32 %v1776_v63, %v1778_v9 }
 0x51d   : > { %v3793_v7 = vpop.f32.mrf.mxu0 }
 0x51f   : > { %v3795_v58 = vpop.f32.mrf.mxu0 }
 0x520   : > { %v1834_v49 = vmax.f32 %v3793_v7, %v3795_v58 }
 0x521   : > { %v1786_v37 = vpop.f32.mrf.mxu0 }
 0x523   : > { %v1788_v59 = vpop.f32.mrf.mxu0 }
 0x524   : > { %v1837_v12 = vmax.f32 %v1786_v37, %v1788_v59 }
 0x525   : > { %v1790_v61 = vpop.f32.mrf.mxu0 }
 0x526   : > { %1838 = vmax.xlane.f32.xlu0 %v1837_v12 }
 0x527   : > { %v1792_v35 = vpop.f32.mrf.mxu0 }
 0x528   : > { %v1840_v39 = vmax.f32 %v1790_v61, %v1792_v35 }
 0x52a   : > { %1832 = vmax.xlane.f32.xlu0 %v1831_v27  ;;  %1841 = vmax.xlane.f32.xlu1 %v1840_v39 }
 0x52e   : > { %1826 = vmax.xlane.f32.xlu0 %v1825_v41  ;;  %1835 = vmax.xlane.f32.xlu1 %v1834_v49 }
 0x532   : > { %1820 = vmax.xlane.f32.xlu0 %v1819_v55  ;;  %1829 = vmax.xlane.f32.xlu1 %v1828_v33 }
 0x536   : > { %1814 = vmax.xlane.f32.xlu0 %v1813_v38  ;;  %1823 = vmax.xlane.f32.xlu1 %v1822_v51 }
 0x53a   : > { %1808 = vmax.xlane.f32.xlu0 %v1807_v52  ;;  %1817 = vmax.xlane.f32.xlu1 %v1816_v26 }
 0x53e   : > { %1802 = vmax.xlane.f32.xlu0 %v1801_v2  ;;  %1811 = vmax.xlane.f32.xlu1 %v1810_v15 }
 0x542   : > { %1796 = vmax.xlane.f32.xlu0 %v1795_v57  ;;  %1805 = vmax.xlane.f32.xlu1 %v1804_v34 }
 0x546   : > { %1799 = vmax.xlane.f32.xlu1 %v1798_v19 }
 0x5af   : > { %v1839_v3 = vpop.xlane.xlu0 %1838 }
 0x5b0   : > { %v1871_v12 = vsub.f32 %v1786_v37, %v1839_v3  ;;  %v1872_v39 = vsub.f32 %v1788_v59, %v1839_v3 }
 0x5b2   : > { %v1931_v27 = vmul.f32 1.442695, %v1871_v12  ;;  %v1933_v41 = vmul.f32 1.442695, %v1872_v39 }
 0x5b3   : > { %v1833_v49 = vpop.xlane.xlu0 %1832  ;;  %v1842_v55 = vpop.xlane.xlu1 %1841 }
 0x5b4   : > { %2722 = vpow2.f32 %v1931_v27  ;;  %v1867_v33 = vsub.f32 %v1776_v63, %v1833_v49  ;;  %v1868_v38 = vsub.f32 %v1778_v9, %v1833_v49  ;;  %v1873_v51 = vsub.f32 %v1790_v61, %v1842_v55 }
 0x5b5   : > { %2724 = vpow2.f32 %v1933_v41  ;;  %v1874_v52 = vsub.f32 %v1792_v35, %v1842_v55 }
 0x5b6   : > { %v1923_v26 = vmul.f32 1.442695, %v1867_v33  ;;  %v1925_v2 = vmul.f32 1.442695, %v1868_v38  ;;  %v1935_v15 = vmul.f32 1.442695, %v1873_v51 }
 0x5b7   : > { %v1937_v57 = vmul.f32 1.442695, %v1874_v52  ;;  %v1827_v34 = vpop.xlane.xlu0 %1826  ;;  %v1836_v23 = vpop.xlane.xlu1 %1835 }
 0x5b8   : > { %2726 = vpow2.f32 %v1923_v26  ;;  %v1863_v37 = vsub.f32 %v3785_v16, %v1827_v34  ;;  %v1864_v59 = vsub.f32 %v3787_v54, %v1827_v34  ;;  %v1869_v19 = vsub.f32 %v3793_v7, %v1836_v23 }
 0x5b9   : > { %2728 = vpow2.f32 %v1925_v2  ;;  %v1870_v63 = vsub.f32 %v3795_v58, %v1836_v23 }
 0x5ba   : > { %2730 = vpow2.f32 %v1935_v15  ;;  %v1915_v9 = vmul.f32 1.442695, %v1863_v37  ;;  %v1917_v61 = vmul.f32 1.442695, %v1864_v59  ;;  %v1927_v35 = vmul.f32 1.442695, %v1869_v19 }
 0x5bb   : > { %2732 = vpow2.f32 %v1937_v57  ;;  %v1929_v3 = vmul.f32 1.442695, %v1870_v63  ;;  %v1821_v12 = vpop.xlane.xlu0 %1820  ;;  %v1830_v39 = vpop.xlane.xlu1 %1829 }
 0x5bc   : > { %2734 = vpow2.f32 %v1915_v9  ;;  %v1859_v27 = vsub.f32 %v3777_v0, %v1821_v12  ;;  %v1860_v16 = vsub.f32 %v3779_v32, %v1821_v12  ;;  %v1865_v54 = vsub.f32 %v3789_v31, %v1830_v39 }
 0x5bd   : > { %2736 = vpow2.f32 %v1917_v61  ;;  %v1866_v7 = vsub.f32 %v3791_v46, %v1830_v39 }
 0x5be   : > { %2738 = vpow2.f32 %v1927_v35  ;;  %v1907_v23 = vmul.f32 1.442695, %v1859_v27  ;;  %v1909_v58 = vmul.f32 1.442695, %v1860_v16  ;;  %v1919_v41 = vmul.f32 1.442695, %v1865_v54 }
 0x5bf   : > { %2740 = vpow2.f32 %v1929_v3  ;;  %v1921_v49 = vmul.f32 1.442695, %v1866_v7  ;;  %v1815_v55 = vpop.xlane.xlu0 %1814  ;;  %v1824_v33 = vpop.xlane.xlu1 %1823 }
 0x5c0   : > { %2742 = vpow2.f32 %v1907_v23  ;;  %v1855_v38 = vsub.f32 %v3769_v14, %v1815_v55  ;;  %v1856_v0 = vsub.f32 %v3771_v20, %v1815_v55  ;;  %v1861_v32 = vsub.f32 %v3781_v60, %v1824_v33 }
 0x5c1   : > { %v3834_v51 = vpop.eup %2722  ;;  %2744 = vpow2.f32 %v1909_v58  ;;  %v1862_v31 = vsub.f32 %v3783_v4, %v1824_v33 }
 0x5c2   : > { %v3837_v46 = vpop.eup %2724  ;;  %2746 = vpow2.f32 %v1919_v41  ;;  %v1899_v52 = vmul.f32 1.442695, %v1855_v38  ;;  %v1901_v26 = vmul.f32 1.442695, %v1856_v0  ;;  %v1911_v2 = vmul.f32 1.442695, %v1861_v32 }
 0x5c3   : > { %2748 = vpow2.f32 %v1921_v49  ;;  %v1913_v15 = vmul.f32 1.442695, %v1862_v31  ;;  %v1809_v57 = vpop.xlane.xlu0 %1808  ;;  %v1818_v34 = vpop.xlane.xlu1 %1817  ;;  %v1981_v14 = vadd.f32 %v3837_v46, %v3834_v51 }
 0x5c4   : > { %2750 = vpow2.f32 %v1899_v52  ;;  %v1851_v20 = vsub.f32 %v3761_v11, %v1809_v57  ;;  %v1852_v60 = vsub.f32 %v3763_v18, %v1809_v57  ;;  %v1857_v4 = vsub.f32 %v3773_v13, %v1818_v34 }
 0x5c5   : > { %v3844_v37 = vpop.eup %2726  ;;  %2752 = vpow2.f32 %v1901_v26  ;;  %v1858_v59 = vsub.f32 %v3775_v50, %v1818_v34  ;;  %1982 = vadd.xlane.f32.xlu0 %v1981_v14 }
 0x5c6   : > { %v3847_v19 = vpop.eup %2728  ;;  %2754 = vpow2.f32 %v1911_v2  ;;  %v1891_v63 = vmul.f32 1.442695, %v1851_v20  ;;  %v1893_v9 = vmul.f32 1.442695, %v1852_v60  ;;  %v1903_v61 = vmul.f32 1.442695, %v1857_v4 }
 0x5c7   : > { %v3849_v35 = vpop.eup %2730  ;;  %2756 = vpow2.f32 %v1913_v15  ;;  %v1905_v11 = vmul.f32 1.442695, %v1858_v59  ;;  %v1803_v3 = vpop.xlane.xlu0 %1802  ;;  %v1975_v13 = vadd.f32 %v3847_v19, %v3844_v37 }
 0x5c8   : > { %v1812_v18 = vpop.xlane.xlu1 %1811  ;;  %v3853_v12 = vpop.eup %2732  ;;  %2758 = vpow2.f32 %v1891_v63  ;;  %v1847_v50 = vsub.f32 %v3753_v21, %v1803_v3  ;;  %v1848_v39 = vsub.f32 %v3755_v8, %v1803_v3 }
 0x5c9   : > { %v1853_v27 = vsub.f32 %v3765_v24, %v1812_v18  ;;  %v3858_v16 = vpop.eup %2734  ;;  %2760 = vpow2.f32 %v1893_v9  ;;  %v1854_v54 = vsub.f32 %v3767_v47, %v1812_v18  ;;  %1976 = vadd.xlane.f32.xlu0 %v1975_v13  ;;  %v1984_v7 = vadd.f32 %v3853_v12, %v3849_v35 }
 0x5ca   : > { %v3863_v23 = vpop.eup %2736  ;;  %2762 = vpow2.f32 %v1903_v61  ;;  %v1883_v58 = vmul.f32 1.442695, %v1847_v50  ;;  %v1885_v41 = vmul.f32 1.442695, %v1848_v39 }
 0x5cb   : > { %v1895_v49 = vmul.f32 1.442695, %v1853_v27  ;;  %v3865_v21 = vpop.eup %2738  ;;  %2764 = vpow2.f32 %v1905_v11  ;;  %v1897_v8 = vmul.f32 1.442695, %v1854_v54  ;;  %1985 = vadd.xlane.f32.xlu1 %v1984_v7  ;;  %v1797_v24 = vpop.xlane.xlu0 %1796  ;;  %v1969_v47 = vadd.f32 %v3863_v23, %v3858_v16 }
 0x5cc   : > { %v1806_v55 = vpop.xlane.xlu1 %1805  ;;  %v3869_v33 = vpop.eup %2740  ;;  %2766 = vpow2.f32 %v1883_v58  ;;  %v1843_v38 = vsub.f32 %v3745_v44, %v1797_v24  ;;  %v1844_v0 = vsub.f32 %v3747_v29, %v1797_v24 }
 0x5cd   : > { %v1849_v32 = vsub.f32 %v3757_v56, %v1806_v55  ;;  %v3874_v31 = vpop.eup %2742  ;;  %2768 = vpow2.f32 %v1885_v41  ;;  %v1850_v52 = vsub.f32 %v3759_v28, %v1806_v55  ;;  %1970 = vadd.xlane.f32.xlu0 %v1969_v47  ;;  %v1978_v26 = vadd.f32 %v3869_v33, %v3865_v21 }
 0x5ce   : > { %v3879_v2 = vpop.eup %2744  ;;  %2770 = vpow2.f32 %v1895_v49  ;;  %v1875_v15 = vmul.f32 1.442695, %v1843_v38  ;;  %v1877_v57 = vmul.f32 1.442695, %v1844_v0 }
 0x5cf   : > { %v1887_v34 = vmul.f32 1.442695, %v1849_v32  ;;  %v3881_v44 = vpop.eup %2746  ;;  %2772 = vpow2.f32 %v1897_v8  ;;  %v1889_v29 = vmul.f32 1.442695, %v1850_v52  ;;  %1979 = vadd.xlane.f32.xlu1 %v1978_v26  ;;  %v1963_v14 = vadd.f32 %v3879_v2, %v3874_v31 }
 0x5d0   : > { %v1800_v56 = vpop.xlane.xlu1 %1799  ;;  %v3885_v28 = vpop.eup %2748  ;;  %2774 = vpow2.f32 %v1875_v15 }
 0x5d1   : > { %v1845_v20 = vsub.f32 %v3749_v43, %v1800_v56  ;;  %v1846_v60 = vsub.f32 %v3751_v40, %v1800_v56  ;;  %v3889_v4 = vpop.eup %2750  ;;  %2776 = vpow2.f32 %v1877_v57  ;;  %1964 = vadd.xlane.f32.xlu0 %v1963_v14  ;;  %v1972_v59 = vadd.f32 %v3885_v28, %v3881_v44 }
 0x5d2   : > { %v3893_v63 = vpop.eup %2752  ;;  %2778 = vpow2.f32 %v1887_v34 }
 0x5d3   : > { %v1879_v9 = vmul.f32 1.442695, %v1845_v20  ;;  %v1881_v61 = vmul.f32 1.442695, %v1846_v60  ;;  %v3895_v11 = vpop.eup %2754  ;;  %2780 = vpow2.f32 %v1889_v29  ;;  %1973 = vadd.xlane.f32.xlu1 %v1972_v59  ;;  %v1957_v43 = vadd.f32 %v3893_v63, %v3889_v4 }
 0x5d4   : > { %v3899_v40 = vpop.eup %2756 }
 0x5d5   : > { %2782 = vpow2.f32 %v1879_v9  ;;  %v3901_v3 = vpop.eup %2758  ;;  %1958 = vadd.xlane.f32.xlu0 %v1957_v43  ;;  %v1966_v18 = vadd.f32 %v3899_v40, %v3895_v11 }
 0x5d6   : > { %2784 = vpow2.f32 %v1881_v61  ;;  %v3905_v13 = vpop.eup %2760 }
 0x5d7   : > { %v3907_v50 = vpop.eup %2762  ;;  %1967 = vadd.xlane.f32.xlu1 %v1966_v18  ;;  %v1951_v39 = vadd.f32 %v3905_v13, %v3901_v3 }
 0x5d8   : > { %v3911_v27 = vpop.eup %2764 }
 0x5d9   : > { %v3913_v54 = vpop.eup %2766  ;;  %1952 = vadd.xlane.f32.xlu0 %v1951_v39  ;;  %v1960_v7 = vadd.f32 %v3911_v27, %v3907_v50 }
 0x5da   : > { %v3917_v58 = vpop.eup %2768 }
 0x5db   : > { %v3919_v41 = vpop.eup %2770  ;;  %1961 = vadd.xlane.f32.xlu1 %v1960_v7  ;;  %v1945_v49 = vadd.f32 %v3917_v58, %v3913_v54 }
 0x5dc   : > { %v3923_v8 = vpop.eup %2772 }
 0x5dd   : > { %v3925_v24 = vpop.eup %2774  ;;  %1946 = vadd.xlane.f32.xlu0 %v1945_v49  ;;  %v1954_v55 = vadd.f32 %v3923_v8, %v3919_v41 }
 0x5de   : > { %v3929_v47 = vpop.eup %2776 }
 0x5df   : > { %v3931_v38 = vpop.eup %2778  ;;  %1955 = vadd.xlane.f32.xlu1 %v1954_v55  ;;  %v1939_v0 = vadd.f32 %v3929_v47, %v3925_v24 }
 0x5e0   : > { %v3935_v32 = vpop.eup %2780 }
 0x5e1   : > { %1940 = vadd.xlane.f32.xlu0 %v1939_v0  ;;  %v1948_v26 = vadd.f32 %v3935_v32, %v3931_v38 }
 0x5e2   : > { %v3937_v52 = vpop.eup %2782 }
 0x5e3   : > { %v3941_v15 = vpop.eup %2784  ;;  %1949 = vadd.xlane.f32.xlu1 %v1948_v26 }
 0x5e4   : > { %v1942_v57 = vadd.f32 %v3941_v15, %v3937_v52 }
 0x5e7   : > { %1943 = vadd.xlane.f32.xlu1 %v1942_v57 }
 0x64e   : > { %v1983_v34 = vpop.xlane.xlu0 %1982 }
 0x64f   : > { %2786 = vrcp.f32 %v1983_v34 }
 0x652   : > { %v1977_v29 = vpop.xlane.xlu0 %1976 }
 0x654   : > { %v1986_v56 = vpop.xlane.xlu1 %1985 }
 0x655   : > { %2788 = vrcp.f32 %v1986_v56 }
 0x656   : > { %2790 = vrcp.f32 %v1977_v29  ;;  %v1971_v20 = vpop.xlane.xlu0 %1970 }
 0x658   : > { %v1980_v14 = vpop.xlane.xlu1 %1979 }
 0x659   : > { %2792 = vrcp.f32 %v1980_v14 }
 0x65a   : > { %2794 = vrcp.f32 %v1971_v20  ;;  %v1965_v43 = vpop.xlane.xlu0 %1964 }
 0x65c   : > { %v1974_v60 = vpop.xlane.xlu1 %1973  ;;  %v2787_v59 = vpop.eup %2786 }
 0x65d   : > { %2796 = vrcp.f32 %v1974_v60  ;;  %v2032_v18 = vmul.f32 %v2787_v59, %v3837_v46  ;;  %v2031_v7 = vmul.f32 %v2787_v59, %v3834_v51 }
 0x660   : > { %v1968_v9 = vpop.xlane.xlu1 %1967 }
 0x661   : > { %2798 = vrcp.f32 %v1968_v9 }
 0x662   : > { %v2789_v61 = vpop.eup %2788  ;;  %2800 = vrcp.f32 %v1965_v43 }
 0x663   : > { %v2034_v39 = vmul.f32 %v2789_v61, %v3853_v12  ;;  %v2033_v49 = vmul.f32 %v2789_v61, %v3849_v35  ;;  %v2791_v55 = vpop.eup %2790  ;;  %v1959_v12 = vpop.xlane.xlu0 %1958 }
 0x664   : > { %v2028_v34 = vmul.f32 %v2791_v55, %v3847_v19  ;;  %v1962_v56 = vpop.xlane.xlu1 %1961  ;;  %v2027_v60 = vmul.f32 %v2791_v55, %v3844_v37 }
 0x665   : > { %v2050_v0 = vpack.c.bf16 %v2034_v39, %v2032_v18  ;;  %v2049_v26 = vpack.c.bf16 %v2033_v49, %v2031_v7  ;;  %2802 = vrcp.f32 %v1962_v56 }
 0x666   : > { %v2793_v57 = vpop.eup %2792  ;;  %2804 = vrcp.f32 %v1959_v12 }
 0x667   : > { %2067 = vmatprep.subr.bf16.mxu1 %v2050_v0  ;;  %v2030_v29 = vmul.f32 %v2793_v57, %v3869_v33  ;;  %v2795_v46 = vpop.eup %2794  ;;  %v2029_v51 = vmul.f32 %v2793_v57, %v3865_v21  ;;  %v1953_v18 = vpop.xlane.xlu0 %1952 }
 0x668   : > { %2068 = vmatpush1.bf16.xpose.msra.mxu1 %v2049_v26  ;;  %v2024_v59 = vmul.f32 %v2795_v46, %v3863_v23  ;;  %v1956_v61 = vpop.xlane.xlu1 %1955 }
 0x669   : > { %v2048_v14 = vpack.c.bf16 %v2030_v29, %v2028_v34  ;;  %v2047_v19 = vpack.c.bf16 %v2029_v51, %v2027_v60  ;;  %2806 = vrcp.f32 %v1956_v61 }
 0x66a   : > { %v2797_v20 = vpop.eup %2796  ;;  %2808 = vrcp.f32 %v1953_v18 }
 0x66b   : > { %2069 = vmatprep.subr.bf16.mxu1 %v2048_v14  ;;  %v2026_v35 = vmul.f32 %v2797_v20, %v3885_v28  ;;  %v2025_v39 = vmul.f32 %v2797_v20, %v3881_v44  ;;  %v2023_v28 = vmul.f32 %v2795_v46, %v3858_v16  ;;  %v1947_v26 = vpop.xlane.xlu0 %1946 }
 0x66c   : > { %v1950_v55 = vpop.xlane.xlu1 %1949 }
 0x66d   : > { %v2046_v9 = vpack.c.bf16 %v2026_v35, %v2024_v59  ;;  %v2045_v7 = vpack.c.bf16 %v2025_v39, %v2023_v28  ;;  %2810 = vrcp.f32 %v1950_v55  ;;  %v2056_v28 = vld [vmem:[%s3705_s30 + $0x58] sm:$0xff] }
 0x66e   : > { %v2799_v33 = vpop.eup %2798  ;;  %2812 = vrcp.f32 %v1947_v26 }
 0x66f   : > { %v2801_v43 = vpop.eup %2800  ;;  %v2022_v21 = vmul.f32 %v2799_v33, %v3899_v40  ;;  %v2021_v57 = vmul.f32 %v2799_v33, %v3895_v11  ;;  %v1941_v14 = vpop.xlane.xlu0 %1940 }
 0x670   : > { %2070 = vmatpush1.bf16.xpose.msra.mxu1 %v2047_v19  ;;  %v2020_v37 = vmul.f32 %v2801_v43, %v3879_v2  ;;  %v2019_v40 = vmul.f32 %v2801_v43, %v3874_v31  ;;  %v1944_v56 = vpop.xlane.xlu1 %1943 }
 0x671   : > { %2071 = vmatprep.subr.bf16.mxu1 %v2046_v9  ;;  %2814 = vrcp.f32 %v1944_v56 }
 0x672   : > { %v2044_v23 = vpack.c.bf16 %v2022_v21, %v2020_v37  ;;  %v2803_v49 = vpop.eup %2802  ;;  %v2043_v34 = vpack.c.bf16 %v2021_v57, %v2019_v40  ;;  %2816 = vrcp.f32 %v1941_v14  ;;  %v2058_v57 = vld [vmem:[%s3705_s30 + $0x78] sm:$0xff] }
 0x673   : > { %v2805_v0 = vpop.eup %2804  ;;  %v2018_v44 = vmul.f32 %v2803_v49, %v3911_v27  ;;  %v2017_v20 = vmul.f32 %v2803_v49, %v3907_v50  ;;  %v2057_v49 = vld [vmem:[%s3705_s30 + $0x68] sm:$0xff] }
 0x674   : > { %v2016_v16 = vmul.f32 %v2805_v0, %v3893_v63  ;;  %v2015_v27 = vmul.f32 %v2805_v0, %v3889_v4 }
 0x676   : > { %v2042_v2 = vpack.c.bf16 %v2018_v44, %v2016_v16  ;;  %v2807_v29 = vpop.eup %2806  ;;  %v2041_v12 = vpack.c.bf16 %v2017_v20, %v2015_v27  ;;  %v2061_v27 = vld [vmem:[%s3705_s30 + $0xa8] sm:$0xff] }
 0x677   : > { %v2809_v46 = vpop.eup %2808  ;;  %v2014_v11 = vmul.f32 %v2807_v29, %v3923_v8  ;;  %v2013_v60 = vmul.f32 %v2807_v29, %v3919_v41 }
 0x678   : > { %2072 = vmatpush1.bf16.xpose.msra.mxu1 %v2045_v7  ;;  %v2012_v31 = vmul.f32 %v2809_v46, %v3905_v13  ;;  %v2011_v50 = vmul.f32 %v2809_v46, %v3901_v3  ;;  %v2060_v46 = vld [vmem:[%s3705_s30 + $0x98] sm:$0xff] }
 0x679   : > { %2073 = vmatprep.subr.bf16.mxu1 %v2044_v23 }
 0x67a   : > { %v2040_v63 = vpack.c.bf16 %v2014_v11, %v2012_v31  ;;  %v2811_v51 = vpop.eup %2810  ;;  %v2039_v8 = vpack.c.bf16 %v2013_v60, %v2011_v50  ;;  %v2063_v50 = vld [vmem:[%s3705_s30 + $0xc8] sm:$0xff] }
 0x67b   : > { %v2813_v35 = vpop.eup %2812  ;;  %v2010_v59 = vmul.f32 %v2811_v51, %v3935_v32  ;;  %v2009_v33 = vmul.f32 %v2811_v51, %v3931_v38  ;;  %v2055_v38 = vld [vmem:[%s3705_s30 + $0x48] sm:$0xff]  ;;  %v2062_v51 = vld [vmem:[%s3705_s30 + $0xb8] sm:$0xff] }
 0x67c   : > { %v2008_v19 = vmul.f32 %v2813_v35, %v3917_v58  ;;  %v2007_v43 = vmul.f32 %v2813_v35, %v3913_v54 }
 0x67e   : > { %v2038_v9 = vpack.c.bf16 %v2010_v59, %v2008_v19  ;;  %v2815_v4 = vpop.eup %2814  ;;  %v2037_v18 = vpack.c.bf16 %v2009_v33, %v2007_v43  ;;  %v2065_v43 = vld [vmem:[%s3705_s30 + $0xe8] sm:$0xff] }
 0x67f   : > { %v2817_v13 = vpop.eup %2816  ;;  %v2006_v61 = vmul.f32 %v2815_v4, %v3941_v15  ;;  %v2005_v3 = vmul.f32 %v2815_v4, %v3937_v52  ;;  %v2064_v4 = vld [vmem:[%s3705_s30 + $0xd8] sm:$0xff] }
 0x680   : > { %2074 = vmatpush1.bf16.xpose.msra.mxu1 %v2043_v34  ;;  %v2004_v41 = vmul.f32 %v2817_v13, %v3929_v47  ;;  %v2003_v58 = vmul.f32 %v2817_v13, %v3925_v24  ;;  %v2059_v34 = vld [vmem:[%s3705_s30 + $0x88] sm:$0xff] }
 0x681   : > { %2075 = vmatprep.subr.bf16.mxu1 %v2042_v2 }
 0x682   : > { %v2036_v32 = vpack.c.bf16 %v2006_v61, %v2004_v41  ;;  %v2035_v39 = vpack.c.bf16 %v2005_v3, %v2003_v58  ;;  %v2066_v3 = vld [vmem:[%s3705_s30 + $0xf8] sm:$0xff] }
 0x688   : > { %2076 = vmatpush1.bf16.xpose.msra.mxu1 %v2041_v12 }
 0x689   : > { %2077 = vmatprep.subr.bf16.mxu1 %v2040_v63 }
 0x690   : > { %2078 = vmatpush1.bf16.xpose.msra.mxu1 %v2039_v8 }
 0x691   : > { %2079 = vmatprep.subr.bf16.mxu1 %v2038_v9 }
 0x698   : > { %2080 = vmatpush1.bf16.xpose.msra.mxu1 %v2037_v18 }
 0x699   : > { %2081 = vmatprep.subr.bf16.mxu1 %v2036_v32 }
 0x6a0   : > { %2082 = vmatpush1.bf16.xpose.msra.mxu1 %v2035_v39 }
 0x6a7   : > { %2100 = vmatmul.mubr.bf16.vlgmr.msra.gmra.mxu1 %v3638_v5  ;;  %v4160_v5 = vld [vmem:[#allocation29_spill] sm:$0xff] }
 0x6a8   : > { %2107 = vmatprep.mubr.bf16.mxu1 %v3640_v25  ;;  %v2051_v25 = vld [vmem:[%s3705_s30 + $0x8] sm:$0xff] }
 0x6af   : > { %2108 = vmatmul.mubr.bf16.gmra.mxu1 %v3646_v45 }
 0x6b0   : > { %2115 = vmatprep.mubr.bf16.mxu1 %v3648_v48 }
 0x6b7   : > { %2116 = vmatmul.mubr.bf16.gmra.mxu1 %v3654_v53 }
 0x6b8   : > { %2123 = vmatprep.mubr.bf16.mxu1 %v3656_v36  ;;  %v2052_v36 = vld [vmem:[%s3705_s30 + $0x18] sm:$0xff] }
 0x6bf   : > { %2124 = vmatmul.mubr.bf16.gmra.mxu1 %v3662_v30 }
 0x6c0   : > { %2131 = vmatprep.mubr.bf16.mxu1 %v3664_v17 }
 0x6c7   : > { %2132 = vmatmul.mubr.bf16.gmra.mxu1 %v3670_v10 }
 0x6c8   : > { %2139 = vmatprep.mubr.bf16.mxu1 %v3672_v1  ;;  %v2053_v1 = vld [vmem:[%s3705_s30 + $0x28] sm:$0xff] }
 0x6cf   : > { %2140 = vmatmul.mubr.bf16.gmra.mxu1 %v3678_v42 }
 0x6d0   : > { %2147 = vmatprep.mubr.bf16.mxu1 %v3680_v22 }
 0x6d7   : > { %2148 = vmatmul.mubr.bf16.gmra.mxu1 %v3686_v62 }
 0x6d8   : > { %2155 = vmatprep.mubr.bf16.mxu1 %v3688_v6  ;;  %v2054_v6 = vld [vmem:[%s3705_s30 + $0x38] sm:$0xff] }
 0x6df   : > { %2156 = vmatmul.mubr.bf16.gmra.mxu1 %v4160_v5 }
 0x767   : > { %v2101_v45 = vpop.f32.mrf.mxu1 }
 0x768   : > { %v2102_v48 = vadd.f32 %v2101_v45, %v2051_v25 }
 0x769   : > { %v2103_v53 = vpop.f32.mrf.mxu1 }
 0x76a   : > { %2164 = vst [vmem:[%s3712_s11 + $0x8] sm:$0xff] %v2102_v48 }
 0x76b   : > { %v2104_v30 = vpop.f32.mrf.mxu1 }
 0x76c   : > { %v2105_v17 = vadd.f32 %v2104_v30, %v2052_v36 }
 0x76d   : > { %v2106_v10 = vpop.f32.mrf.mxu1 }
 0x76e   : > { %2165 = vst [vmem:[%s3712_s11 + $0x18] sm:$0xff] %v2105_v17 }
 0x76f   : > { %v2109_v42 = vpop.f32.mrf.mxu1 }
 0x770   : > { %v2110_v22 = vadd.f32 %v2109_v42, %v2053_v1 }
 0x771   : > { %v2111_v62 = vpop.f32.mrf.mxu1 }
 0x772   : > { %2166 = vst [vmem:[%s3712_s11 + $0x28] sm:$0xff] %v2110_v22 }
 0x773   : > { %v2112_v54 = vpop.f32.mrf.mxu1 }
 0x774   : > { %v2113_v24 = vadd.f32 %v2112_v54, %v2054_v6 }
 0x775   : > { %v2114_v47 = vpop.f32.mrf.mxu1 }
 0x776   : > { %2167 = vst [vmem:[%s3712_s11 + $0x38] sm:$0xff] %v2113_v24 }
 0x777   : > { %v2117_v52 = vpop.f32.mrf.mxu1 }
 0x778   : > { %v2118_v15 = vadd.f32 %v2117_v52, %v2055_v38 }
 0x779   : > { %v2119_v21 = vpop.f32.mrf.mxu1 }
 0x77a   : > { %2168 = vst [vmem:[%s3712_s11 + $0x48] sm:$0xff] %v2118_v15 }
 0x77b   : > { %v2120_v37 = vpop.f32.mrf.mxu1 }
 0x77c   : > { %v2121_v7 = vadd.f32 %v2120_v37, %v2056_v28 }
 0x77d   : > { %v2122_v23 = vpop.f32.mrf.mxu1 }
 0x77e   : > { %2169 = vst [vmem:[%s3712_s11 + $0x58] sm:$0xff] %v2121_v7 }
 0x77f   : > { %v2125_v55 = vpop.f32.mrf.mxu1 }
 0x780   : > { %v2126_v0 = vadd.f32 %v2125_v55, %v2057_v49 }
 0x781   : > { %v2127_v26 = vpop.f32.mrf.mxu1 }
 0x782   : > { %2170 = vst [vmem:[%s3712_s11 + $0x68] sm:$0xff] %v2126_v0 }
 0x783   : > { %v2128_v44 = vpop.f32.mrf.mxu1 }
 0x784   : > { %v2129_v40 = vadd.f32 %v2128_v44, %v2058_v57 }
 0x785   : > { %v2130_v16 = vpop.f32.mrf.mxu1 }
 0x786   : > { %2171 = vst [vmem:[%s3712_s11 + $0x78] sm:$0xff] %v2129_v40 }
 0x787   : > { %v2133_v2 = vpop.f32.mrf.mxu1 }
 0x788   : > { %v2134_v29 = vadd.f32 %v2133_v2, %v2059_v34 }
 0x789   : > { %v2135_v56 = vpop.f32.mrf.mxu1 }
 0x78a   : > { %2172 = vst [vmem:[%s3712_s11 + $0x88] sm:$0xff] %v2134_v29 }
 0x78b   : > { %v2136_v14 = vpop.f32.mrf.mxu1 }
 0x78c   : > { %v2137_v20 = vadd.f32 %v2136_v14, %v2060_v46 }
 0x78d   : > { %v2138_v11 = vpop.f32.mrf.mxu1 }
 0x78e   : > { %2173 = vst [vmem:[%s3712_s11 + $0x98] sm:$0xff] %v2137_v20 }
 0x78f   : > { %v2141_v31 = vpop.f32.mrf.mxu1 }
 0x790   : > { %v2142_v12 = vadd.f32 %v2141_v31, %v2061_v27 }
 0x791   : > { %v2143_v63 = vpop.f32.mrf.mxu1 }
 0x792   : > { %2174 = vst [vmem:[%s3712_s11 + $0xa8] sm:$0xff] %v2142_v12 }
 0x793   : > { %v2144_v35 = vpop.f32.mrf.mxu1 }
 0x794   : > { %v2145_v60 = vadd.f32 %v2144_v35, %v2062_v51 }
 0x795   : > { %v2146_v59 = vpop.f32.mrf.mxu1 }
 0x796   : > { %2175 = vst [vmem:[%s3712_s11 + $0xb8] sm:$0xff] %v2145_v60 }
 0x797   : > { %v2149_v19 = vpop.f32.mrf.mxu1 }
 0x798   : > { %v2150_v8 = vadd.f32 %v2149_v19, %v2063_v50 }
 0x799   : > { %v2151_v9 = vpop.f32.mrf.mxu1 }
 0x79a   : > { %2176 = vst [vmem:[%s3712_s11 + $0xc8] sm:$0xff] %v2150_v8 }
 0x79b   : > { %v2152_v13 = vpop.f32.mrf.mxu1 }
 0x79c   : > { %v2153_v33 = vadd.f32 %v2152_v13, %v2064_v4 }
 0x79d   : > { %v2154_v61 = vpop.f32.mrf.mxu1 }
 0x79e   : > { %2177 = vst [vmem:[%s3712_s11 + $0xd8] sm:$0xff] %v2153_v33 }
 0x79f   : > { %v2157_v41 = vpop.f32.mrf.mxu1 }
 0x7a0   : > { %v2158_v18 = vadd.f32 %v2157_v41, %v2065_v43 }
 0x7a1   : > { %v2159_v32 = vpop.f32.mrf.mxu1 }
 0x7a2   : > { %2178 = vst [vmem:[%s3712_s11 + $0xe8] sm:$0xff] %v2158_v18 }
 0x7a3   : > { %v2160_v58 = vpop.f32.mrf.mxu1 }
 0x7a4   : > { %v2161_v39 = vadd.f32 %v2160_v58, %v2066_v3 }
 0x7a5   : > { %v2162_v5 = vpop.f32.mrf.mxu1 }
 0x7a6   : > { %2179 = vst [vmem:[%s3712_s11 + $0xf8] sm:$0xff] %v2161_v39 }
 0x7a7 PF: > { %s18_s27 = sadd.s32 1, %s2825_s27  }
 0x7a8   : > { %p15_p4 = scmp.ge.s32.totalorder %s18_s27, 6  }
 0x7aa   :  { %17 = sbr.rel (!%p15_p4) target bundleno = 1 (0x1), region = 85 }

</bundles_post_ra>
